<compile_context>
chip_gen: v5e
topology: v5e:2x2
jax: 0.10.0
libtpu: 0.0.40
codegen_flags: <defaults>
</compile_context>

<pallas_src>
import math
import functools

import jax
import jax.numpy as jnp
from jax.experimental import pallas as pl
from jax.experimental.pallas import tpu as pltpu


# ----------------------------------------------------------------------------
# GRU-D kernels
# ----------------------------------------------------------------------------
def _grud_precompute_kernel(x_ref, m_ref, d_ref, xm_ref, wd_ref, bd_ref,
                            whd_ref, bhd_ref, wihx_ref, wihm_ref, bih_ref,
                            gi_ref, gh_ref):
    """Batched (B*T, ...) precompute of all non-recurrent GRU-D work."""
    x = x_ref[...]
    m = m_ref[...]
    d = d_ref[...]
    # per-feature input decay: gamma_x = exp(-relu(d * w + b))   (Linear(1,1) per feature)
    gamma_x = jnp.exp(-jnp.maximum(d * wd_ref[...] + bd_ref[...], 0.0))
    x_hat = (m * x
             + (1.0 - m) * gamma_x * x
             + (1.0 - m) * (1.0 - gamma_x) * xm_ref[...])
    # input-side GRU gate pre-activations, hoisted out of the serial recurrence
    gi_ref[...] = (jnp.dot(x_hat, wihx_ref[...], preferred_element_type=jnp.float32)
                   + jnp.dot(m, wihm_ref[...], preferred_element_type=jnp.float32)
                   + bih_ref[...])
    # hidden decay: gamma_h = exp(-relu(Linear(V -> D)(d)))
    gh_ref[...] = jnp.exp(-jnp.maximum(
        jnp.dot(d, whd_ref[...], preferred_element_type=jnp.float32)
        + bhd_ref[...], 0.0))


def _grud_recurrence_kernel(gi_ref, gh_ref, whh_ref, bhh_ref, h0_ref, out_ref,
                            *, seq_len, hidden_dim):
    """Serial recurrence: one kernel invocation, static time loop.

    NOTE: state is carried across timesteps inside the kernel, so this must
    never be split over a "parallel" time grid (there is no grid here at all).
    """
    D = hidden_dim
    whh = whh_ref[...]                 # (D, 3D)
    bhh = bhh_ref[...]                 # (1, 3D)
    gi_all = gi_ref[...]               # (B, T, 3D)  precomputed
    gh_all = gh_ref[...]               # (B, T, D)   precomputed decay
    h = h0_ref[...]                    # (B, D)
    hs = []
    for t in range(seq_len):           # static unroll; only h @ Whh is serial
        h = gh_all[:, t, :] * h
        gh = jnp.dot(h, whh, preferred_element_type=jnp.float32) + bhh
        gi = gi_all[:, t, :]
        r = jax.nn.sigmoid(gi[:, 0:D] + gh[:, 0:D])
        z = jax.nn.sigmoid(gi[:, D:2 * D] + gh[:, D:2 * D])
        n = jnp.tanh(gi[:, 2 * D:3 * D] + r * gh[:, 2 * D:3 * D])
        h = (1.0 - z) * n + z * h
        hs.append(h)
    out_ref[...] = jnp.stack(hs, axis=1).astype(out_ref.dtype)   # (B, T, D)


def grud_sequence(x, m, d, x_m, gp, h0):
    """GRU-D recurrence.  x, m, d: (B, T, V); h0: (B, D) -> (B, T, D)."""
    B, T, V = x.shape
    D = h0.shape[1]
    xf = x.reshape(B * T, V).astype(jnp.float32)
    mf = m.reshape(B * T, V).astype(jnp.float32)
    df = d.reshape(B * T, V).astype(jnp.float32)

    gi, gh = pl.pallas_call(
        _grud_precompute_kernel,
        out_shape=(jax.ShapeDtypeStruct((B * T, 3 * D), jnp.float32),
                   jax.ShapeDtypeStruct((B * T, D), jnp.float32)),
    )(xf, mf, df, x_m.reshape(1, V).astype(jnp.float32),
      gp["wd"], gp["bd"], gp["whd"], gp["bhd"],
      gp["wih_x"], gp["wih_m"], gp["bih"])

    emb = pl.pallas_call(
        functools.partial(_grud_recurrence_kernel, seq_len=T, hidden_dim=D),
        out_shape=jax.ShapeDtypeStruct((B, T, D), jnp.float32),
    )(gi.reshape(B, T, 3 * D), gh.reshape(B, T, D),
      gp["whh"], gp["bhh"], h0.astype(jnp.float32))
    return emb


# ----------------------------------------------------------------------------
# Fused transformer-encoder kernels
# ----------------------------------------------------------------------------
def _linear_ln_kernel(x_ref, w_ref, b_ref, g_ref, beta_ref, o_ref):
    y = (jnp.dot(x_ref[...], w_ref[...], preferred_element_type=jnp.float32)
         + b_ref[...])
    mu = jnp.mean(y, axis=-1, keepdims=True)
    var = jnp.mean((y - mu) ** 2, axis=-1, keepdims=True)
    o_ref[...] = ((y - mu) * jax.lax.rsqrt(var + 1e-5) * g_ref[...]
                  + beta_ref[...]).astype(o_ref.dtype)


def linear_ln(x2d, w, b, g, beta):
    M = x2d.shape[0]
    N = w.shape[1]
    return pl.pallas_call(
        _linear_ln_kernel,
        out_shape=jax.ShapeDtypeStruct((M, N), jnp.float32),
    )(x2d, w, b.reshape(1, N), g.reshape(1, N), beta.reshape(1, N))


def _linear_resid_ln_mask_kernel(x_ref, res_ref, w_ref, b_ref, g_ref, beta_ref,
                                 mask_ref, o_ref):
    y = (jnp.dot(x_ref[...], w_ref[...], preferred_element_type=jnp.float32)
         + b_ref[...] + res_ref[...])
    mu = jnp.mean(y, axis=-1, keepdims=True)
    var = jnp.mean((y - mu) ** 2, axis=-1, keepdims=True)
    y = (y - mu) * jax.lax.rsqrt(var + 1e-5) * g_ref[...] + beta_ref[...]
    o_ref[...] = (y * mask_ref[...]).astype(o_ref.dtype)


def linear_resid_ln_mask(x2d, res2d, w, b, g, beta, mask2d):
    M = x2d.shape[0]
    N = w.shape[1]
    return pl.pallas_call(
        _linear_resid_ln_mask_kernel,
        out_shape=jax.ShapeDtypeStruct((M, N), jnp.float32),
    )(x2d, res2d, w, b.reshape(1, N), g.reshape(1, N), beta.reshape(1, N),
      mask2d)


def _ffn_resid_ln_mask_kernel(x_ref, w1_ref, b1_ref, w2_ref, b2_ref,
                              g_ref, beta_ref, mask_ref, o_ref):
    x = x_ref[...]
    h = jnp.maximum(jnp.dot(x, w1_ref[...], preferred_element_type=jnp.float32)
                    + b1_ref[...], 0.0)
    y = (jnp.dot(h, w2_ref[...], preferred_element_type=jnp.float32)
         + b2_ref[...] + x)
    mu = jnp.mean(y, axis=-1, keepdims=True)
    var = jnp.mean((y - mu) ** 2, axis=-1, keepdims=True)
    y = (y - mu) * jax.lax.rsqrt(var + 1e-5) * g_ref[...] + beta_ref[...]
    o_ref[...] = (y * mask_ref[...]).astype(o_ref.dtype)


def ffn_resid_ln_mask(x2d, fp, mask2d):
    M, D = x2d.shape
    dff = fp["w1"].shape[1]
    return pl.pallas_call(
        _ffn_resid_ln_mask_kernel,
        out_shape=jax.ShapeDtypeStruct((M, D), jnp.float32),
    )(x2d, fp["w1"], fp["b1"].reshape(1, dff), fp["w2"], fp["b2"].reshape(1, D),
      fp["ln_g"].reshape(1, D), fp["ln_b"].reshape(1, D), mask2d)


def _mha_kernel(x_ref, wqkv_ref, bqkv_ref, bias_ref, o_ref,
                *, n_head, d_model, scale):
    """Fused QKV projection + all-heads attention for one batch element."""
    x = x_ref[0]                                                 # (L, D)
    qkv = (jnp.dot(x, wqkv_ref[...], preferred_element_type=jnp.float32)
           + bqkv_ref[...])                                      # (L, 3D)
    bias = bias_ref[0]                                           # (L, L) f32
    dk = d_model // n_head
    outs = []
    for h in range(n_head):                                      # static unroll
        q = qkv[:, h * dk:(h + 1) * dk]
        k = qkv[:, d_model + h * dk:d_model + (h + 1) * dk]
        v = qkv[:, 2 * d_model + h * dk:2 * d_model + (h + 1) * dk]
        s = jax.lax.dot_general(q, k, (((1,), (1,)), ((), ())),
                                preferred_element_type=jnp.float32)
        s = s * scale + bias
        s = s - jnp.max(s, axis=-1, keepdims=True)
        p = jnp.exp(s)
        p = p / jnp.sum(p, axis=-1, keepdims=True)
        outs.append(jnp.dot(p, v, preferred_element_type=jnp.float32))
    # head-concatenated dense (L, D) store
    o_ref[0] = jnp.concatenate(outs, axis=-1).astype(o_ref.dtype)


def mha(x, wqkv, bqkv, attn_bias, n_head):
    """x: (B, L, D); attn_bias: (B, L, L) (per batch, shared across heads)."""
    B, L, D = x.shape
    scale = 1.0 / math.sqrt(D // n_head)
    return pl.pallas_call(
        functools.partial(_mha_kernel, n_head=n_head, d_model=D, scale=scale),
        grid=(B,),
        in_specs=[
            pl.BlockSpec((1, L, D), lambda b: (b, 0, 0)),
            pl.BlockSpec((D, 3 * D), lambda b: (0, 0)),
            pl.BlockSpec((1, 3 * D), lambda b: (0, 0)),
            pl.BlockSpec((1, L, L), lambda b: (b, 0, 0)),
        ],
        out_specs=pl.BlockSpec((1, L, D), lambda b: (b, 0, 0)),
        out_shape=jax.ShapeDtypeStruct((B, L, D), jnp.float32),
        compiler_params=pltpu.CompilerParams(
            dimension_semantics=("parallel",)),
    )(x, wqkv, bqkv.reshape(1, 3 * D), attn_bias)


def _heads_kernel(x_ref, w1_ref, b1_ref, s_ref, t_ref, w2_ref, b2_ref, o_ref):
    """All 12 task heads batched: Linear -> BN(eval, folded) -> ReLU -> Linear -> sigmoid."""
    h = (jnp.dot(x_ref[...], w1_ref[...], preferred_element_type=jnp.float32)
         + b1_ref[...])
    h = jnp.maximum(h * s_ref[...] + t_ref[...], 0.0)
    o = (jnp.dot(h, w2_ref[...], preferred_element_type=jnp.float32)
         + b2_ref[...])
    o_ref[...] = jax.nn.sigmoid(o).astype(o_ref.dtype)


# ----------------------------------------------------------------------------
# Transformer encoder (speech-transformer style, post-norm)
# ----------------------------------------------------------------------------
def positional_encoding(length, d_model):
    pos = jnp.arange(length, dtype=jnp.float32)[:, None]
    i = jnp.arange(d_model)[None, :]
    angle = pos / jnp.power(10000.0, (2.0 * (i // 2)) / d_model)
    return jnp.where(i % 2 == 0, jnp.sin(angle), jnp.cos(angle))


def transformer_encoder(x, lengths, p, n_head, classification):
    B, L, Din = x.shape
    if classification:
        cls = jnp.broadcast_to(p["cls_token"], (B, 1, Din))
        x = jnp.concatenate([cls, x], axis=1)
        L = L + 1
    pos = jnp.arange(L)[None, :]
    valid = (pos < lengths[:, None]).astype(jnp.float32)           # (B, L)
    non_pad_mask = valid.reshape(B * L, 1)                         # (B*L, 1)
    # key-padding bias, per batch (NOT tiled over heads); f32, -1e9 safe in f32
    attn_bias = jnp.broadcast_to(
        jnp.where(valid[:, None, :] > 0, 0.0, -1e9), (B, L, L))

    D = p["w_in"].shape[1]
    h = linear_ln(x.reshape(B * L, Din), p["w_in"], p["b_in"],
                  p["ln_in_g"], p["ln_in_b"]).reshape(B, L, D)
    h = h + positional_encoding(L, D)[None]                        # use_pe=True

    for lp in p["layers"]:
        a = lp["attn"]
        attn_out = mha(h, a["wqkv"], a["bqkv"], attn_bias, n_head)  # (B, L, D)
        h2 = linear_resid_ln_mask(attn_out.reshape(B * L, D),
                                  h.reshape(B * L, D),
                                  a["wo"], a["bo"], a["ln_g"], a["ln_b"],
                                  non_pad_mask)
        h = ffn_resid_ln_mask(h2, lp["ffn"], non_pad_mask).reshape(B, L, D)
    return h


# ----------------------------------------------------------------------------
# Parameter construction (deterministic, synthetic)
# ----------------------------------------------------------------------------
class ParamGen:
    def __init__(self, seed=0):
        self._key = jax.random.PRNGKey(seed)

    def normal(self, shape, scale=0.1):
        self._key, sub = jax.random.split(self._key)
        return (scale * jax.random.normal(sub, shape)).astype(jnp.float32)

    def zeros(self, shape):
        return jnp.zeros(shape, jnp.float32)

    def ones(self, shape):
        return jnp.ones(shape, jnp.float32)


def make_encoder_params(pg, d_in, d_model, d_ff, n_layers, classification):
    p = {
        "w_in": pg.normal((d_in, d_model)), "b_in": pg.zeros((d_model,)),
        "ln_in_g": pg.ones((d_model,)), "ln_in_b": pg.zeros((d_model,)),
        "layers": [],
    }
    if classification:
        p["cls_token"] = pg.normal((1, 1, d_in))
    for _ in range(n_layers):
        attn = {"wqkv": pg.normal((d_model, 3 * d_model)),     # [Wq | Wk | Wv]
                "bqkv": pg.zeros((3 * d_model,)),
                "wo": pg.normal((d_model, d_model)), "bo": pg.zeros((d_model,)),
                "ln_g": pg.ones((d_model,)), "ln_b": pg.zeros((d_model,))}
        ffn = {"w1": pg.normal((d_model, d_ff)), "b1": pg.zeros((d_ff,)),
               "w2": pg.normal((d_ff, d_model)), "b2": pg.zeros((d_model,)),
               "ln_g": pg.ones((d_model,)), "ln_b": pg.zeros((d_model,))}
        p["layers"].append({"attn": attn, "ffn": ffn})
    return p


def make_fc_head_params(pg, d_in, n_tasks, nodes):
    w1 = pg.normal((d_in, n_tasks * nodes))
    b1 = pg.zeros((n_tasks * nodes,))
    # BatchNorm1d eval mode (running stats: mean 0, var 1, gamma 1, beta 0)
    bn_g, bn_b = pg.ones((n_tasks * nodes,)), pg.zeros((n_tasks * nodes,))
    bn_mean, bn_var = pg.zeros((n_tasks * nodes,)), pg.ones((n_tasks * nodes,))
    bn_scale = bn_g / jnp.sqrt(bn_var + 1e-5)
    bn_shift = bn_b - bn_mean * bn_scale
    # per-head (64 -> 1) second linears arranged block-diagonally: (12*64, 12)
    w2_heads = pg.normal((n_tasks, nodes))
    w2 = jnp.zeros((n_tasks * nodes, n_tasks), jnp.float32)
    for i in range(n_tasks):
        w2 = w2.at[i * nodes:(i + 1) * nodes, i].set(w2_heads[i])
    b2 = pg.zeros((n_tasks,))
    return {"w1": w1, "b1": b1, "bn_scale": bn_scale, "bn_shift": bn_shift,
            "w2": w2, "b2": b2}


def make_params(pg, V, D, d_ff, vocab, txt_layers, fin_layers, n_tasks):
    grud = {
        "wd": pg.normal((1, V)), "bd": pg.zeros((1, V)),       # per-feature Linear(1,1)
        "whd": pg.normal((V, D)), "bhd": pg.zeros((1, D)),     # hidden_decay Linear(V, D)
        "wih_x": pg.normal((V, 3 * D)), "wih_m": pg.normal((V, 3 * D)),
        "bih": pg.zeros((1, 3 * D)),
        "whh": pg.normal((D, 3 * D)), "bhh": pg.zeros((1, 3 * D)),
    }
    return {
        "grud": grud,
        "txt_embedding": pg.normal((vocab, D)),
        "txt_encoder": make_encoder_params(pg, D, D, d_ff, txt_layers, False),
        "final_encoder": make_encoder_params(pg, D, D, d_ff, fin_layers, True),
        "fc_heads": make_fc_head_params(pg, D + 2, n_tasks, 64),
    }


# ----------------------------------------------------------------------------
# Full forward pass
# ----------------------------------------------------------------------------
def forward(params, x, h0, m, d, x_m, age, gen, input_lengths, txts,
            txt_lengths, *, txt_num_heads, num_heads):
    B, T, V = x.shape

    # GRU-D over the vital-sign sequence (2 Pallas calls: batched precompute +
    # single-invocation recurrence).
    emb = grud_sequence(x, m, d, x_m, params["grud"], h0)        # (B, T, D)

    # TODO(synk): embedding gather done with jnp indexing (no clean Pallas gather).
    txt_emb = params["txt_embedding"][txts]                      # (B, L, D)
    txt_out = transformer_encoder(txt_emb, txt_lengths,
                                  params["txt_encoder"],
                                  txt_num_heads, classification=False)

    final_in = jnp.concatenate([emb, txt_out], axis=1)           # (B, T+L, D)
    final_out = transformer_encoder(final_in, txt_lengths + T + 1,
                                    params["final_encoder"],
                                    num_heads, classification=True)
    cls = final_out[:, 0]                                        # (B, D)

    class_input = jnp.concatenate(
        [cls, age[:, None].astype(jnp.float32),
         gen[:, None].astype(jnp.float32)], axis=1)              # (B, D+2)

    hp = params["fc_heads"]
    n_tasks = hp["w2"].shape[1]
    probs = pl.pallas_call(                                      # all 12 heads, 1 call
        _heads_kernel,
        out_shape=jax.ShapeDtypeStruct((B, n_tasks), jnp.float32),
    )(class_input, hp["w1"], hp["b1"].reshape(1, -1),
      hp["bn_scale"].reshape(1, -1), hp["bn_shift"].reshape(1, -1),
      hp["w2"], hp["b2"].reshape(1, -1))
    return jnp.transpose(probs)[:, :, None]                      # (12, B, 1)


# ----------------------------------------------------------------------------
# Demo
# ----------------------------------------------------------------------------
if __name__ == "__main__":
    # small config: vslt_input_size=6, model_dim=32, 1 layer / 2 heads per
    # encoder, d_ff=64, character tokenization (vocab=42), 12 tasks.
    B, T, V, D = 2, 4, 6, 32
    L_TXT, VOCAB, D_FF = 8, 42, 64
    TXT_HEADS, TXT_LAYERS = 2, 1
    FIN_HEADS, FIN_LAYERS = 2, 1
    N_TASKS = 12

    pg = ParamGen(seed=0)
    params = make_params(pg, V, D, D_FF, VOCAB, TXT_LAYERS, FIN_LAYERS, N_TASKS)

    key = jax.random.PRNGKey(0)
    keys = jax.random.split(key, 10)
    x = jax.random.normal(keys[0], (B, T, V), dtype=jnp.float32)
    h0 = jax.random.normal(keys[1], (B, D), dtype=jnp.float32)
    m = jax.random.bernoulli(keys[2], 0.7, (B, T, V)).astype(jnp.float32)
    d_in = jax.random.uniform(keys[3], (B, T, V), dtype=jnp.float32) * 2.0
    x_m = jax.random.normal(keys[4], (V,), dtype=jnp.float32)
    age = jax.random.uniform(keys[5], (B,), dtype=jnp.float32)
    gen = jax.random.bernoulli(keys[6], 0.5, (B,)).astype(jnp.float32)
    input_lengths = jnp.full((B,), T, dtype=jnp.int32)
    txts = jax.random.randint(keys[7], (B, L_TXT), 1, VOCAB, dtype=jnp.int32)
    txt_lengths = jnp.array([L_TXT, 5], dtype=jnp.int32)
    # zero out padded text tokens (cosmetic; masking is length-based)
    txts = jnp.where(jnp.arange(L_TXT)[None, :] < txt_lengths[:, None], txts, 0)

    fwd = jax.jit(functools.partial(forward,
                                    txt_num_heads=TXT_HEADS,
                                    num_heads=FIN_HEADS))
    out = fwd(params, x, h0, m, d_in, x_m, age, gen,
              input_lengths, txts, txt_lengths)
    out = jax.block_until_ready(out)
    assert out.shape == (N_TASKS, B, 1)
    assert bool(jnp.all(jnp.isfinite(out)))
    print("KERNEL_OK")
</pallas_src>

<mosaic_0001>
module attributes {stable_mosaic.version = 11 : i64} {
  func.func @_linear_ln_kernel(%arg0: memref<16x32xf32, #tpu.memory_space<vmem>>, %arg1: memref<32x32xf32, #tpu.memory_space<vmem>>, %arg2: memref<1x32xf32, #tpu.memory_space<vmem>>, %arg3: memref<1x32xf32, #tpu.memory_space<vmem>>, %arg4: memref<1x32xf32, #tpu.memory_space<vmem>>, %arg5: memref<16x32xf32, #tpu.memory_space<vmem>>) attributes {dimension_semantics = [], scalar_prefetch = 0 : i64, scratch_operands = 0 : i64, tpu.core_type = #tpu.core_type<tc>} {
    %c0 = arith.constant 0 : index
    %c0_0 = arith.constant 0 : index
    %0 = vector.load %arg0[%c0, %c0_0] : memref<16x32xf32, #tpu.memory_space<vmem>>, vector<16x32xf32>
    %c0_1 = arith.constant 0 : index
    %c0_2 = arith.constant 0 : index
    %1 = vector.load %arg1[%c0_1, %c0_2] : memref<32x32xf32, #tpu.memory_space<vmem>>, vector<32x32xf32>
    %cst = arith.constant dense<0.000000e+00> : vector<16x32xf32>
    %2 = tpu.matmul %0, %1, %cst {dimension_numbers = #tpu.dot_dimension_numbers<[1], [0], [0], [1], [0, 0, 1, 1], [], []>} : vector<16x32xf32>, vector<32x32xf32>, vector<16x32xf32> -> vector<16x32xf32>
    %c0_3 = arith.constant 0 : index
    %c0_4 = arith.constant 0 : index
    %3 = vector.load %arg2[%c0_3, %c0_4] : memref<1x32xf32, #tpu.memory_space<vmem>>, vector<1x32xf32>
    %4 = vector.broadcast %3 : vector<1x32xf32> to vector<16x32xf32>
    %5 = arith.addf %2, %4 : vector<16x32xf32>
    %cst_5 = arith.constant dense<0.000000e+00> : vector<16xf32>
    %6 = vector.multi_reduction <add>, %5, %cst_5 [1] : vector<16x32xf32> to vector<16xf32>
    %7 = vector.shape_cast %6 : vector<16xf32> to vector<16x1xf32>
    %cst_6 = arith.constant 3.200000e+01 : f32
    %8 = vector.broadcast %cst_6 : f32 to vector<16x1xf32>
    %9 = arith.divf %7, %8 : vector<16x1xf32>
    %10 = vector.broadcast %9 : vector<16x1xf32> to vector<16x32xf32>
    %11 = arith.subf %5, %10 : vector<16x32xf32>
    %12 = arith.mulf %11, %11 : vector<16x32xf32>
    %cst_7 = arith.constant dense<0.000000e+00> : vector<16xf32>
    %13 = vector.multi_reduction <add>, %12, %cst_7 [1] : vector<16x32xf32> to vector<16xf32>
    %14 = vector.shape_cast %13 : vector<16xf32> to vector<16x1xf32>
    %cst_8 = arith.constant 3.200000e+01 : f32
    %15 = vector.broadcast %cst_8 : f32 to vector<16x1xf32>
    %16 = arith.divf %14, %15 : vector<16x1xf32>
    %17 = vector.broadcast %9 : vector<16x1xf32> to vector<16x32xf32>
    %18 = arith.subf %5, %17 : vector<16x32xf32>
    %cst_9 = arith.constant 9.99999974E-6 : f32
    %19 = vector.broadcast %cst_9 : f32 to vector<16x1xf32>
    %20 = arith.addf %16, %19 : vector<16x1xf32>
    %21 = math.rsqrt %20 : vector<16x1xf32>
    %22 = vector.broadcast %21 : vector<16x1xf32> to vector<16x32xf32>
    %23 = arith.mulf %18, %22 : vector<16x32xf32>
    %c0_10 = arith.constant 0 : index
    %c0_11 = arith.constant 0 : index
    %24 = vector.load %arg3[%c0_10, %c0_11] : memref<1x32xf32, #tpu.memory_space<vmem>>, vector<1x32xf32>
    %25 = vector.broadcast %24 : vector<1x32xf32> to vector<16x32xf32>
    %26 = arith.mulf %23, %25 : vector<16x32xf32>
    %c0_12 = arith.constant 0 : index
    %c0_13 = arith.constant 0 : index
    %27 = vector.load %arg4[%c0_12, %c0_13] : memref<1x32xf32, #tpu.memory_space<vmem>>, vector<1x32xf32>
    %28 = vector.broadcast %27 : vector<1x32xf32> to vector<16x32xf32>
    %29 = arith.addf %26, %28 : vector<16x32xf32>
    %c0_14 = arith.constant 0 : index
    %c0_15 = arith.constant 0 : index
    %30 = vector.load %arg5[%c0_14, %c0_15] : memref<16x32xf32, #tpu.memory_space<vmem>>, vector<16x32xf32>
    tpu.vector_store %arg5[%c0_14, %c0_15], %29 {strides = array<i32>} : memref<16x32xf32, #tpu.memory_space<vmem>>, vector<16x32xf32>,
    return
  }
}

module attributes {stable_mosaic.version = 11 : i64} {
  func.func @_grud_precompute_kernel(%arg0: memref<8x6xf32, #tpu.memory_space<vmem>>, %arg1: memref<8x6xf32, #tpu.memory_space<vmem>>, %arg2: memref<8x6xf32, #tpu.memory_space<vmem>>, %arg3: memref<1x6xf32, #tpu.memory_space<vmem>>, %arg4: memref<1x6xf32, #tpu.memory_space<vmem>>, %arg5: memref<1x6xf32, #tpu.memory_space<vmem>>, %arg6: memref<6x32xf32, #tpu.memory_space<vmem>>, %arg7: memref<1x32xf32, #tpu.memory_space<vmem>>, %arg8: memref<6x96xf32, #tpu.memory_space<vmem>>, %arg9: memref<6x96xf32, #tpu.memory_space<vmem>>, %arg10: memref<1x96xf32, #tpu.memory_space<vmem>>, %arg11: memref<8x96xf32, #tpu.memory_space<vmem>>, %arg12: memref<8x32xf32, #tpu.memory_space<vmem>>) attributes {dimension_semantics = [], scalar_prefetch = 0 : i64, scratch_operands = 0 : i64, tpu.core_type = #tpu.core_type<tc>} {
    %c0 = arith.constant 0 : index
    %c0_0 = arith.constant 0 : index
    %0 = vector.load %arg0[%c0, %c0_0] : memref<8x6xf32, #tpu.memory_space<vmem>>, vector<8x6xf32>
    %c0_1 = arith.constant 0 : index
    %c0_2 = arith.constant 0 : index
    %1 = vector.load %arg1[%c0_1, %c0_2] : memref<8x6xf32, #tpu.memory_space<vmem>>, vector<8x6xf32>
    %c0_3 = arith.constant 0 : index
    %c0_4 = arith.constant 0 : index
    %2 = vector.load %arg2[%c0_3, %c0_4] : memref<8x6xf32, #tpu.memory_space<vmem>>, vector<8x6xf32>
    %c0_5 = arith.constant 0 : index
    %c0_6 = arith.constant 0 : index
    %3 = vector.load %arg4[%c0_5, %c0_6] : memref<1x6xf32, #tpu.memory_space<vmem>>, vector<1x6xf32>
    %4 = vector.broadcast %3 : vector<1x6xf32> to vector<8x6xf32>
    %5 = arith.mulf %2, %4 : vector<8x6xf32>
    %c0_7 = arith.constant 0 : index
    %c0_8 = arith.constant 0 : index
    %6 = vector.load %arg5[%c0_7, %c0_8] : memref<1x6xf32, #tpu.memory_space<vmem>>, vector<1x6xf32>
    %7 = vector.broadcast %6 : vector<1x6xf32> to vector<8x6xf32>
    %8 = arith.addf %5, %7 : vector<8x6xf32>
    %cst = arith.constant 0.000000e+00 : f32
    %9 = vector.broadcast %cst : f32 to vector<8x6xf32>
    %10 = arith.maximumf %8, %9 : vector<8x6xf32>
    %cst_9 = arith.constant 0.000000e+00 : f32
    %11 = vector.broadcast %cst_9 : f32 to vector<8x6xf32>
    %12 = arith.subf %11, %10 : vector<8x6xf32>
    %13 = math.exp %12 : vector<8x6xf32>
    %14 = arith.mulf %1, %0 : vector<8x6xf32>
    %cst_10 = arith.constant 1.000000e+00 : f32
    %15 = vector.broadcast %cst_10 : f32 to vector<8x6xf32>
    %16 = arith.subf %15, %1 : vector<8x6xf32>
    %17 = arith.mulf %16, %13 : vector<8x6xf32>
    %18 = arith.mulf %17, %0 : vector<8x6xf32>
    %19 = arith.addf %14, %18 : vector<8x6xf32>
    %cst_11 = arith.constant 1.000000e+00 : f32
    %20 = vector.broadcast %cst_11 : f32 to vector<8x6xf32>
    %21 = arith.subf %20, %1 : vector<8x6xf32>
    %cst_12 = arith.constant 1.000000e+00 : f32
    %22 = vector.broadcast %cst_12 : f32 to vector<8x6xf32>
    %23 = arith.subf %22, %13 : vector<8x6xf32>
    %24 = arith.mulf %21, %23 : vector<8x6xf32>
    %c0_13 = arith.constant 0 : index
    %c0_14 = arith.constant 0 : index
    %25 = vector.load %arg3[%c0_13, %c0_14] : memref<1x6xf32, #tpu.memory_space<vmem>>, vector<1x6xf32>
    %26 = vector.broadcast %25 : vector<1x6xf32> to vector<8x6xf32>
    %27 = arith.mulf %24, %26 : vector<8x6xf32>
    %28 = arith.addf %19, %27 : vector<8x6xf32>
    %c0_15 = arith.constant 0 : index
    %c0_16 = arith.constant 0 : index
    %29 = vector.load %arg8[%c0_15, %c0_16] : memref<6x96xf32, #tpu.memory_space<vmem>>, vector<6x96xf32>
    %cst_17 = arith.constant dense<0.000000e+00> : vector<8x96xf32>
    %30 = tpu.matmul %28, %29, %cst_17 {dimension_numbers = #tpu.dot_dimension_numbers<[1], [0], [0], [1], [0, 0, 1, 1], [], []>} : vector<8x6xf32>, vector<6x96xf32>, vector<8x96xf32> -> vector<8x96xf32>
    %c0_18 = arith.constant 0 : index
    %c0_19 = arith.constant 0 : index
    %31 = vector.load %arg9[%c0_18, %c0_19] : memref<6x96xf32, #tpu.memory_space<vmem>>, vector<6x96xf32>
    %cst_20 = arith.constant dense<0.000000e+00> : vector<8x96xf32>
    %32 = tpu.matmul %1, %31, %cst_20 {dimension_numbers = #tpu.dot_dimension_numbers<[1], [0], [0], [1], [0, 0, 1, 1], [], []>} : vector<8x6xf32>, vector<6x96xf32>, vector<8x96xf32> -> vector<8x96xf32>
    %33 = arith.addf %30, %32 : vector<8x96xf32>
    %c0_21 = arith.constant 0 : index
    %c0_22 = arith.constant 0 : index
    %34 = vector.load %arg10[%c0_21, %c0_22] : memref<1x96xf32, #tpu.memory_space<vmem>>, vector<1x96xf32>
    %35 = vector.broadcast %34 : vector<1x96xf32> to vector<8x96xf32>
    %36 = arith.addf %33, %35 : vector<8x96xf32>
    %c0_23 = arith.constant 0 : index
    %c0_24 = arith.constant 0 : index
    %37 = vector.load %arg11[%c0_23, %c0_24] : memref<8x96xf32, #tpu.memory_space<vmem>>, vector<8x96xf32>
    tpu.vector_store %arg11[%c0_23, %c0_24], %36 {strides = array<i32>} : memref<8x96xf32, #tpu.memory_space<vmem>>, vector<8x96xf32>,
    %c0_25 = arith.constant 0 : index
    %c0_26 = arith.constant 0 : index
    %38 = vector.load %arg6[%c0_25, %c0_26] : memref<6x32xf32, #tpu.memory_space<vmem>>, vector<6x32xf32>
    %cst_27 = arith.constant dense<0.000000e+00> : vector<8x32xf32>
    %39 = tpu.matmul %2, %38, %cst_27 {dimension_numbers = #tpu.dot_dimension_numbers<[1], [0], [0], [1], [0, 0, 1, 1], [], []>} : vector<8x6xf32>, vector<6x32xf32>, vector<8x32xf32> -> vector<8x32xf32>
    %c0_28 = arith.constant 0 : index
    %c0_29 = arith.constant 0 : index
    %40 = vector.load %arg7[%c0_28, %c0_29] : memref<1x32xf32, #tpu.memory_space<vmem>>, vector<1x32xf32>
    %41 = vector.broadcast %40 : vector<1x32xf32> to vector<8x32xf32>
    %42 = arith.addf %39, %41 : vector<8x32xf32>
    %cst_30 = arith.constant 0.000000e+00 : f32
    %43 = vector.broadcast %cst_30 : f32 to vector<8x32xf32>
    %44 = arith.maximumf %42, %43 : vector<8x32xf32>
    %cst_31 = arith.constant 0.000000e+00 : f32
    %45 = vector.broadcast %cst_31 : f32 to vector<8x32xf32>
    %46 = arith.subf %45, %44 : vector<8x32xf32>
    %47 = math.exp %46 : vector<8x32xf32>
    %c0_32 = arith.constant 0 : index
    %c0_33 = arith.constant 0 : index
    %48 = vector.load %arg12[%c0_32, %c0_33] : memref<8x32xf32, #tpu.memory_space<vmem>>, vector<8x32xf32>
    tpu.vector_store %arg12[%c0_32, %c0_33], %47 {strides = array<i32>} : memref<8x32xf32, #tpu.memory_space<vmem>>, vector<8x32xf32>,
    return
  }
}

module attributes {stable_mosaic.version = 11 : i64} {
  func.func @_grud_recurrence_kernel(%arg0: memref<2x4x96xf32, #tpu.memory_space<vmem>>, %arg1: memref<2x4x32xf32, #tpu.memory_space<vmem>>, %arg2: memref<32x96xf32, #tpu.memory_space<vmem>>, %arg3: memref<1x96xf32, #tpu.memory_space<vmem>>, %arg4: memref<2x32xf32, #tpu.memory_space<vmem>>, %arg5: memref<2x4x32xf32, #tpu.memory_space<vmem>>) attributes {dimension_semantics = [], scalar_prefetch = 0 : i64, scratch_operands = 0 : i64, tpu.core_type = #tpu.core_type<tc>} {
    %c0 = arith.constant 0 : index
    %c0_0 = arith.constant 0 : index
    %0 = vector.load %arg2[%c0, %c0_0] : memref<32x96xf32, #tpu.memory_space<vmem>>, vector<32x96xf32>
    %c0_1 = arith.constant 0 : index
    %c0_2 = arith.constant 0 : index
    %1 = vector.load %arg3[%c0_1, %c0_2] : memref<1x96xf32, #tpu.memory_space<vmem>>, vector<1x96xf32>
    %c0_3 = arith.constant 0 : index
    %c0_4 = arith.constant 0 : index
    %c0_5 = arith.constant 0 : index
    %2 = vector.load %arg0[%c0_3, %c0_4, %c0_5] : memref<2x4x96xf32, #tpu.memory_space<vmem>>, vector<2x4x96xf32>
    %c0_6 = arith.constant 0 : index
    %c0_7 = arith.constant 0 : index
    %c0_8 = arith.constant 0 : index
    %3 = vector.load %arg1[%c0_6, %c0_7, %c0_8] : memref<2x4x32xf32, #tpu.memory_space<vmem>>, vector<2x4x32xf32>
    %c0_9 = arith.constant 0 : index
    %c0_10 = arith.constant 0 : index
    %4 = vector.load %arg4[%c0_9, %c0_10] : memref<2x32xf32, #tpu.memory_space<vmem>>, vector<2x32xf32>
    %5 = vector.extract_strided_slice %3 {offsets = [0, 0, 0], sizes = [2, 1, 32], strides = [1, 1, 1]} : vector<2x4x32xf32> to vector<2x1x32xf32>
    %6 = vector.shape_cast %5 : vector<2x1x32xf32> to vector<2x32xf32>
    %7 = arith.mulf %6, %4 : vector<2x32xf32>
    %cst = arith.constant dense<0.000000e+00> : vector<2x96xf32>
    %8 = tpu.matmul %7, %0, %cst {dimension_numbers = #tpu.dot_dimension_numbers<[1], [0], [0], [1], [0, 0, 1, 1], [], []>} : vector<2x32xf32>, vector<32x96xf32>, vector<2x96xf32> -> vector<2x96xf32>
    %9 = vector.broadcast %1 : vector<1x96xf32> to vector<2x96xf32>
    %10 = arith.addf %8, %9 : vector<2x96xf32>
    %11 = vector.extract_strided_slice %2 {offsets = [0, 0, 0], sizes = [2, 1, 96], strides = [1, 1, 1]} : vector<2x4x96xf32> to vector<2x1x96xf32>
    %12 = vector.shape_cast %11 : vector<2x1x96xf32> to vector<2x96xf32>
    %13 = vector.extract_strided_slice %12 {offsets = [0, 0], sizes = [2, 32], strides = [1, 1]} : vector<2x96xf32> to vector<2x32xf32>
    %14 = vector.extract_strided_slice %10 {offsets = [0, 0], sizes = [2, 32], strides = [1, 1]} : vector<2x96xf32> to vector<2x32xf32>
    %15 = arith.addf %13, %14 : vector<2x32xf32>
    %16 = arith.negf %15 : vector<2x32xf32>
    %17 = math.exp %16 : vector<2x32xf32>
    %cst_11 = arith.constant 1.000000e+00 : f32
    %18 = vector.broadcast %cst_11 : f32 to vector<2x32xf32>
    %19 = arith.addf %18, %17 : vector<2x32xf32>
    %20 = arith.divf %18, %19 : vector<2x32xf32>
    %21 = vector.extract_strided_slice %12 {offsets = [0, 32], sizes = [2, 32], strides = [1, 1]} : vector<2x96xf32> to vector<2x32xf32>
    %22 = vector.extract_strided_slice %10 {offsets = [0, 32], sizes = [2, 32], strides = [1, 1]} : vector<2x96xf32> to vector<2x32xf32>
    %23 = arith.addf %21, %22 : vector<2x32xf32>
    %24 = arith.negf %23 : vector<2x32xf32>
    %25 = math.exp %24 : vector<2x32xf32>
    %cst_12 = arith.constant 1.000000e+00 : f32
    %26 = vector.broadcast %cst_12 : f32 to vector<2x32xf32>
    %27 = arith.addf %26, %25 : vector<2x32xf32>
    %28 = arith.divf %26, %27 : vector<2x32xf32>
    %29 = vector.extract_strided_slice %12 {offsets = [0, 64], sizes = [2, 32], strides = [1, 1]} : vector<2x96xf32> to vector<2x32xf32>
    %30 = vector.extract_strided_slice %10 {offsets = [0, 64], sizes = [2, 32], strides = [1, 1]} : vector<2x96xf32> to vector<2x32xf32>
    %31 = arith.mulf %20, %30 : vector<2x32xf32>
    %32 = arith.addf %29, %31 : vector<2x32xf32>
    %33 = math.tanh %32 : vector<2x32xf32>
    %cst_13 = arith.constant 1.000000e+00 : f32
    %34 = vector.broadcast %cst_13 : f32 to vector<2x32xf32>
    %35 = arith.subf %34, %28 : vector<2x32xf32>
    %36 = arith.mulf %35, %33 : vector<2x32xf32>
    %37 = arith.mulf %28, %7 : vector<2x32xf32>
    %38 = arith.addf %36, %37 : vector<2x32xf32>
    %39 = vector.extract_strided_slice %3 {offsets = [0, 1, 0], sizes = [2, 1, 32], strides = [1, 1, 1]} : vector<2x4x32xf32> to vector<2x1x32xf32>
    %40 = vector.shape_cast %39 : vector<2x1x32xf32> to vector<2x32xf32>
    %41 = arith.mulf %40, %38 : vector<2x32xf32>
    %cst_14 = arith.constant dense<0.000000e+00> : vector<2x96xf32>
    %42 = tpu.matmul %41, %0, %cst_14 {dimension_numbers = #tpu.dot_dimension_numbers<[1], [0], [0], [1], [0, 0, 1, 1], [], []>} : vector<2x32xf32>, vector<32x96xf32>, vector<2x96xf32> -> vector<2x96xf32>
    %43 = vector.broadcast %1 : vector<1x96xf32> to vector<2x96xf32>
    %44 = arith.addf %42, %43 : vector<2x96xf32>
    %45 = vector.extract_strided_slice %2 {offsets = [0, 1, 0], sizes = [2, 1, 96], strides = [1, 1, 1]} : vector<2x4x96xf32> to vector<2x1x96xf32>
    %46 = vector.shape_cast %45 : vector<2x1x96xf32> to vector<2x96xf32>
    %47 = vector.extract_strided_slice %46 {offsets = [0, 0], sizes = [2, 32], strides = [1, 1]} : vector<2x96xf32> to vector<2x32xf32>
    %48 = vector.extract_strided_slice %44 {offsets = [0, 0], sizes = [2, 32], strides = [1, 1]} : vector<2x96xf32> to vector<2x32xf32>
    %49 = arith.addf %47, %48 : vector<2x32xf32>
    %50 = arith.negf %49 : vector<2x32xf32>
    %51 = math.exp %50 : vector<2x32xf32>
    %cst_15 = arith.constant 1.000000e+00 : f32
    %52 = vector.broadcast %cst_15 : f32 to vector<2x32xf32>
    %53 = arith.addf %52, %51 : vector<2x32xf32>
    %54 = arith.divf %52, %53 : vector<2x32xf32>
    %55 = vector.extract_strided_slice %46 {offsets = [0, 32], sizes = [2, 32], strides = [1, 1]} : vector<2x96xf32> to vector<2x32xf32>
    %56 = vector.extract_strided_slice %44 {offsets = [0, 32], sizes = [2, 32], strides = [1, 1]} : vector<2x96xf32> to vector<2x32xf32>
    %57 = arith.addf %55, %56 : vector<2x32xf32>
    %58 = arith.negf %57 : vector<2x32xf32>
    %59 = math.exp %58 : vector<2x32xf32>
    %cst_16 = arith.constant 1.000000e+00 : f32
    %60 = vector.broadcast %cst_16 : f32 to vector<2x32xf32>
    %61 = arith.addf %60, %59 : vector<2x32xf32>
    %62 = arith.divf %60, %61 : vector<2x32xf32>
    %63 = vector.extract_strided_slice %46 {offsets = [0, 64], sizes = [2, 32], strides = [1, 1]} : vector<2x96xf32> to vector<2x32xf32>
    %64 = vector.extract_strided_slice %44 {offsets = [0, 64], sizes = [2, 32], strides = [1, 1]} : vector<2x96xf32> to vector<2x32xf32>
    %65 = arith.mulf %54, %64 : vector<2x32xf32>
    %66 = arith.addf %63, %65 : vector<2x32xf32>
    %67 = math.tanh %66 : vector<2x32xf32>
    %cst_17 = arith.constant 1.000000e+00 : f32
    %68 = vector.broadcast %cst_17 : f32 to vector<2x32xf32>
    %69 = arith.subf %68, %62 : vector<2x32xf32>
    %70 = arith.mulf %69, %67 : vector<2x32xf32>
    %71 = arith.mulf %62, %41 : vector<2x32xf32>
    %72 = arith.addf %70, %71 : vector<2x32xf32>
    %73 = vector.extract_strided_slice %3 {offsets = [0, 2, 0], sizes = [2, 1, 32], strides = [1, 1, 1]} : vector<2x4x32xf32> to vector<2x1x32xf32>
    %74 = vector.shape_cast %73 : vector<2x1x32xf32> to vector<2x32xf32>
    %75 = arith.mulf %74, %72 : vector<2x32xf32>
    %cst_18 = arith.constant dense<0.000000e+00> : vector<2x96xf32>
    %76 = tpu.matmul %75, %0, %cst_18 {dimension_numbers = #tpu.dot_dimension_numbers<[1], [0], [0], [1], [0, 0, 1, 1], [], []>} : vector<2x32xf32>, vector<32x96xf32>, vector<2x96xf32> -> vector<2x96xf32>
    %77 = vector.broadcast %1 : vector<1x96xf32> to vector<2x96xf32>
    %78 = arith.addf %76, %77 : vector<2x96xf32>
    %79 = vector.extract_strided_slice %2 {offsets = [0, 2, 0], sizes = [2, 1, 96], strides = [1, 1, 1]} : vector<2x4x96xf32> to vector<2x1x96xf32>
    %80 = vector.shape_cast %79 : vector<2x1x96xf32> to vector<2x96xf32>
    %81 = vector.extract_strided_slice %80 {offsets = [0, 0], sizes = [2, 32], strides = [1, 1]} : vector<2x96xf32> to vector<2x32xf32>
    %82 = vector.extract_strided_slice %78 {offsets = [0, 0], sizes = [2, 32], strides = [1, 1]} : vector<2x96xf32> to vector<2x32xf32>
    %83 = arith.addf %81, %82 : vector<2x32xf32>
    %84 = arith.negf %83 : vector<2x32xf32>
    %85 = math.exp %84 : vector<2x32xf32>
    %cst_19 = arith.constant 1.000000e+00 : f32
    %86 = vector.broadcast %cst_19 : f32 to vector<2x32xf32>
    %87 = arith.addf %86, %85 : vector<2x32xf32>
    %88 = arith.divf %86, %87 : vector<2x32xf32>
    %89 = vector.extract_strided_slice %80 {offsets = [0, 32], sizes = [2, 32], strides = [1, 1]} : vector<2x96xf32> to vector<2x32xf32>
    %90 = vector.extract_strided_slice %78 {offsets = [0, 32], sizes = [2, 32], strides = [1, 1]} : vector<2x96xf32> to vector<2x32xf32>
    %91 = arith.addf %89, %90 : vector<2x32xf32>
    %92 = arith.negf %91 : vector<2x32xf32>
    %93 = math.exp %92 : vector<2x32xf32>
    %cst_20 = arith.constant 1.000000e+00 : f32
    %94 = vector.broadcast %cst_20 : f32 to vector<2x32xf32>
    %95 = arith.addf %94, %93 : vector<2x32xf32>
    %96 = arith.divf %94, %95 : vector<2x32xf32>
    %97 = vector.extract_strided_slice %80 {offsets = [0, 64], sizes = [2, 32], strides = [1, 1]} : vector<2x96xf32> to vector<2x32xf32>
    %98 = vector.extract_strided_slice %78 {offsets = [0, 64], sizes = [2, 32], strides = [1, 1]} : vector<2x96xf32> to vector<2x32xf32>
    %99 = arith.mulf %88, %98 : vector<2x32xf32>
    %100 = arith.addf %97, %99 : vector<2x32xf32>
    %101 = math.tanh %100 : vector<2x32xf32>
    %cst_21 = arith.constant 1.000000e+00 : f32
    %102 = vector.broadcast %cst_21 : f32 to vector<2x32xf32>
    %103 = arith.subf %102, %96 : vector<2x32xf32>
    %104 = arith.mulf %103, %101 : vector<2x32xf32>
    %105 = arith.mulf %96, %75 : vector<2x32xf32>
    %106 = arith.addf %104, %105 : vector<2x32xf32>
    %107 = vector.extract_strided_slice %3 {offsets = [0, 3, 0], sizes = [2, 1, 32], strides = [1, 1, 1]} : vector<2x4x32xf32> to vector<2x1x32xf32>
    %108 = vector.shape_cast %107 : vector<2x1x32xf32> to vector<2x32xf32>
    %109 = arith.mulf %108, %106 : vector<2x32xf32>
    %cst_22 = arith.constant dense<0.000000e+00> : vector<2x96xf32>
    %110 = tpu.matmul %109, %0, %cst_22 {dimension_numbers = #tpu.dot_dimension_numbers<[1], [0], [0], [1], [0, 0, 1, 1], [], []>} : vector<2x32xf32>, vector<32x96xf32>, vector<2x96xf32> -> vector<2x96xf32>
    %111 = vector.broadcast %1 : vector<1x96xf32> to vector<2x96xf32>
    %112 = arith.addf %110, %111 : vector<2x96xf32>
    %113 = vector.extract_strided_slice %2 {offsets = [0, 3, 0], sizes = [2, 1, 96], strides = [1, 1, 1]} : vector<2x4x96xf32> to vector<2x1x96xf32>
    %114 = vector.shape_cast %113 : vector<2x1x96xf32> to vector<2x96xf32>
    %115 = vector.extract_strided_slice %114 {offsets = [0, 0], sizes = [2, 32], strides = [1, 1]} : vector<2x96xf32> to vector<2x32xf32>
    %116 = vector.extract_strided_slice %112 {offsets = [0, 0], sizes = [2, 32], strides = [1, 1]} : vector<2x96xf32> to vector<2x32xf32>
    %117 = arith.addf %115, %116 : vector<2x32xf32>
    %118 = arith.negf %117 : vector<2x32xf32>
    %119 = math.exp %118 : vector<2x32xf32>
    %cst_23 = arith.constant 1.000000e+00 : f32
    %120 = vector.broadcast %cst_23 : f32 to vector<2x32xf32>
    %121 = arith.addf %120, %119 : vector<2x32xf32>
    %122 = arith.divf %120, %121 : vector<2x32xf32>
    %123 = vector.extract_strided_slice %114 {offsets = [0, 32], sizes = [2, 32], strides = [1, 1]} : vector<2x96xf32> to vector<2x32xf32>
    %124 = vector.extract_strided_slice %112 {offsets = [0, 32], sizes = [2, 32], strides = [1, 1]} : vector<2x96xf32> to vector<2x32xf32>
    %125 = arith.addf %123, %124 : vector<2x32xf32>
    %126 = arith.negf %125 : vector<2x32xf32>
    %127 = math.exp %126 : vector<2x32xf32>
    %cst_24 = arith.constant 1.000000e+00 : f32
    %128 = vector.broadcast %cst_24 : f32 to vector<2x32xf32>
    %129 = arith.addf %128, %127 : vector<2x32xf32>
    %130 = arith.divf %128, %129 : vector<2x32xf32>
    %131 = vector.extract_strided_slice %114 {offsets = [0, 64], sizes = [2, 32], strides = [1, 1]} : vector<2x96xf32> to vector<2x32xf32>
    %132 = vector.extract_strided_slice %112 {offsets = [0, 64], sizes = [2, 32], strides = [1, 1]} : vector<2x96xf32> to vector<2x32xf32>
    %133 = arith.mulf %122, %132 : vector<2x32xf32>
    %134 = arith.addf %131, %133 : vector<2x32xf32>
    %135 = math.tanh %134 : vector<2x32xf32>
    %cst_25 = arith.constant 1.000000e+00 : f32
    %136 = vector.broadcast %cst_25 : f32 to vector<2x32xf32>
    %137 = arith.subf %136, %130 : vector<2x32xf32>
    %138 = arith.mulf %137, %135 : vector<2x32xf32>
    %139 = arith.mulf %130, %109 : vector<2x32xf32>
    %140 = arith.addf %138, %139 : vector<2x32xf32>
    %141 = vector.shape_cast %38 : vector<2x32xf32> to vector<2x1x32xf32>
    %142 = vector.shape_cast %72 : vector<2x32xf32> to vector<2x1x32xf32>
    %143 = vector.shape_cast %106 : vector<2x32xf32> to vector<2x1x32xf32>
    %144 = vector.shape_cast %140 : vector<2x32xf32> to vector<2x1x32xf32>
    %145 = tpu.concatenate %141, %142, %143, %144 in 1 : vector<2x1x32xf32>, vector<2x1x32xf32>, vector<2x1x32xf32>, vector<2x1x32xf32> -> vector<2x4x32xf32>
    %c0_26 = arith.constant 0 : index
    %c0_27 = arith.constant 0 : index
    %c0_28 = arith.constant 0 : index
    %146 = vector.load %arg5[%c0_26, %c0_27, %c0_28] : memref<2x4x32xf32, #tpu.memory_space<vmem>>, vector<2x4x32xf32>
    tpu.vector_store %arg5[%c0_26, %c0_27, %c0_28], %145 {strides = array<i32>} : memref<2x4x32xf32, #tpu.memory_space<vmem>>, vector<2x4x32xf32>,
    return
  }
}

module attributes {stable_mosaic.version = 11 : i64} {
  func.func @_mha_kernel(%arg0: i32, %arg1: memref<1x8x32xf32, #tpu.memory_space<vmem>>, %arg2: memref<32x96xf32, #tpu.memory_space<vmem>>, %arg3: memref<1x96xf32, #tpu.memory_space<vmem>>, %arg4: memref<1x8x8xf32, #tpu.memory_space<vmem>>, %arg5: memref<1x8x32xf32, #tpu.memory_space<vmem>>) attributes {dimension_semantics = [#tpu.dimension_semantics<parallel>], iteration_bounds = array<i64: 2>, scalar_prefetch = 0 : i64, scratch_operands = 0 : i64, tpu.core_type = #tpu.core_type<tc>, window_params = [{transform_indices = @transform_0, window_bounds = array<i64: 1, 8, 32>}, {pipeline_mode = #tpu.pipeline_mode<synchronous>, transform_indices = @transform_1, window_bounds = array<i64: 32, 96>}, {pipeline_mode = #tpu.pipeline_mode<synchronous>, transform_indices = @transform_2, window_bounds = array<i64: 1, 96>}, {transform_indices = @transform_3, window_bounds = array<i64: 1, 8, 8>}, {transform_indices = @transform_4, window_bounds = array<i64: 1, 8, 32>}]} {
    %c0 = arith.constant 0 : index
    %c0_0 = arith.constant 0 : index
    %c0_1 = arith.constant 0 : index
    %0 = vector.load %arg1[%c0, %c0_0, %c0_1] : memref<1x8x32xf32, #tpu.memory_space<vmem>>, vector<1x8x32xf32>
    %1 = vector.shape_cast %0 : vector<1x8x32xf32> to vector<8x32xf32>
    %c0_2 = arith.constant 0 : index
    %c0_3 = arith.constant 0 : index
    %2 = vector.load %arg2[%c0_2, %c0_3] : memref<32x96xf32, #tpu.memory_space<vmem>>, vector<32x96xf32>
    %cst = arith.constant dense<0.000000e+00> : vector<8x96xf32>
    %3 = tpu.matmul %1, %2, %cst {dimension_numbers = #tpu.dot_dimension_numbers<[1], [0], [0], [1], [0, 0, 1, 1], [], []>} : vector<8x32xf32>, vector<32x96xf32>, vector<8x96xf32> -> vector<8x96xf32>
    %c0_4 = arith.constant 0 : index
    %c0_5 = arith.constant 0 : index
    %4 = vector.load %arg3[%c0_4, %c0_5] : memref<1x96xf32, #tpu.memory_space<vmem>>, vector<1x96xf32>
    %5 = vector.broadcast %4 : vector<1x96xf32> to vector<8x96xf32>
    %6 = arith.addf %3, %5 : vector<8x96xf32>
    %c0_6 = arith.constant 0 : index
    %c0_7 = arith.constant 0 : index
    %c0_8 = arith.constant 0 : index
    %7 = vector.load %arg4[%c0_6, %c0_7, %c0_8] : memref<1x8x8xf32, #tpu.memory_space<vmem>>, vector<1x8x8xf32>
    %8 = vector.shape_cast %7 : vector<1x8x8xf32> to vector<8x8xf32>
    %9 = vector.extract_strided_slice %6 {offsets = [0, 0], sizes = [8, 16], strides = [1, 1]} : vector<8x96xf32> to vector<8x16xf32>
    %10 = vector.extract_strided_slice %6 {offsets = [0, 32], sizes = [8, 16], strides = [1, 1]} : vector<8x96xf32> to vector<8x16xf32>
    %11 = vector.extract_strided_slice %6 {offsets = [0, 64], sizes = [8, 16], strides = [1, 1]} : vector<8x96xf32> to vector<8x16xf32>
    %cst_9 = arith.constant dense<0.000000e+00> : vector<8x8xf32>
    %12 = tpu.matmul %9, %10, %cst_9 {dimension_numbers = #tpu.dot_dimension_numbers<[1], [1], [0], [0], [0, 0, 1, 0], [], []>} : vector<8x16xf32>, vector<8x16xf32>, vector<8x8xf32> -> vector<8x8xf32>
    %cst_10 = arith.constant 2.500000e-01 : f32
    %13 = vector.broadcast %cst_10 : f32 to vector<8x8xf32>
    %14 = arith.mulf %12, %13 : vector<8x8xf32>
    %15 = arith.addf %14, %8 : vector<8x8xf32>
    %cst_11 = arith.constant dense<0xFF800000> : vector<8xf32>
    %16 = vector.multi_reduction <maximumf>, %15, %cst_11 [1] : vector<8x8xf32> to vector<8xf32>
    %17 = vector.shape_cast %16 : vector<8xf32> to vector<8x1xf32>
    %18 = vector.broadcast %17 : vector<8x1xf32> to vector<8x8xf32>
    %19 = arith.subf %15, %18 : vector<8x8xf32>
    %20 = math.exp %19 : vector<8x8xf32>
    %cst_12 = arith.constant dense<0.000000e+00> : vector<8xf32>
    %21 = vector.multi_reduction <add>, %20, %cst_12 [1] : vector<8x8xf32> to vector<8xf32>
    %22 = vector.shape_cast %21 : vector<8xf32> to vector<8x1xf32>
    %23 = vector.broadcast %22 : vector<8x1xf32> to vector<8x8xf32>
    %24 = arith.divf %20, %23 : vector<8x8xf32>
    %cst_13 = arith.constant dense<0.000000e+00> : vector<8x16xf32>
    %25 = tpu.matmul %24, %11, %cst_13 {dimension_numbers = #tpu.dot_dimension_numbers<[1], [0], [0], [1], [0, 0, 1, 1], [], []>} : vector<8x8xf32>, vector<8x16xf32>, vector<8x16xf32> -> vector<8x16xf32>
    %26 = vector.extract_strided_slice %6 {offsets = [0, 16], sizes = [8, 16], strides = [1, 1]} : vector<8x96xf32> to vector<8x16xf32>
    %27 = vector.extract_strided_slice %6 {offsets = [0, 48], sizes = [8, 16], strides = [1, 1]} : vector<8x96xf32> to vector<8x16xf32>
    %28 = vector.extract_strided_slice %6 {offsets = [0, 80], sizes = [8, 16], strides = [1, 1]} : vector<8x96xf32> to vector<8x16xf32>
    %cst_14 = arith.constant dense<0.000000e+00> : vector<8x8xf32>
    %29 = tpu.matmul %26, %27, %cst_14 {dimension_numbers = #tpu.dot_dimension_numbers<[1], [1], [0], [0], [0, 0, 1, 0], [], []>} : vector<8x16xf32>, vector<8x16xf32>, vector<8x8xf32> -> vector<8x8xf32>
    %cst_15 = arith.constant 2.500000e-01 : f32
    %30 = vector.broadcast %cst_15 : f32 to vector<8x8xf32>
    %31 = arith.mulf %29, %30 : vector<8x8xf32>
    %32 = arith.addf %31, %8 : vector<8x8xf32>
    %cst_16 = arith.constant dense<0xFF800000> : vector<8xf32>
    %33 = vector.multi_reduction <maximumf>, %32, %cst_16 [1] : vector<8x8xf32> to vector<8xf32>
    %34 = vector.shape_cast %33 : vector<8xf32> to vector<8x1xf32>
    %35 = vector.broadcast %34 : vector<8x1xf32> to vector<8x8xf32>
    %36 = arith.subf %32, %35 : vector<8x8xf32>
    %37 = math.exp %36 : vector<8x8xf32>
    %cst_17 = arith.constant dense<0.000000e+00> : vector<8xf32>
    %38 = vector.multi_reduction <add>, %37, %cst_17 [1] : vector<8x8xf32> to vector<8xf32>
    %39 = vector.shape_cast %38 : vector<8xf32> to vector<8x1xf32>
    %40 = vector.broadcast %39 : vector<8x1xf32> to vector<8x8xf32>
    %41 = arith.divf %37, %40 : vector<8x8xf32>
    %cst_18 = arith.constant dense<0.000000e+00> : vector<8x16xf32>
    %42 = tpu.matmul %41, %28, %cst_18 {dimension_numbers = #tpu.dot_dimension_numbers<[1], [0], [0], [1], [0, 0, 1, 1], [], []>} : vector<8x8xf32>, vector<8x16xf32>, vector<8x16xf32> -> vector<8x16xf32>
    %43 = tpu.concatenate %25, %42 in 1 : vector<8x16xf32>, vector<8x16xf32> -> vector<8x32xf32>
    %c0_19 = arith.constant 0 : index
    %c0_20 = arith.constant 0 : index
    %c0_21 = arith.constant 0 : index
    %44 = vector.load %arg5[%c0_19, %c0_20, %c0_21] : memref<1x8x32xf32, #tpu.memory_space<vmem>>, vector<1x8x32xf32>
    %45 = vector.shape_cast %44 : vector<1x8x32xf32> to vector<8x32xf32>
    %46 = vector.shape_cast %43 : vector<8x32xf32> to vector<1x8x32xf32>
    tpu.vector_store %arg5[%c0_19, %c0_20, %c0_21], %46 {strides = array<i32>} : memref<1x8x32xf32, #tpu.memory_space<vmem>>, vector<1x8x32xf32>,
    return
  }
  func.func @transform_0(%arg0: i32) -> (i32, i32, i32) {
    %c0_i32 = arith.constant 0 : i32
    %c0_i32_0 = arith.constant 0 : i32
    %c0_i32_1 = arith.constant 0 : i32
    return %arg0, %c0_i32, %c0_i32_0 : i32, i32, i32
  }
  func.func @transform_1(%arg0: i32) -> (i32, i32) {
    %c0_i32 = arith.constant 0 : i32
    %c0_i32_0 = arith.constant 0 : i32
    %c0_i32_1 = arith.constant 0 : i32
    return %c0_i32, %c0_i32_0 : i32, i32
  }
  func.func @transform_2(%arg0: i32) -> (i32, i32) {
    %c0_i32 = arith.constant 0 : i32
    %c0_i32_0 = arith.constant 0 : i32
    %c0_i32_1 = arith.constant 0 : i32
    return %c0_i32, %c0_i32_0 : i32, i32
  }
  func.func @transform_3(%arg0: i32) -> (i32, i32, i32) {
    %c0_i32 = arith.constant 0 : i32
    %c0_i32_0 = arith.constant 0 : i32
    %c0_i32_1 = arith.constant 0 : i32
    return %arg0, %c0_i32, %c0_i32_0 : i32, i32, i32
  }
  func.func @transform_4(%arg0: i32) -> (i32, i32, i32) {
    %c0_i32 = arith.constant 0 : i32
    %c0_i32_0 = arith.constant 0 : i32
    %c0_i32_1 = arith.constant 0 : i32
    return %arg0, %c0_i32, %c0_i32_0 : i32, i32, i32
  }
}

module attributes {stable_mosaic.version = 11 : i64} {
  func.func @_linear_resid_ln_mask_kernel(%arg0: memref<16x32xf32, #tpu.memory_space<vmem>>, %arg1: memref<16x32xf32, #tpu.memory_space<vmem>>, %arg2: memref<32x32xf32, #tpu.memory_space<vmem>>, %arg3: memref<1x32xf32, #tpu.memory_space<vmem>>, %arg4: memref<1x32xf32, #tpu.memory_space<vmem>>, %arg5: memref<1x32xf32, #tpu.memory_space<vmem>>, %arg6: memref<16x1xf32, #tpu.memory_space<vmem>>, %arg7: memref<16x32xf32, #tpu.memory_space<vmem>>) attributes {dimension_semantics = [], scalar_prefetch = 0 : i64, scratch_operands = 0 : i64, tpu.core_type = #tpu.core_type<tc>} {
    %c0 = arith.constant 0 : index
    %c0_0 = arith.constant 0 : index
    %0 = vector.load %arg0[%c0, %c0_0] : memref<16x32xf32, #tpu.memory_space<vmem>>, vector<16x32xf32>
    %c0_1 = arith.constant 0 : index
    %c0_2 = arith.constant 0 : index
    %1 = vector.load %arg2[%c0_1, %c0_2] : memref<32x32xf32, #tpu.memory_space<vmem>>, vector<32x32xf32>
    %cst = arith.constant dense<0.000000e+00> : vector<16x32xf32>
    %2 = tpu.matmul %0, %1, %cst {dimension_numbers = #tpu.dot_dimension_numbers<[1], [0], [0], [1], [0, 0, 1, 1], [], []>} : vector<16x32xf32>, vector<32x32xf32>, vector<16x32xf32> -> vector<16x32xf32>
    %c0_3 = arith.constant 0 : index
    %c0_4 = arith.constant 0 : index
    %3 = vector.load %arg3[%c0_3, %c0_4] : memref<1x32xf32, #tpu.memory_space<vmem>>, vector<1x32xf32>
    %4 = vector.broadcast %3 : vector<1x32xf32> to vector<16x32xf32>
    %5 = arith.addf %2, %4 : vector<16x32xf32>
    %c0_5 = arith.constant 0 : index
    %c0_6 = arith.constant 0 : index
    %6 = vector.load %arg1[%c0_5, %c0_6] : memref<16x32xf32, #tpu.memory_space<vmem>>, vector<16x32xf32>
    %7 = arith.addf %5, %6 : vector<16x32xf32>
    %cst_7 = arith.constant dense<0.000000e+00> : vector<16xf32>
    %8 = vector.multi_reduction <add>, %7, %cst_7 [1] : vector<16x32xf32> to vector<16xf32>
    %9 = vector.shape_cast %8 : vector<16xf32> to vector<16x1xf32>
    %cst_8 = arith.constant 3.200000e+01 : f32
    %10 = vector.broadcast %cst_8 : f32 to vector<16x1xf32>
    %11 = arith.divf %9, %10 : vector<16x1xf32>
    %12 = vector.broadcast %11 : vector<16x1xf32> to vector<16x32xf32>
    %13 = arith.subf %7, %12 : vector<16x32xf32>
    %14 = arith.mulf %13, %13 : vector<16x32xf32>
    %cst_9 = arith.constant dense<0.000000e+00> : vector<16xf32>
    %15 = vector.multi_reduction <add>, %14, %cst_9 [1] : vector<16x32xf32> to vector<16xf32>
    %16 = vector.shape_cast %15 : vector<16xf32> to vector<16x1xf32>
    %cst_10 = arith.constant 3.200000e+01 : f32
    %17 = vector.broadcast %cst_10 : f32 to vector<16x1xf32>
    %18 = arith.divf %16, %17 : vector<16x1xf32>
    %19 = vector.broadcast %11 : vector<16x1xf32> to vector<16x32xf32>
    %20 = arith.subf %7, %19 : vector<16x32xf32>
    %cst_11 = arith.constant 9.99999974E-6 : f32
    %21 = vector.broadcast %cst_11 : f32 to vector<16x1xf32>
    %22 = arith.addf %18, %21 : vector<16x1xf32>
    %23 = math.rsqrt %22 : vector<16x1xf32>
    %24 = vector.broadcast %23 : vector<16x1xf32> to vector<16x32xf32>
    %25 = arith.mulf %20, %24 : vector<16x32xf32>
    %c0_12 = arith.constant 0 : index
    %c0_13 = arith.constant 0 : index
    %26 = vector.load %arg4[%c0_12, %c0_13] : memref<1x32xf32, #tpu.memory_space<vmem>>, vector<1x32xf32>
    %27 = vector.broadcast %26 : vector<1x32xf32> to vector<16x32xf32>
    %28 = arith.mulf %25, %27 : vector<16x32xf32>
    %c0_14 = arith.constant 0 : index
    %c0_15 = arith.constant 0 : index
    %29 = vector.load %arg5[%c0_14, %c0_15] : memref<1x32xf32, #tpu.memory_space<vmem>>, vector<1x32xf32>
    %30 = vector.broadcast %29 : vector<1x32xf32> to vector<16x32xf32>
    %31 = arith.addf %28, %30 : vector<16x32xf32>
    %c0_16 = arith.constant 0 : index
    %c0_17 = arith.constant 0 : index
    %32 = vector.load %arg6[%c0_16, %c0_17] : memref<16x1xf32, #tpu.memory_space<vmem>>, vector<16x1xf32>
    %33 = vector.broadcast %32 : vector<16x1xf32> to vector<16x32xf32>
    %34 = arith.mulf %31, %33 : vector<16x32xf32>
    %c0_18 = arith.constant 0 : index
    %c0_19 = arith.constant 0 : index
    %35 = vector.load %arg7[%c0_18, %c0_19] : memref<16x32xf32, #tpu.memory_space<vmem>>, vector<16x32xf32>
    tpu.vector_store %arg7[%c0_18, %c0_19], %34 {strides = array<i32>} : memref<16x32xf32, #tpu.memory_space<vmem>>, vector<16x32xf32>,
    return
  }
}

module attributes {stable_mosaic.version = 11 : i64} {
  func.func @_linear_ln_kernel(%arg0: memref<26x32xf32, #tpu.memory_space<vmem>>, %arg1: memref<32x32xf32, #tpu.memory_space<vmem>>, %arg2: memref<1x32xf32, #tpu.memory_space<vmem>>, %arg3: memref<1x32xf32, #tpu.memory_space<vmem>>, %arg4: memref<1x32xf32, #tpu.memory_space<vmem>>, %arg5: memref<26x32xf32, #tpu.memory_space<vmem>>) attributes {dimension_semantics = [], scalar_prefetch = 0 : i64, scratch_operands = 0 : i64, tpu.core_type = #tpu.core_type<tc>} {
    %c0 = arith.constant 0 : index
    %c0_0 = arith.constant 0 : index
    %0 = vector.load %arg0[%c0, %c0_0] : memref<26x32xf32, #tpu.memory_space<vmem>>, vector<26x32xf32>
    %c0_1 = arith.constant 0 : index
    %c0_2 = arith.constant 0 : index
    %1 = vector.load %arg1[%c0_1, %c0_2] : memref<32x32xf32, #tpu.memory_space<vmem>>, vector<32x32xf32>
    %cst = arith.constant dense<0.000000e+00> : vector<26x32xf32>
    %2 = tpu.matmul %0, %1, %cst {dimension_numbers = #tpu.dot_dimension_numbers<[1], [0], [0], [1], [0, 0, 1, 1], [], []>} : vector<26x32xf32>, vector<32x32xf32>, vector<26x32xf32> -> vector<26x32xf32>
    %c0_3 = arith.constant 0 : index
    %c0_4 = arith.constant 0 : index
    %3 = vector.load %arg2[%c0_3, %c0_4] : memref<1x32xf32, #tpu.memory_space<vmem>>, vector<1x32xf32>
    %4 = vector.broadcast %3 : vector<1x32xf32> to vector<26x32xf32>
    %5 = arith.addf %2, %4 : vector<26x32xf32>
    %cst_5 = arith.constant dense<0.000000e+00> : vector<26xf32>
    %6 = vector.multi_reduction <add>, %5, %cst_5 [1] : vector<26x32xf32> to vector<26xf32>
    %7 = vector.shape_cast %6 : vector<26xf32> to vector<26x1xf32>
    %cst_6 = arith.constant 3.200000e+01 : f32
    %8 = vector.broadcast %cst_6 : f32 to vector<26x1xf32>
    %9 = arith.divf %7, %8 : vector<26x1xf32>
    %10 = vector.broadcast %9 : vector<26x1xf32> to vector<26x32xf32>
    %11 = arith.subf %5, %10 : vector<26x32xf32>
    %12 = arith.mulf %11, %11 : vector<26x32xf32>
    %cst_7 = arith.constant dense<0.000000e+00> : vector<26xf32>
    %13 = vector.multi_reduction <add>, %12, %cst_7 [1] : vector<26x32xf32> to vector<26xf32>
    %14 = vector.shape_cast %13 : vector<26xf32> to vector<26x1xf32>
    %cst_8 = arith.constant 3.200000e+01 : f32
    %15 = vector.broadcast %cst_8 : f32 to vector<26x1xf32>
    %16 = arith.divf %14, %15 : vector<26x1xf32>
    %17 = vector.broadcast %9 : vector<26x1xf32> to vector<26x32xf32>
    %18 = arith.subf %5, %17 : vector<26x32xf32>
    %cst_9 = arith.constant 9.99999974E-6 : f32
    %19 = vector.broadcast %cst_9 : f32 to vector<26x1xf32>
    %20 = arith.addf %16, %19 : vector<26x1xf32>
    %21 = math.rsqrt %20 : vector<26x1xf32>
    %22 = vector.broadcast %21 : vector<26x1xf32> to vector<26x32xf32>
    %23 = arith.mulf %18, %22 : vector<26x32xf32>
    %c0_10 = arith.constant 0 : index
    %c0_11 = arith.constant 0 : index
    %24 = vector.load %arg3[%c0_10, %c0_11] : memref<1x32xf32, #tpu.memory_space<vmem>>, vector<1x32xf32>
    %25 = vector.broadcast %24 : vector<1x32xf32> to vector<26x32xf32>
    %26 = arith.mulf %23, %25 : vector<26x32xf32>
    %c0_12 = arith.constant 0 : index
    %c0_13 = arith.constant 0 : index
    %27 = vector.load %arg4[%c0_12, %c0_13] : memref<1x32xf32, #tpu.memory_space<vmem>>, vector<1x32xf32>
    %28 = vector.broadcast %27 : vector<1x32xf32> to vector<26x32xf32>
    %29 = arith.addf %26, %28 : vector<26x32xf32>
    %c0_14 = arith.constant 0 : index
    %c0_15 = arith.constant 0 : index
    %30 = vector.load %arg5[%c0_14, %c0_15] : memref<26x32xf32, #tpu.memory_space<vmem>>, vector<26x32xf32>
    tpu.vector_store %arg5[%c0_14, %c0_15], %29 {strides = array<i32>} : memref<26x32xf32, #tpu.memory_space<vmem>>, vector<26x32xf32>,
    return
  }
}

module attributes {stable_mosaic.version = 11 : i64} {
  func.func @_ffn_resid_ln_mask_kernel(%arg0: memref<16x32xf32, #tpu.memory_space<vmem>>, %arg1: memref<32x64xf32, #tpu.memory_space<vmem>>, %arg2: memref<1x64xf32, #tpu.memory_space<vmem>>, %arg3: memref<64x32xf32, #tpu.memory_space<vmem>>, %arg4: memref<1x32xf32, #tpu.memory_space<vmem>>, %arg5: memref<1x32xf32, #tpu.memory_space<vmem>>, %arg6: memref<1x32xf32, #tpu.memory_space<vmem>>, %arg7: memref<16x1xf32, #tpu.memory_space<vmem>>, %arg8: memref<16x32xf32, #tpu.memory_space<vmem>>) attributes {dimension_semantics = [], scalar_prefetch = 0 : i64, scratch_operands = 0 : i64, tpu.core_type = #tpu.core_type<tc>} {
    %c0 = arith.constant 0 : index
    %c0_0 = arith.constant 0 : index
    %0 = vector.load %arg0[%c0, %c0_0] : memref<16x32xf32, #tpu.memory_space<vmem>>, vector<16x32xf32>
    %c0_1 = arith.constant 0 : index
    %c0_2 = arith.constant 0 : index
    %1 = vector.load %arg1[%c0_1, %c0_2] : memref<32x64xf32, #tpu.memory_space<vmem>>, vector<32x64xf32>
    %cst = arith.constant dense<0.000000e+00> : vector<16x64xf32>
    %2 = tpu.matmul %0, %1, %cst {dimension_numbers = #tpu.dot_dimension_numbers<[1], [0], [0], [1], [0, 0, 1, 1], [], []>} : vector<16x32xf32>, vector<32x64xf32>, vector<16x64xf32> -> vector<16x64xf32>
    %c0_3 = arith.constant 0 : index
    %c0_4 = arith.constant 0 : index
    %3 = vector.load %arg2[%c0_3, %c0_4] : memref<1x64xf32, #tpu.memory_space<vmem>>, vector<1x64xf32>
    %4 = vector.broadcast %3 : vector<1x64xf32> to vector<16x64xf32>
    %5 = arith.addf %2, %4 : vector<16x64xf32>
    %cst_5 = arith.constant 0.000000e+00 : f32
    %6 = vector.broadcast %cst_5 : f32 to vector<16x64xf32>
    %7 = arith.maximumf %5, %6 : vector<16x64xf32>
    %c0_6 = arith.constant 0 : index
    %c0_7 = arith.constant 0 : index
    %8 = vector.load %arg3[%c0_6, %c0_7] : memref<64x32xf32, #tpu.memory_space<vmem>>, vector<64x32xf32>
    %cst_8 = arith.constant dense<0.000000e+00> : vector<16x32xf32>
    %9 = tpu.matmul %7, %8, %cst_8 {dimension_numbers = #tpu.dot_dimension_numbers<[1], [0], [0], [1], [0, 0, 1, 1], [], []>} : vector<16x64xf32>, vector<64x32xf32>, vector<16x32xf32> -> vector<16x32xf32>
    %c0_9 = arith.constant 0 : index
    %c0_10 = arith.constant 0 : index
    %10 = vector.load %arg4[%c0_9, %c0_10] : memref<1x32xf32, #tpu.memory_space<vmem>>, vector<1x32xf32>
    %11 = vector.broadcast %10 : vector<1x32xf32> to vector<16x32xf32>
    %12 = arith.addf %9, %11 : vector<16x32xf32>
    %13 = arith.addf %12, %0 : vector<16x32xf32>
    %cst_11 = arith.constant dense<0.000000e+00> : vector<16xf32>
    %14 = vector.multi_reduction <add>, %13, %cst_11 [1] : vector<16x32xf32> to vector<16xf32>
    %15 = vector.shape_cast %14 : vector<16xf32> to vector<16x1xf32>
    %cst_12 = arith.constant 3.200000e+01 : f32
    %16 = vector.broadcast %cst_12 : f32 to vector<16x1xf32>
    %17 = arith.divf %15, %16 : vector<16x1xf32>
    %18 = vector.broadcast %17 : vector<16x1xf32> to vector<16x32xf32>
    %19 = arith.subf %13, %18 : vector<16x32xf32>
    %20 = arith.mulf %19, %19 : vector<16x32xf32>
    %cst_13 = arith.constant dense<0.000000e+00> : vector<16xf32>
    %21 = vector.multi_reduction <add>, %20, %cst_13 [1] : vector<16x32xf32> to vector<16xf32>
    %22 = vector.shape_cast %21 : vector<16xf32> to vector<16x1xf32>
    %cst_14 = arith.constant 3.200000e+01 : f32
    %23 = vector.broadcast %cst_14 : f32 to vector<16x1xf32>
    %24 = arith.divf %22, %23 : vector<16x1xf32>
    %25 = vector.broadcast %17 : vector<16x1xf32> to vector<16x32xf32>
    %26 = arith.subf %13, %25 : vector<16x32xf32>
    %cst_15 = arith.constant 9.99999974E-6 : f32
    %27 = vector.broadcast %cst_15 : f32 to vector<16x1xf32>
    %28 = arith.addf %24, %27 : vector<16x1xf32>
    %29 = math.rsqrt %28 : vector<16x1xf32>
    %30 = vector.broadcast %29 : vector<16x1xf32> to vector<16x32xf32>
    %31 = arith.mulf %26, %30 : vector<16x32xf32>
    %c0_16 = arith.constant 0 : index
    %c0_17 = arith.constant 0 : index
    %32 = vector.load %arg5[%c0_16, %c0_17] : memref<1x32xf32, #tpu.memory_space<vmem>>, vector<1x32xf32>
    %33 = vector.broadcast %32 : vector<1x32xf32> to vector<16x32xf32>
    %34 = arith.mulf %31, %33 : vector<16x32xf32>
    %c0_18 = arith.constant 0 : index
    %c0_19 = arith.constant 0 : index
    %35 = vector.load %arg6[%c0_18, %c0_19] : memref<1x32xf32, #tpu.memory_space<vmem>>, vector<1x32xf32>
    %36 = vector.broadcast %35 : vector<1x32xf32> to vector<16x32xf32>
    %37 = arith.addf %34, %36 : vector<16x32xf32>
    %c0_20 = arith.constant 0 : index
    %c0_21 = arith.constant 0 : index
    %38 = vector.load %arg7[%c0_20, %c0_21] : memref<16x1xf32, #tpu.memory_space<vmem>>, vector<16x1xf32>
    %39 = vector.broadcast %38 : vector<16x1xf32> to vector<16x32xf32>
    %40 = arith.mulf %37, %39 : vector<16x32xf32>
    %c0_22 = arith.constant 0 : index
    %c0_23 = arith.constant 0 : index
    %41 = vector.load %arg8[%c0_22, %c0_23] : memref<16x32xf32, #tpu.memory_space<vmem>>, vector<16x32xf32>
    tpu.vector_store %arg8[%c0_22, %c0_23], %40 {strides = array<i32>} : memref<16x32xf32, #tpu.memory_space<vmem>>, vector<16x32xf32>,
    return
  }
}

module attributes {stable_mosaic.version = 11 : i64} {
  func.func @_mha_kernel(%arg0: i32, %arg1: memref<1x13x32xf32, #tpu.memory_space<vmem>>, %arg2: memref<32x96xf32, #tpu.memory_space<vmem>>, %arg3: memref<1x96xf32, #tpu.memory_space<vmem>>, %arg4: memref<1x13x13xf32, #tpu.memory_space<vmem>>, %arg5: memref<1x13x32xf32, #tpu.memory_space<vmem>>) attributes {dimension_semantics = [#tpu.dimension_semantics<parallel>], iteration_bounds = array<i64: 2>, scalar_prefetch = 0 : i64, scratch_operands = 0 : i64, tpu.core_type = #tpu.core_type<tc>, window_params = [{transform_indices = @transform_0, window_bounds = array<i64: 1, 13, 32>}, {pipeline_mode = #tpu.pipeline_mode<synchronous>, transform_indices = @transform_1, window_bounds = array<i64: 32, 96>}, {pipeline_mode = #tpu.pipeline_mode<synchronous>, transform_indices = @transform_2, window_bounds = array<i64: 1, 96>}, {transform_indices = @transform_3, window_bounds = array<i64: 1, 13, 13>}, {transform_indices = @transform_4, window_bounds = array<i64: 1, 13, 32>}]} {
    %c0 = arith.constant 0 : index
    %c0_0 = arith.constant 0 : index
    %c0_1 = arith.constant 0 : index
    %0 = vector.load %arg1[%c0, %c0_0, %c0_1] : memref<1x13x32xf32, #tpu.memory_space<vmem>>, vector<1x13x32xf32>
    %1 = vector.shape_cast %0 : vector<1x13x32xf32> to vector<13x32xf32>
    %c0_2 = arith.constant 0 : index
    %c0_3 = arith.constant 0 : index
    %2 = vector.load %arg2[%c0_2, %c0_3] : memref<32x96xf32, #tpu.memory_space<vmem>>, vector<32x96xf32>
    %cst = arith.constant dense<0.000000e+00> : vector<13x96xf32>
    %3 = tpu.matmul %1, %2, %cst {dimension_numbers = #tpu.dot_dimension_numbers<[1], [0], [0], [1], [0, 0, 1, 1], [], []>} : vector<13x32xf32>, vector<32x96xf32>, vector<13x96xf32> -> vector<13x96xf32>
    %c0_4 = arith.constant 0 : index
    %c0_5 = arith.constant 0 : index
    %4 = vector.load %arg3[%c0_4, %c0_5] : memref<1x96xf32, #tpu.memory_space<vmem>>, vector<1x96xf32>
    %5 = vector.broadcast %4 : vector<1x96xf32> to vector<13x96xf32>
    %6 = arith.addf %3, %5 : vector<13x96xf32>
    %c0_6 = arith.constant 0 : index
    %c0_7 = arith.constant 0 : index
    %c0_8 = arith.constant 0 : index
    %7 = vector.load %arg4[%c0_6, %c0_7, %c0_8] : memref<1x13x13xf32, #tpu.memory_space<vmem>>, vector<1x13x13xf32>
    %8 = vector.shape_cast %7 : vector<1x13x13xf32> to vector<13x13xf32>
    %9 = vector.extract_strided_slice %6 {offsets = [0, 0], sizes = [13, 16], strides = [1, 1]} : vector<13x96xf32> to vector<13x16xf32>
    %10 = vector.extract_strided_slice %6 {offsets = [0, 32], sizes = [13, 16], strides = [1, 1]} : vector<13x96xf32> to vector<13x16xf32>
    %11 = vector.extract_strided_slice %6 {offsets = [0, 64], sizes = [13, 16], strides = [1, 1]} : vector<13x96xf32> to vector<13x16xf32>
    %cst_9 = arith.constant dense<0.000000e+00> : vector<13x13xf32>
    %12 = tpu.matmul %9, %10, %cst_9 {dimension_numbers = #tpu.dot_dimension_numbers<[1], [1], [0], [0], [0, 0, 1, 0], [], []>} : vector<13x16xf32>, vector<13x16xf32>, vector<13x13xf32> -> vector<13x13xf32>
    %cst_10 = arith.constant 2.500000e-01 : f32
    %13 = vector.broadcast %cst_10 : f32 to vector<13x13xf32>
    %14 = arith.mulf %12, %13 : vector<13x13xf32>
    %15 = arith.addf %14, %8 : vector<13x13xf32>
    %cst_11 = arith.constant dense<0xFF800000> : vector<13xf32>
    %16 = vector.multi_reduction <maximumf>, %15, %cst_11 [1] : vector<13x13xf32> to vector<13xf32>
    %17 = vector.shape_cast %16 : vector<13xf32> to vector<13x1xf32>
    %18 = vector.broadcast %17 : vector<13x1xf32> to vector<13x13xf32>
    %19 = arith.subf %15, %18 : vector<13x13xf32>
    %20 = math.exp %19 : vector<13x13xf32>
    %cst_12 = arith.constant dense<0.000000e+00> : vector<13xf32>
    %21 = vector.multi_reduction <add>, %20, %cst_12 [1] : vector<13x13xf32> to vector<13xf32>
    %22 = vector.shape_cast %21 : vector<13xf32> to vector<13x1xf32>
    %23 = vector.broadcast %22 : vector<13x1xf32> to vector<13x13xf32>
    %24 = arith.divf %20, %23 : vector<13x13xf32>
    %cst_13 = arith.constant dense<0.000000e+00> : vector<13x16xf32>
    %25 = tpu.matmul %24, %11, %cst_13 {dimension_numbers = #tpu.dot_dimension_numbers<[1], [0], [0], [1], [0, 0, 1, 1], [], []>} : vector<13x13xf32>, vector<13x16xf32>, vector<13x16xf32> -> vector<13x16xf32>
    %26 = vector.extract_strided_slice %6 {offsets = [0, 16], sizes = [13, 16], strides = [1, 1]} : vector<13x96xf32> to vector<13x16xf32>
    %27 = vector.extract_strided_slice %6 {offsets = [0, 48], sizes = [13, 16], strides = [1, 1]} : vector<13x96xf32> to vector<13x16xf32>
    %28 = vector.extract_strided_slice %6 {offsets = [0, 80], sizes = [13, 16], strides = [1, 1]} : vector<13x96xf32> to vector<13x16xf32>
    %cst_14 = arith.constant dense<0.000000e+00> : vector<13x13xf32>
    %29 = tpu.matmul %26, %27, %cst_14 {dimension_numbers = #tpu.dot_dimension_numbers<[1], [1], [0], [0], [0, 0, 1, 0], [], []>} : vector<13x16xf32>, vector<13x16xf32>, vector<13x13xf32> -> vector<13x13xf32>
    %cst_15 = arith.constant 2.500000e-01 : f32
    %30 = vector.broadcast %cst_15 : f32 to vector<13x13xf32>
    %31 = arith.mulf %29, %30 : vector<13x13xf32>
    %32 = arith.addf %31, %8 : vector<13x13xf32>
    %cst_16 = arith.constant dense<0xFF800000> : vector<13xf32>
    %33 = vector.multi_reduction <maximumf>, %32, %cst_16 [1] : vector<13x13xf32> to vector<13xf32>
    %34 = vector.shape_cast %33 : vector<13xf32> to vector<13x1xf32>
    %35 = vector.broadcast %34 : vector<13x1xf32> to vector<13x13xf32>
    %36 = arith.subf %32, %35 : vector<13x13xf32>
    %37 = math.exp %36 : vector<13x13xf32>
    %cst_17 = arith.constant dense<0.000000e+00> : vector<13xf32>
    %38 = vector.multi_reduction <add>, %37, %cst_17 [1] : vector<13x13xf32> to vector<13xf32>
    %39 = vector.shape_cast %38 : vector<13xf32> to vector<13x1xf32>
    %40 = vector.broadcast %39 : vector<13x1xf32> to vector<13x13xf32>
    %41 = arith.divf %37, %40 : vector<13x13xf32>
    %cst_18 = arith.constant dense<0.000000e+00> : vector<13x16xf32>
    %42 = tpu.matmul %41, %28, %cst_18 {dimension_numbers = #tpu.dot_dimension_numbers<[1], [0], [0], [1], [0, 0, 1, 1], [], []>} : vector<13x13xf32>, vector<13x16xf32>, vector<13x16xf32> -> vector<13x16xf32>
    %43 = tpu.concatenate %25, %42 in 1 : vector<13x16xf32>, vector<13x16xf32> -> vector<13x32xf32>
    %c0_19 = arith.constant 0 : index
    %c0_20 = arith.constant 0 : index
    %c0_21 = arith.constant 0 : index
    %44 = vector.load %arg5[%c0_19, %c0_20, %c0_21] : memref<1x13x32xf32, #tpu.memory_space<vmem>>, vector<1x13x32xf32>
    %45 = vector.shape_cast %44 : vector<1x13x32xf32> to vector<13x32xf32>
    %46 = vector.shape_cast %43 : vector<13x32xf32> to vector<1x13x32xf32>
    tpu.vector_store %arg5[%c0_19, %c0_20, %c0_21], %46 {strides = array<i32>} : memref<1x13x32xf32, #tpu.memory_space<vmem>>, vector<1x13x32xf32>,
    return
  }
  func.func @transform_0(%arg0: i32) -> (i32, i32, i32) {
    %c0_i32 = arith.constant 0 : i32
    %c0_i32_0 = arith.constant 0 : i32
    %c0_i32_1 = arith.constant 0 : i32
    return %arg0, %c0_i32, %c0_i32_0 : i32, i32, i32
  }
  func.func @transform_1(%arg0: i32) -> (i32, i32) {
    %c0_i32 = arith.constant 0 : i32
    %c0_i32_0 = arith.constant 0 : i32
    %c0_i32_1 = arith.constant 0 : i32
    return %c0_i32, %c0_i32_0 : i32, i32
  }
  func.func @transform_2(%arg0: i32) -> (i32, i32) {
    %c0_i32 = arith.constant 0 : i32
    %c0_i32_0 = arith.constant 0 : i32
    %c0_i32_1 = arith.constant 0 : i32
    return %c0_i32, %c0_i32_0 : i32, i32
  }
  func.func @transform_3(%arg0: i32) -> (i32, i32, i32) {
    %c0_i32 = arith.constant 0 : i32
    %c0_i32_0 = arith.constant 0 : i32
    %c0_i32_1 = arith.constant 0 : i32
    return %arg0, %c0_i32, %c0_i32_0 : i32, i32, i32
  }
  func.func @transform_4(%arg0: i32) -> (i32, i32, i32) {
    %c0_i32 = arith.constant 0 : i32
    %c0_i32_0 = arith.constant 0 : i32
    %c0_i32_1 = arith.constant 0 : i32
    return %arg0, %c0_i32, %c0_i32_0 : i32, i32, i32
  }
}

module attributes {stable_mosaic.version = 11 : i64} {
  func.func @_linear_resid_ln_mask_kernel(%arg0: memref<26x32xf32, #tpu.memory_space<vmem>>, %arg1: memref<26x32xf32, #tpu.memory_space<vmem>>, %arg2: memref<32x32xf32, #tpu.memory_space<vmem>>, %arg3: memref<1x32xf32, #tpu.memory_space<vmem>>, %arg4: memref<1x32xf32, #tpu.memory_space<vmem>>, %arg5: memref<1x32xf32, #tpu.memory_space<vmem>>, %arg6: memref<26x1xf32, #tpu.memory_space<vmem>>, %arg7: memref<26x32xf32, #tpu.memory_space<vmem>>) attributes {dimension_semantics = [], scalar_prefetch = 0 : i64, scratch_operands = 0 : i64, tpu.core_type = #tpu.core_type<tc>} {
    %c0 = arith.constant 0 : index
    %c0_0 = arith.constant 0 : index
    %0 = vector.load %arg0[%c0, %c0_0] : memref<26x32xf32, #tpu.memory_space<vmem>>, vector<26x32xf32>
    %c0_1 = arith.constant 0 : index
    %c0_2 = arith.constant 0 : index
    %1 = vector.load %arg2[%c0_1, %c0_2] : memref<32x32xf32, #tpu.memory_space<vmem>>, vector<32x32xf32>
    %cst = arith.constant dense<0.000000e+00> : vector<26x32xf32>
    %2 = tpu.matmul %0, %1, %cst {dimension_numbers = #tpu.dot_dimension_numbers<[1], [0], [0], [1], [0, 0, 1, 1], [], []>} : vector<26x32xf32>, vector<32x32xf32>, vector<26x32xf32> -> vector<26x32xf32>
    %c0_3 = arith.constant 0 : index
    %c0_4 = arith.constant 0 : index
    %3 = vector.load %arg3[%c0_3, %c0_4] : memref<1x32xf32, #tpu.memory_space<vmem>>, vector<1x32xf32>
    %4 = vector.broadcast %3 : vector<1x32xf32> to vector<26x32xf32>
    %5 = arith.addf %2, %4 : vector<26x32xf32>
    %c0_5 = arith.constant 0 : index
    %c0_6 = arith.constant 0 : index
    %6 = vector.load %arg1[%c0_5, %c0_6] : memref<26x32xf32, #tpu.memory_space<vmem>>, vector<26x32xf32>
    %7 = arith.addf %5, %6 : vector<26x32xf32>
    %cst_7 = arith.constant dense<0.000000e+00> : vector<26xf32>
    %8 = vector.multi_reduction <add>, %7, %cst_7 [1] : vector<26x32xf32> to vector<26xf32>
    %9 = vector.shape_cast %8 : vector<26xf32> to vector<26x1xf32>
    %cst_8 = arith.constant 3.200000e+01 : f32
    %10 = vector.broadcast %cst_8 : f32 to vector<26x1xf32>
    %11 = arith.divf %9, %10 : vector<26x1xf32>
    %12 = vector.broadcast %11 : vector<26x1xf32> to vector<26x32xf32>
    %13 = arith.subf %7, %12 : vector<26x32xf32>
    %14 = arith.mulf %13, %13 : vector<26x32xf32>
    %cst_9 = arith.constant dense<0.000000e+00> : vector<26xf32>
    %15 = vector.multi_reduction <add>, %14, %cst_9 [1] : vector<26x32xf32> to vector<26xf32>
    %16 = vector.shape_cast %15 : vector<26xf32> to vector<26x1xf32>
    %cst_10 = arith.constant 3.200000e+01 : f32
    %17 = vector.broadcast %cst_10 : f32 to vector<26x1xf32>
    %18 = arith.divf %16, %17 : vector<26x1xf32>
    %19 = vector.broadcast %11 : vector<26x1xf32> to vector<26x32xf32>
    %20 = arith.subf %7, %19 : vector<26x32xf32>
    %cst_11 = arith.constant 9.99999974E-6 : f32
    %21 = vector.broadcast %cst_11 : f32 to vector<26x1xf32>
    %22 = arith.addf %18, %21 : vector<26x1xf32>
    %23 = math.rsqrt %22 : vector<26x1xf32>
    %24 = vector.broadcast %23 : vector<26x1xf32> to vector<26x32xf32>
    %25 = arith.mulf %20, %24 : vector<26x32xf32>
    %c0_12 = arith.constant 0 : index
    %c0_13 = arith.constant 0 : index
    %26 = vector.load %arg4[%c0_12, %c0_13] : memref<1x32xf32, #tpu.memory_space<vmem>>, vector<1x32xf32>
    %27 = vector.broadcast %26 : vector<1x32xf32> to vector<26x32xf32>
    %28 = arith.mulf %25, %27 : vector<26x32xf32>
    %c0_14 = arith.constant 0 : index
    %c0_15 = arith.constant 0 : index
    %29 = vector.load %arg5[%c0_14, %c0_15] : memref<1x32xf32, #tpu.memory_space<vmem>>, vector<1x32xf32>
    %30 = vector.broadcast %29 : vector<1x32xf32> to vector<26x32xf32>
    %31 = arith.addf %28, %30 : vector<26x32xf32>
    %c0_16 = arith.constant 0 : index
    %c0_17 = arith.constant 0 : index
    %32 = vector.load %arg6[%c0_16, %c0_17] : memref<26x1xf32, #tpu.memory_space<vmem>>, vector<26x1xf32>
    %33 = vector.broadcast %32 : vector<26x1xf32> to vector<26x32xf32>
    %34 = arith.mulf %31, %33 : vector<26x32xf32>
    %c0_18 = arith.constant 0 : index
    %c0_19 = arith.constant 0 : index
    %35 = vector.load %arg7[%c0_18, %c0_19] : memref<26x32xf32, #tpu.memory_space<vmem>>, vector<26x32xf32>
    tpu.vector_store %arg7[%c0_18, %c0_19], %34 {strides = array<i32>} : memref<26x32xf32, #tpu.memory_space<vmem>>, vector<26x32xf32>,
    return
  }
}

module attributes {stable_mosaic.version = 11 : i64} {
  func.func @_ffn_resid_ln_mask_kernel(%arg0: memref<26x32xf32, #tpu.memory_space<vmem>>, %arg1: memref<32x64xf32, #tpu.memory_space<vmem>>, %arg2: memref<1x64xf32, #tpu.memory_space<vmem>>, %arg3: memref<64x32xf32, #tpu.memory_space<vmem>>, %arg4: memref<1x32xf32, #tpu.memory_space<vmem>>, %arg5: memref<1x32xf32, #tpu.memory_space<vmem>>, %arg6: memref<1x32xf32, #tpu.memory_space<vmem>>, %arg7: memref<26x1xf32, #tpu.memory_space<vmem>>, %arg8: memref<26x32xf32, #tpu.memory_space<vmem>>) attributes {dimension_semantics = [], scalar_prefetch = 0 : i64, scratch_operands = 0 : i64, tpu.core_type = #tpu.core_type<tc>} {
    %c0 = arith.constant 0 : index
    %c0_0 = arith.constant 0 : index
    %0 = vector.load %arg0[%c0, %c0_0] : memref<26x32xf32, #tpu.memory_space<vmem>>, vector<26x32xf32>
    %c0_1 = arith.constant 0 : index
    %c0_2 = arith.constant 0 : index
    %1 = vector.load %arg1[%c0_1, %c0_2] : memref<32x64xf32, #tpu.memory_space<vmem>>, vector<32x64xf32>
    %cst = arith.constant dense<0.000000e+00> : vector<26x64xf32>
    %2 = tpu.matmul %0, %1, %cst {dimension_numbers = #tpu.dot_dimension_numbers<[1], [0], [0], [1], [0, 0, 1, 1], [], []>} : vector<26x32xf32>, vector<32x64xf32>, vector<26x64xf32> -> vector<26x64xf32>
    %c0_3 = arith.constant 0 : index
    %c0_4 = arith.constant 0 : index
    %3 = vector.load %arg2[%c0_3, %c0_4] : memref<1x64xf32, #tpu.memory_space<vmem>>, vector<1x64xf32>
    %4 = vector.broadcast %3 : vector<1x64xf32> to vector<26x64xf32>
    %5 = arith.addf %2, %4 : vector<26x64xf32>
    %cst_5 = arith.constant 0.000000e+00 : f32
    %6 = vector.broadcast %cst_5 : f32 to vector<26x64xf32>
    %7 = arith.maximumf %5, %6 : vector<26x64xf32>
    %c0_6 = arith.constant 0 : index
    %c0_7 = arith.constant 0 : index
    %8 = vector.load %arg3[%c0_6, %c0_7] : memref<64x32xf32, #tpu.memory_space<vmem>>, vector<64x32xf32>
    %cst_8 = arith.constant dense<0.000000e+00> : vector<26x32xf32>
    %9 = tpu.matmul %7, %8, %cst_8 {dimension_numbers = #tpu.dot_dimension_numbers<[1], [0], [0], [1], [0, 0, 1, 1], [], []>} : vector<26x64xf32>, vector<64x32xf32>, vector<26x32xf32> -> vector<26x32xf32>
    %c0_9 = arith.constant 0 : index
    %c0_10 = arith.constant 0 : index
    %10 = vector.load %arg4[%c0_9, %c0_10] : memref<1x32xf32, #tpu.memory_space<vmem>>, vector<1x32xf32>
    %11 = vector.broadcast %10 : vector<1x32xf32> to vector<26x32xf32>
    %12 = arith.addf %9, %11 : vector<26x32xf32>
    %13 = arith.addf %12, %0 : vector<26x32xf32>
    %cst_11 = arith.constant dense<0.000000e+00> : vector<26xf32>
    %14 = vector.multi_reduction <add>, %13, %cst_11 [1] : vector<26x32xf32> to vector<26xf32>
    %15 = vector.shape_cast %14 : vector<26xf32> to vector<26x1xf32>
    %cst_12 = arith.constant 3.200000e+01 : f32
    %16 = vector.broadcast %cst_12 : f32 to vector<26x1xf32>
    %17 = arith.divf %15, %16 : vector<26x1xf32>
    %18 = vector.broadcast %17 : vector<26x1xf32> to vector<26x32xf32>
    %19 = arith.subf %13, %18 : vector<26x32xf32>
    %20 = arith.mulf %19, %19 : vector<26x32xf32>
    %cst_13 = arith.constant dense<0.000000e+00> : vector<26xf32>
    %21 = vector.multi_reduction <add>, %20, %cst_13 [1] : vector<26x32xf32> to vector<26xf32>
    %22 = vector.shape_cast %21 : vector<26xf32> to vector<26x1xf32>
    %cst_14 = arith.constant 3.200000e+01 : f32
    %23 = vector.broadcast %cst_14 : f32 to vector<26x1xf32>
    %24 = arith.divf %22, %23 : vector<26x1xf32>
    %25 = vector.broadcast %17 : vector<26x1xf32> to vector<26x32xf32>
    %26 = arith.subf %13, %25 : vector<26x32xf32>
    %cst_15 = arith.constant 9.99999974E-6 : f32
    %27 = vector.broadcast %cst_15 : f32 to vector<26x1xf32>
    %28 = arith.addf %24, %27 : vector<26x1xf32>
    %29 = math.rsqrt %28 : vector<26x1xf32>
    %30 = vector.broadcast %29 : vector<26x1xf32> to vector<26x32xf32>
    %31 = arith.mulf %26, %30 : vector<26x32xf32>
    %c0_16 = arith.constant 0 : index
    %c0_17 = arith.constant 0 : index
    %32 = vector.load %arg5[%c0_16, %c0_17] : memref<1x32xf32, #tpu.memory_space<vmem>>, vector<1x32xf32>
    %33 = vector.broadcast %32 : vector<1x32xf32> to vector<26x32xf32>
    %34 = arith.mulf %31, %33 : vector<26x32xf32>
    %c0_18 = arith.constant 0 : index
    %c0_19 = arith.constant 0 : index
    %35 = vector.load %arg6[%c0_18, %c0_19] : memref<1x32xf32, #tpu.memory_space<vmem>>, vector<1x32xf32>
    %36 = vector.broadcast %35 : vector<1x32xf32> to vector<26x32xf32>
    %37 = arith.addf %34, %36 : vector<26x32xf32>
    %c0_20 = arith.constant 0 : index
    %c0_21 = arith.constant 0 : index
    %38 = vector.load %arg7[%c0_20, %c0_21] : memref<26x1xf32, #tpu.memory_space<vmem>>, vector<26x1xf32>
    %39 = vector.broadcast %38 : vector<26x1xf32> to vector<26x32xf32>
    %40 = arith.mulf %37, %39 : vector<26x32xf32>
    %c0_22 = arith.constant 0 : index
    %c0_23 = arith.constant 0 : index
    %41 = vector.load %arg8[%c0_22, %c0_23] : memref<26x32xf32, #tpu.memory_space<vmem>>, vector<26x32xf32>
    tpu.vector_store %arg8[%c0_22, %c0_23], %40 {strides = array<i32>} : memref<26x32xf32, #tpu.memory_space<vmem>>, vector<26x32xf32>,
    return
  }
}

module attributes {stable_mosaic.version = 11 : i64} {
  func.func @_heads_kernel(%arg0: memref<2x34xf32, #tpu.memory_space<vmem>>, %arg1: memref<34x768xf32, #tpu.memory_space<vmem>>, %arg2: memref<1x768xf32, #tpu.memory_space<vmem>>, %arg3: memref<1x768xf32, #tpu.memory_space<vmem>>, %arg4: memref<1x768xf32, #tpu.memory_space<vmem>>, %arg5: memref<768x12xf32, #tpu.memory_space<vmem>>, %arg6: memref<1x12xf32, #tpu.memory_space<vmem>>, %arg7: memref<2x12xf32, #tpu.memory_space<vmem>>) attributes {dimension_semantics = [], scalar_prefetch = 0 : i64, scratch_operands = 0 : i64, tpu.core_type = #tpu.core_type<tc>} {
    %c0 = arith.constant 0 : index
    %c0_0 = arith.constant 0 : index
    %0 = vector.load %arg0[%c0, %c0_0] : memref<2x34xf32, #tpu.memory_space<vmem>>, vector<2x34xf32>
    %c0_1 = arith.constant 0 : index
    %c0_2 = arith.constant 0 : index
    %1 = vector.load %arg1[%c0_1, %c0_2] : memref<34x768xf32, #tpu.memory_space<vmem>>, vector<34x768xf32>
    %cst = arith.constant dense<0.000000e+00> : vector<2x768xf32>
    %2 = tpu.matmul %0, %1, %cst {dimension_numbers = #tpu.dot_dimension_numbers<[1], [0], [0], [1], [0, 0, 1, 1], [], []>} : vector<2x34xf32>, vector<34x768xf32>, vector<2x768xf32> -> vector<2x768xf32>
    %c0_3 = arith.constant 0 : index
    %c0_4 = arith.constant 0 : index
    %3 = vector.load %arg2[%c0_3, %c0_4] : memref<1x768xf32, #tpu.memory_space<vmem>>, vector<1x768xf32>
    %4 = vector.broadcast %3 : vector<1x768xf32> to vector<2x768xf32>
    %5 = arith.addf %2, %4 : vector<2x768xf32>
    %c0_5 = arith.constant 0 : index
    %c0_6 = arith.constant 0 : index
    %6 = vector.load %arg3[%c0_5, %c0_6] : memref<1x768xf32, #tpu.memory_space<vmem>>, vector<1x768xf32>
    %7 = vector.broadcast %6 : vector<1x768xf32> to vector<2x768xf32>
    %8 = arith.mulf %5, %7 : vector<2x768xf32>
    %c0_7 = arith.constant 0 : index
    %c0_8 = arith.constant 0 : index
    %9 = vector.load %arg4[%c0_7, %c0_8] : memref<1x768xf32, #tpu.memory_space<vmem>>, vector<1x768xf32>
    %10 = vector.broadcast %9 : vector<1x768xf32> to vector<2x768xf32>
    %11 = arith.addf %8, %10 : vector<2x768xf32>
    %cst_9 = arith.constant 0.000000e+00 : f32
    %12 = vector.broadcast %cst_9 : f32 to vector<2x768xf32>
    %13 = arith.maximumf %11, %12 : vector<2x768xf32>
    %c0_10 = arith.constant 0 : index
    %c0_11 = arith.constant 0 : index
    %14 = vector.load %arg5[%c0_10, %c0_11] : memref<768x12xf32, #tpu.memory_space<vmem>>, vector<768x12xf32>
    %cst_12 = arith.constant dense<0.000000e+00> : vector<2x12xf32>
    %15 = tpu.matmul %13, %14, %cst_12 {dimension_numbers = #tpu.dot_dimension_numbers<[1], [0], [0], [1], [0, 0, 1, 1], [], []>} : vector<2x768xf32>, vector<768x12xf32>, vector<2x12xf32> -> vector<2x12xf32>
    %c0_13 = arith.constant 0 : index
    %c0_14 = arith.constant 0 : index
    %16 = vector.load %arg6[%c0_13, %c0_14] : memref<1x12xf32, #tpu.memory_space<vmem>>, vector<1x12xf32>
    %17 = vector.broadcast %16 : vector<1x12xf32> to vector<2x12xf32>
    %18 = arith.addf %15, %17 : vector<2x12xf32>
    %19 = arith.negf %18 : vector<2x12xf32>
    %20 = math.exp %19 : vector<2x12xf32>
    %cst_15 = arith.constant 1.000000e+00 : f32
    %21 = vector.broadcast %cst_15 : f32 to vector<2x12xf32>
    %22 = arith.addf %21, %20 : vector<2x12xf32>
    %23 = arith.divf %21, %22 : vector<2x12xf32>
    %c0_16 = arith.constant 0 : index
    %c0_17 = arith.constant 0 : index
    %24 = vector.load %arg7[%c0_16, %c0_17] : memref<2x12xf32, #tpu.memory_space<vmem>>, vector<2x12xf32>
    tpu.vector_store %arg7[%c0_16, %c0_17], %23 {strides = array<i32>} : memref<2x12xf32, #tpu.memory_space<vmem>>, vector<2x12xf32>,
    return
  }
}

</mosaic_0001>

<bundles_post_ra>
// kernel: forward.13
= control target key start
LH: loop header
LB: loop body
LE: loop exit
PB: predicated region body
PF: predicated region fallthrough
CT: control target
= control target key end

     0   :  { %vm30_vm0 = vcmask 261120   ;;  %v145_v13 = vmov 32.0   ;;  %s217_s1 = inlined_call_operand.vmem [shape: f32[32,32], index: 1, kind: input, shape index: {}]   ;;  %s218_s2 = inlined_call_operand.vmem [shape: f32[1,32], index: 2, kind: input, shape index: {}]   ;;  %s219_s0 = inlined_call_operand.vmem [shape: f32[16,32], index: 0, kind: input, shape index: {}]   ;;  %s220_s3 = inlined_call_operand.vmem [shape: f32[1,32], index: 3, kind: input, shape index: {}]   ;;  %s221_s4 = inlined_call_operand.vmem [shape: f32[1,32], index: 4, kind: input, shape index: {}]   ;;  %s222_s5 = inlined_call_operand.vmem [shape: f32[16,32], index: 5, kind: output, shape index: {}]  }
   0x1   :  { %v25_v0 = vld [vmem:[%s217_s1 + $0x18] sm:$0xff]  ;;  %v24_v1 = vld [vmem:[%s217_s1 + $0x10] sm:$0xff]  ;;  %v23_v2 = vld [vmem:[%s217_s1 + $0x8] sm:$0xff]  ;;  %139 = vrcp.f32 %v145_v13 }
   0x2   :  { %49 = vmatpush.msra.mxu0 %v25_v0  ;;  %131 = vmatpush.msra.mxu1 %v25_v0  ;;  %v22_v3 = vld [vmem:[%s217_s1] sm:$0xff]  ;;  %v21_v5 = vld [vmem:[%s219_s0 + $0x8] sm:$0xff] }
   0x3   :  { %v20_v4 = vld [vmem:[%s219_s0] sm:$0xff] }
   0x4   :  { %50 = vmatpush.msra.mxu0 %v24_v1  ;;  %132 = vmatpush.msra.mxu1 %v24_v1  ;;  %v136_v6 = vld [vmem:[%s218_s2] ss:$0 sm:$0xff] }
   0x5   :  { %v137_v44 = vld [vmem:[%s220_s3] ss:$0 sm:$0xff] }
   0x6   :  { %51 = vmatpush.msra.mxu0 %v23_v2  ;;  %133 = vmatpush.msra.mxu1 %v23_v2  ;;  %v138_v47 = vld [vmem:[%s221_s4] ss:$0 sm:$0xff] }
   0x7   :  { %v140_v14 = vpop.eup %139 }
   0x8   :  { %52 = vmatpush.msra.mxu0 %v22_v3  ;;  %134 = vmatpush.msra.mxu1 %v22_v3  ;;  %v67_v15 = vmul.f32 32.0, %v140_v14  ;;  %vm71_vm1 = vweird.f32 %v140_v14 }
   0x9   :  { %129 = vmatmul.msk.f32.vlgmr.msra.gmra.mxu0 %vm30_vm0, %v20_v4  ;;  %130 = vmatmul.msk.f32.vlgmr.msra.gmra.mxu1 %vm30_vm0, %v21_v5 }
   0xa   :  { %v68_v16 = vsub.f32 1.0, %v67_v15 }
   0xc   :  { %v69_v17 = vmul.f32 %v140_v14, %v68_v16 }
   0xe   :  { %v70_v18 = vadd.f32 %v140_v14, %v69_v17 }
  0x10   :  { %v72_v19 = vsel %vm71_vm1, %v140_v14, %v70_v18 }
  0x86   :  { %v54_v7 = vpop.f32.mrf.mxu0  ;;  %v57_v9 = vpop.f32.mrf.mxu1 }
  0x87   :  { %v55_v8 = vadd.f32 %v136_v6, %v54_v7  ;;  %v58_v11 = vadd.f32 %v136_v6, %v57_v9 }
  0x89   :  { %v60_v10 = vsel %vm30_vm0, %v55_v8, 0.0  ;;  %v63_v12 = vsel %vm30_vm0, %v58_v11, 0.0 }
  0x8a   :  { %61 = vadd.xlane.f32.xlu0 %v60_v10 }
  0x92   :  { %64 = vadd.xlane.f32.xlu0 %v63_v12 }
  0xfd   :  { %v62_v20 = vpop.xlane.xlu0 %61 }
  0xfe   :  { %v73_v21 = vmul.f32 %v72_v19, %v62_v20 }
 0x100   :  { %v75_v22 = vsub.f32 %v55_v8, %v73_v21 }
 0x102   :  { %v77_v23 = vmul.f32 %v75_v22, %v75_v22 }
 0x104   :  { %v79_v24 = vsel %vm30_vm0, %v77_v23, 0.0 }
 0x105   :  { %80 = vadd.xlane.f32.xlu1 %v79_v24  ;;  %v65_v25 = vpop.xlane.xlu0 %64 }
 0x106   :  { %v74_v26 = vmul.f32 %v72_v19, %v65_v25 }
 0x108   :  { %v76_v27 = vsub.f32 %v58_v11, %v74_v26 }
 0x10a   :  { %v78_v28 = vmul.f32 %v76_v27, %v76_v27 }
 0x10c   :  { %v82_v29 = vsel %vm30_vm0, %v78_v28, 0.0 }
 0x10d   :  { %83 = vadd.xlane.f32.xlu1 %v82_v29 }
 0x178   :  { %v81_v30 = vpop.xlane.xlu1 %80 }
 0x179   :  { %v85_v31 = vmul.f32 %v81_v30, %v72_v19 }
 0x17b   :  { %v87_v32 = vadd.f32 1e-05, %v85_v31 }
 0x17d   :  { %141 = vrsqrt.f32 %v87_v32  ;;  %vm95_vm3 = vweird.f32 %v87_v32 }
 0x180   :  { %v84_v33 = vpop.xlane.xlu1 %83 }
 0x181   :  { %v86_v34 = vmul.f32 %v84_v33, %v72_v19 }
 0x183   :  { %v142_v35 = vpop.eup %141  ;;  %v88_v36 = vadd.f32 1e-05, %v86_v34 }
 0x184   :  { %v90_v37 = vmul.f32 %v142_v35, %v87_v32  ;;  %vm96_vm2 = vweird.f32 %v142_v35 }
 0x185   :  { %143 = vrsqrt.f32 %v88_v36  ;;  %vm97_vm4 = vmor %vm95_vm3, %vm96_vm2  ;;  %vm105_vm6 = vweird.f32 %v88_v36 }
 0x186   :  { %v91_v38 = vmul.f32 %v142_v35, %v90_v37 }
 0x188   :  { %v92_v39 = vmul.f32 0.5, %v91_v38 }
 0x18a   :  { %v93_v40 = vsub.f32 1.5, %v92_v39 }
 0x18b   :  { %v144_v41 = vpop.eup %143 }
 0x18c   :  { %v94_v42 = vmul.f32 %v142_v35, %v93_v40  ;;  %v100_v43 = vmul.f32 %v144_v41, %v88_v36  ;;  %vm106_vm5 = vweird.f32 %v144_v41 }
 0x18d   :  { %vm107_vm7 = vmor %vm105_vm6, %vm106_vm5 }
 0x18e   :  { %v98_v45 = vsel %vm97_vm4, %v142_v35, %v94_v42  ;;  %v101_v46 = vmul.f32 %v144_v41, %v100_v43 }
 0x18f   :  { %v109_v48 = vmul.f32 %v98_v45, %v75_v22 }
 0x190   :  { %v102_v49 = vmul.f32 0.5, %v101_v46 }
 0x191   :  { %v115_v50 = vmul.f32 %v137_v44, %v109_v48 }
 0x192   :  { %v103_v51 = vsub.f32 1.5, %v102_v49 }
 0x193   :  { %v121_v52 = vadd.f32 %v138_v47, %v115_v50 }
 0x194   :  { %v104_v53 = vmul.f32 %v144_v41, %v103_v51 }
 0x195   :  { %123 = vst.msk [vmem:[%s222_s5] sm:$0xff] %vm30_vm0, %v121_v52 }
 0x196   :  { %v108_v54 = vsel %vm107_vm7, %v144_v41, %v104_v53 }
 0x197   :  { %v110_v55 = vmul.f32 %v108_v54, %v76_v27 }
 0x199   :  { %v116_v56 = vmul.f32 %v137_v44, %v110_v55 }
 0x19b   :  { %v122_v57 = vadd.f32 %v138_v47, %v116_v56 }
 0x19d   :  { %124 = vst.msk [vmem:[%s222_s5 + $0x8] sm:$0xff] %vm30_vm0, %v122_v57 }

// kernel: forward.11
= control target key start
LH: loop header
LB: loop body
LE: loop exit
PB: predicated region body
PF: predicated region fallthrough
CT: control target
= control target key end

     0   :  { %vm76_vm0 = vcmask 1045504   ;;  %vm72_vm1 = vcmask 48128   ;;  %vm168_vm2 = vcmask 261120   ;;  %vm131_vm3 = vcmask 785408   ;;  %s303_s6 = inlined_call_operand.vmem [shape: f32[6,32], index: 6, kind: input, shape index: {}]   ;;  %s304_s2 = inlined_call_operand.vmem [shape: f32[8,6], index: 2, kind: input, shape index: {}]   ;;  %s305_s4 = inlined_call_operand.vmem [shape: f32[1,6], index: 4, kind: input, shape index: {}]   ;;  %s306_s5 = inlined_call_operand.vmem [shape: f32[1,6], index: 5, kind: input, shape index: {}]   ;;  %s307_s9 = inlined_call_operand.vmem [shape: f32[6,96], index: 9, kind: input, shape index: {}]   ;;  %s308_s8 = inlined_call_operand.vmem [shape: f32[6,96], index: 8, kind: input, shape index: {}]   ;;  %s309_s1 = inlined_call_operand.vmem [shape: f32[8,6], index: 1, kind: input, shape index: {}]   ;;  %s310_s3 = inlined_call_operand.vmem [shape: f32[1,6], index: 3, kind: input, shape index: {}]   ;;  %s311_s7 = inlined_call_operand.vmem [shape: f32[1,32], index: 7, kind: input, shape index: {}]   ;;  %s312_s0 = inlined_call_operand.vmem [shape: f32[8,6], index: 0, kind: input, shape index: {}]   ;;  %s313_s10 = inlined_call_operand.vmem [shape: f32[1,96], index: 10, kind: input, shape index: {}]   ;;  %s314_s12 = inlined_call_operand.vmem [shape: f32[8,32], index: 12, kind: output, shape index: {1}]   ;;  %s315_s11 = inlined_call_operand.vmem [shape: f32[8,96], index: 11, kind: output, shape index: {0}]  }
   0x1   :  { %v133_v0 = vld [vmem:[%s303_s6] sm:$0x3f] }
   0x2   :  { %v42_v1 = vld [vmem:[%s304_s2] sm:$0xff]  ;;  %182 = vmatpush.msk.msra.mxu2 %vm76_vm0, %v133_v0 }
   0x3   :  { %v184_v2 = vld [vmem:[%s305_s4] ss:$0 sm:$0xff]  ;;  %183 = vmatmul.msk.f32.vlgmr.msra.gmra.mxu2 %vm72_vm1, %v42_v1 }
   0x4   :  { %v185_v3 = vld [vmem:[%s306_s5] ss:$0 sm:$0xff]  ;;  %v47_v6 = vmul.f32 %v184_v2, %v42_v1 }
   0x5   :  { %v71_v4 = vld [vmem:[%s307_s9] sm:$0x3f] }
   0x6   :  { %v70_v5 = vld [vmem:[%s308_s8] sm:$0x3f]  ;;  %178 = vmatpush.msk.msra.mxu0 %vm76_vm0, %v71_v4  ;;  %v52_v8 = vadd.f32 %v185_v3, %v47_v6 }
   0x7   :  { %180 = vmatpush.msk.msra.mxu1 %vm76_vm0, %v70_v5  ;;  %v41_v7 = vld [vmem:[%s309_s1] sm:$0xff] }
   0x8   :  { %179 = vmatmul.msk.f32.vlgmr.msra.gmra.mxu0 %vm72_vm1, %v41_v7  ;;  %v53_v9 = vmax.f32 %v52_v8, 0.0  ;;  %v58_v12 = vsub.f32 1.0, %v41_v7  ;;  %v40_v13 = vld [vmem:[%s312_s0] sm:$0xff] }
   0x9   :  { %v57_v15 = vmul.f32 %v41_v7, %v40_v13  ;;  %v186_v18 = vld [vmem:[%s310_s3] ss:$0 sm:$0xff] }
   0xa   :  { %v54_v10 = vsub.f32 0.0, %v53_v9  ;;  %v187_v24 = vld [vmem:[%s311_s7] ss:$0 sm:$0xff] }
   0xb   :  { %v188_v32 = vld [vmem:[%s313_s10] ss:$0 sm:$0xff] }
   0xc   :  { %v55_v11 = vmul.f32 1.442695, %v54_v10 }
   0xe   :  { %189 = vpow2.f32 %v55_v11 }
  0x14   :  { %v190_v14 = vpop.eup %189 }
  0x15   :  { %v59_v16 = vmul.f32 %v190_v14, %v58_v12  ;;  %v62_v17 = vsub.f32 1.0, %v190_v14 }
  0x17   :  { %v60_v19 = vmul.f32 %v59_v16, %v40_v13  ;;  %v63_v20 = vmul.f32 %v62_v17, %v58_v12 }
  0x19   :  { %v61_v21 = vadd.f32 %v60_v19, %v57_v15  ;;  %v68_v22 = vmul.f32 %v186_v18, %v63_v20 }
  0x1b   :  { %v69_v23 = vadd.f32 %v68_v22, %v61_v21 }
  0x1d   :  { %181 = vmatmul.msk.f32.vlgmr.msra.gmra.mxu1 %vm72_vm1, %v69_v23 }
  0x85   :  { %v97_v31 = vpop.f32.mrf.mxu0 }
  0x86   :  { %v161_v25 = vpop.f32.mrf.mxu2 }
  0x87   :  { %v162_v26 = vadd.f32 %v187_v24, %v161_v25 }
  0x89   :  { %v164_v27 = vmax.f32 %v162_v26, 0.0 }
  0x8b   :  { %v165_v28 = vsub.f32 0.0, %v164_v27 }
  0x8d   :  { %v166_v29 = vmul.f32 1.442695, %v165_v28 }
  0x8f   :  { %191 = vpow2.f32 %v166_v29 }
  0x95   :  { %v192_v30 = vpop.eup %191 }
  0x96   :  { %169 = vst.msk [vmem:[%s314_s12] sm:$0xff] %vm168_vm2, %v192_v30 }
  0x9a   :  { %v123_v33 = vpop.f32.mrf.mxu1 }
  0x9b   :  { %v124_v34 = vadd.f32 %v123_v33, %v97_v31 }
  0x9d   :  { %v130_v35 = vadd.f32 %v188_v32, %v124_v34 }
  0x9f   :  { %132 = vst.msk [vmem:[%s315_s11] sm:$0xff] %vm131_vm3, %v130_v35 }

// kernel: forward.12
= control target key start
LH: loop header
LB: loop body
LE: loop exit
PB: predicated region body
PF: predicated region fallthrough
CT: control target
= control target key end

     0   :  { %vm42_vm0 = vcmask 1041409   ;;  %vm44_vm1 = vcmask 261120   ;;  %s619_s10 = smov 96   ;;  %s814_s2 = inlined_call_operand.vmem [shape: f32[32,96], index: 2, kind: input, shape index: {}]   ;;  %s815_s1 = inlined_call_operand.vmem [shape: f32[2,4,32], index: 1, kind: input, shape index: {}]   ;;  %s816_s4 = inlined_call_operand.vmem [shape: f32[2,32], index: 4, kind: input, shape index: {}]   ;;  %s817_s3 = inlined_call_operand.vmem [shape: f32[1,96], index: 3, kind: input, shape index: {}]   ;;  %s818_s0 = inlined_call_operand.vmem [shape: f32[2,4,96], index: 0, kind: input, shape index: {}]   ;;  %s819_s5 = inlined_call_operand.vmem [shape: f32[2,4,32], index: 5, kind: output, shape index: {}]  }
   0x1   :  { %v23_v0 = vld [vmem:[%s814_s2 + $0x18] sm:$0xff]  ;;  %v22_v1 = vld [vmem:[%s814_s2 + $0x10] sm:$0xff]  ;;  %v21_v2 = vld [vmem:[%s814_s2 + $0x8] sm:$0xff] }
   0x2   :  { %59 = vmatpush.msra.mxu0 %v23_v0  ;;  %v662_v3 = vld [vmem:[%s815_s1] sm:$0xf]  ;;  %183 = vmatpush.msra.mxu1 %v23_v0  ;;  %v667_v4 = vld [vmem:[%s815_s1 + $0x4] sm:$0xf] }
   0x3   :  { %v29_v5 = vld [vmem:[%s816_s4] sm:$0x3]  ;;  %308 = vmatpush.msra.mxu2 %v23_v0  ;;  %434 = vmatpush.msra.mxu3 %v23_v0  ;;  %s617_s4 = smov 64   ;;  %v702_v19 = vld [vmem:[%s818_s0 + $0x4] sm:$0xf] }
   0x4   :  { %60 = vmatpush.msra.mxu0 %v22_v1  ;;  %v31_v6 = vrot.slane %v29_v5, 1  ;;  %184 = vmatpush.msra.mxu1 %v22_v1  ;;  %v20_v7 = vld [vmem:[%s814_s2] sm:$0xff]  ;;  %v676_v8 = vmul.f32 %v29_v5, %v662_v3 }
   0x5   :  { %309 = vmatpush.msra.mxu2 %v22_v1  ;;  %435 = vmatpush.msra.mxu3 %v22_v1  ;;  %v688_v12 = vld [vmem:[%s817_s3] ss:$0 sm:$0xff] }
   0x6   :  { %61 = vmatpush.msra.mxu0 %v21_v2  ;;  %v679_v9 = vmul.f32 %v31_v6, %v667_v4  ;;  %185 = vmatpush.msra.mxu1 %v21_v2  ;;  %v696_v16 = vld [vmem:[%s818_s0] sm:$0xf]  ;;  %s618_s0 = smov 32  }
   0x7   :  { %310 = vmatpush.msra.mxu2 %v21_v2  ;;  %436 = vmatpush.msra.mxu3 %v21_v2 }
   0x8   :  { %62 = vmatpush.msra.mxu0 %v20_v7  ;;  %v41_v10 = vrot.slane %v679_v9, 7  ;;  %186 = vmatpush.msra.mxu1 %v20_v7 }
   0x9   :  { %311 = vmatpush.msra.mxu2 %v20_v7  ;;  %437 = vmatpush.msra.mxu3 %v20_v7 }
   0xa   :  { %v43_v11 = vsel %vm42_vm0, %v41_v10, %v676_v8 }
   0xb   :  { %553 = vmatmul.msk.f32.vlgmr.msra.gmra.mxu0 %vm44_vm1, %v43_v11 }
  0x88   :  { %v64_v13 = vpop.f32.mrf.mxu0 }
  0x89   :  { %v65_v14 = vadd.f32 %v688_v12, %v64_v13 }
  0x8b   :  { %111 = vrot.lane.b32.xlu0 %v65_v14, %s617_s4  ;;  %v68_v15 = vrot.slane %v65_v14, 1  ;;  %v71_v17 = vadd.f32 %v65_v14, %v696_v16 }
  0x8d   :  { %v554_v18 = vmul.f32 -1.442695, %v71_v17  ;;  %v72_v20 = vadd.f32 %v68_v15, %v702_v19 }
  0x8f   :  { %569 = vpow2.f32 %v554_v18  ;;  %v555_v21 = vmul.f32 -1.442695, %v72_v20 }
  0x91   :  { %571 = vpow2.f32 %v555_v21 }
  0x93   :  { %113 = vrot.lane.b32.xlu0 %v68_v15, %s617_s4 }
  0x95   :  { %v570_v22 = vpop.eup %569 }
  0x96   :  { %v79_v23 = vadd.f32 1.0, %v570_v22 }
  0x97   :  { %v572_v24 = vpop.eup %571 }
  0x98   :  { %573 = vrcp.f32 %v79_v23  ;;  %v80_v25 = vadd.f32 1.0, %v572_v24  ;;  %v92_v34 = vand.u32 2147483648, %v79_v23  ;;  %vm86_vm3 = vweird.f32 %v79_v23 }
  0x99   :  { %v90_v35 = vand.u32 2147483647, %v79_v23 }
  0x9a   :  { %575 = vrcp.f32 %v80_v25  ;;  %v93_v38 = vor.u32 1.1754944e-38, %v92_v34  ;;  %v107_v43 = vand.u32 2147483648, %v80_v25  ;;  %vm101_vm7 = vweird.f32 %v80_v25 }
  0x9b   :  { %vm91_vm5 = vcmp.eq.f32.partialorder %v90_v35, 8.507059e+37  ;;  %v105_v44 = vand.u32 2147483647, %v80_v25 }
  0x9c   :  { %v108_v46 = vor.u32 1.1754944e-38, %v107_v43 }
  0x9d   :  { %vm106_vm9 = vcmp.eq.f32.partialorder %v105_v44, 8.507059e+37 }
  0x9e   :  { %v574_v26 = vpop.eup %573 }
  0x9f   :  { %v82_v27 = vmul.f32 %v574_v26, %v79_v23  ;;  %vm87_vm2 = vweird.f32 %v574_v26 }
  0xa0   :  { %v576_v29 = vpop.eup %575  ;;  %vm88_vm4 = vmor %vm86_vm3, %vm87_vm2 }
  0xa1   :  { %v83_v28 = vsub.f32 1.0, %v82_v27  ;;  %v97_v31 = vmul.f32 %v576_v29, %v80_v25  ;;  %vm102_vm6 = vweird.f32 %v576_v29 }
  0xa2   :  { %vm103_vm8 = vmor %vm101_vm7, %vm102_vm6 }
  0xa3   :  { %v84_v30 = vmul.f32 %v574_v26, %v83_v28  ;;  %v98_v33 = vsub.f32 1.0, %v97_v31 }
  0xa5   :  { %v85_v32 = vadd.f32 %v574_v26, %v84_v30  ;;  %v99_v37 = vmul.f32 %v576_v29, %v98_v33 }
  0xa7   :  { %v89_v36 = vsel %vm88_vm4, %v574_v26, %v85_v32  ;;  %v100_v42 = vadd.f32 %v576_v29, %v99_v37 }
  0xa8   :  { %v94_v40 = vsel %vm91_vm5, %v93_v38, %v89_v36 }
  0xa9   :  { %v104_v45 = vsel %vm103_vm8, %v576_v29, %v100_v42  ;;  %v131_v57 = vsub.f32 1.0, %v94_v40 }
  0xaa   :  { %v109_v48 = vsel %vm106_vm9, %v108_v46, %v104_v45 }
  0xab   :  { %v132_v0 = vsub.f32 1.0, %v109_v48 }
  0xfd   :  { %v112_v39 = vpop.permute.xlu0 %111 }
  0xfe   :  { %v117_v41 = vmul.f32 %v112_v39, %v94_v40 }
 0x100   :  { %121 = vrot.lane.b32.xlu1 %v117_v41, %s617_s4 }
 0x105   :  { %v114_v47 = vpop.permute.xlu0 %113 }
 0x106   :  { %v118_v49 = vmul.f32 %v114_v47, %v109_v48 }
 0x108   :  { %123 = vrot.lane.b32.xlu1 %v118_v49, %s617_s4 }
 0x110   :  { %145 = vrot.lane.b32.xlu1 %v679_v9, %s618_s0 }
 0x172   :  { %v122_v50 = vpop.permute.xlu1 %121 }
 0x173   :  { %v127_v51 = vadd.f32 %v122_v50, %v696_v16 }
 0x175   :  { %577 = vtanh.f32 %v127_v51 }
 0x17a   :  { %v124_v52 = vpop.permute.xlu1 %123 }
 0x17b   :  { %v578_v53 = vpop.eup %577  ;;  %v128_v54 = vadd.f32 %v124_v52, %v702_v19 }
 0x17c   :  { %135 = vrot.lane.b32.xlu2 %v578_v53, %s619_s10 }
 0x17d   :  { %579 = vtanh.f32 %v128_v54 }
 0x182   :  { %v146_v63 = vpop.permute.xlu1 %145 }
 0x183   :  { %v580_v55 = vpop.eup %579  ;;  %v150_v2 = vmul.f32 %v146_v63, %v109_v48 }
 0x184   :  { %143 = vrot.lane.b32.xlu2 %v676_v8, %s618_s0  ;;  %137 = vrot.lane.b32.xlu0 %v580_v55, %s619_s10 }
 0x1d6   :  { %v136_v56 = vpop.permute.xlu2 %135 }
 0x1d7   :  { %v141_v59 = vmul.f32 %v136_v56, %v131_v57 }
 0x1de   :  { %v144_v58 = vpop.permute.xlu2 %143 }
 0x1df   :  { %v149_v60 = vmul.f32 %v144_v58, %v94_v40 }
 0x1e1   :  { %v715_v61 = vadd.f32 %v149_v60, %v141_v59 }
 0x1e3   :  { %v155_v62 = vrot.slane %v715_v61, 7 }
 0x1e5   :  { %157 = vrot.lane.b32.xlu2 %v155_v62, %s619_s10 }
 0x1f6   :  { %v138_v1 = vpop.permute.xlu0 %137 }
 0x1f7   :  { %v142_v5 = vmul.f32 %v138_v1, %v132_v0 }
 0x1f9   :  { %v719_v6 = vadd.f32 %v150_v2, %v142_v5 }
 0x1fb   :  { %v156_v7 = vrot.slane %v719_v6, 7 }
 0x1fd   :  { %159 = vrot.lane.b32.xlu0 %v156_v7, %s619_s10 }
 0x23f   :  { %v158_v8 = vpop.permute.xlu2 %157 }
 0x240   :  { %v163_v9 = vmul.f32 %v158_v8, %v662_v3 }
 0x242   :  { %v167_v11 = vrot.slane %v163_v9, 1 }
 0x26f   :  { %v160_v10 = vpop.permute.xlu0 %159 }
 0x270   :  { %v725_v13 = vmul.f32 %v160_v10, %v667_v4 }
 0x272   :  { %v168_v14 = vsel %vm42_vm0, %v725_v13, %v167_v11 }
 0x273   :  { %556 = vmatmul.msk.f32.vlgmr.msra.gmra.mxu1 %vm44_vm1, %v168_v14 }
 0x2f0   :  { %v188_v15 = vpop.f32.mrf.mxu1 }
 0x2f1   :  { %v189_v17 = vadd.f32 %v688_v12, %v188_v15 }
 0x2f3   :  { %237 = vrot.lane.b32.xlu2 %v189_v17, %s617_s4  ;;  %v192_v18 = vrot.slane %v189_v17, 7  ;;  %v196_v20 = vadd.f32 %v189_v17, %v702_v19 }
 0x2f5   :  { %235 = vrot.lane.b32.xlu1 %v192_v18, %s617_s4  ;;  %v558_v21 = vmul.f32 -1.442695, %v196_v20  ;;  %v195_v24 = vadd.f32 %v192_v18, %v696_v16 }
 0x2f7   :  { %581 = vpow2.f32 %v558_v21  ;;  %v557_v26 = vmul.f32 -1.442695, %v195_v24 }
 0x2fd   :  { %v582_v22 = vpop.eup %581 }
 0x2fe   :  { %v204_v23 = vadd.f32 1.0, %v582_v22 }
 0x300   :  { %583 = vrcp.f32 %v204_v23  ;;  %v231_v33 = vand.u32 2147483648, %v204_v23  ;;  %vm225_vm11 = vweird.f32 %v204_v23  ;;  %v229_v34 = vand.u32 2147483647, %v204_v23 }
 0x301   :  { %585 = vpow2.f32 %v557_v26 }
 0x302   :  { %v232_v36 = vor.u32 1.1754944e-38, %v231_v33  ;;  %vm230_vm13 = vcmp.eq.f32.partialorder %v229_v34, 8.507059e+37 }
 0x306   :  { %v584_v25 = vpop.eup %583 }
 0x307   :  { %v221_v27 = vmul.f32 %v584_v25, %v204_v23  ;;  %v586_v30 = vpop.eup %585  ;;  %vm226_vm10 = vweird.f32 %v584_v25 }
 0x308   :  { %v203_v32 = vadd.f32 1.0, %v586_v30  ;;  %vm227_vm12 = vmor %vm225_vm11, %vm226_vm10 }
 0x309   :  { %v222_v28 = vsub.f32 1.0, %v221_v27 }
 0x30a   :  { %587 = vrcp.f32 %v203_v32  ;;  %v216_v45 = vand.u32 2147483648, %v203_v32  ;;  %vm210_vm15 = vweird.f32 %v203_v32  ;;  %v214_v46 = vand.u32 2147483647, %v203_v32 }
 0x30b   :  { %v223_v29 = vmul.f32 %v584_v25, %v222_v28 }
 0x30c   :  { %v217_v48 = vor.u32 1.1754944e-38, %v216_v45  ;;  %vm215_vm3 = vcmp.eq.f32.partialorder %v214_v46, 8.507059e+37 }
 0x30d   :  { %v224_v31 = vadd.f32 %v584_v25, %v223_v29 }
 0x30f   :  { %v228_v35 = vsel %vm227_vm12, %v584_v25, %v224_v31  ;;  %vm529_vm12 = vcmask 1040384  }
 0x310   :  { %v233_v38 = vsel %vm230_vm13, %v232_v36, %v228_v35  ;;  %v588_v40 = vpop.eup %587  ;;  %vm532_vm13 = vcmask 1041408  }
 0x311   :  { %v206_v41 = vmul.f32 %v588_v40, %v203_v32  ;;  %vm211_vm14 = vweird.f32 %v588_v40  ;;  %v256_v5 = vsub.f32 1.0, %v233_v38 }
 0x312   :  { %vm212_vm2 = vmor %vm210_vm15, %vm211_vm14 }
 0x313   :  { %v207_v42 = vsub.f32 1.0, %v206_v41 }
 0x315   :  { %v208_v43 = vmul.f32 %v588_v40, %v207_v42 }
 0x317   :  { %v209_v44 = vadd.f32 %v588_v40, %v208_v43 }
 0x319   :  { %v213_v47 = vsel %vm212_vm2, %v588_v40, %v209_v44 }
 0x31a   :  { %v218_v50 = vsel %vm215_vm3, %v217_v48, %v213_v47 }
 0x31b   :  { %v255_v59 = vsub.f32 1.0, %v218_v50 }
 0x34d   :  { %v238_v37 = vpop.permute.xlu2 %237 }
 0x34e   :  { %v242_v39 = vmul.f32 %v238_v37, %v233_v38 }
 0x350   :  { %247 = vrot.lane.b32.xlu1 %v242_v39, %s617_s4 }
 0x358   :  { %267 = vrot.lane.b32.xlu1 %v163_v9, %s618_s0 }
 0x367   :  { %v236_v49 = vpop.permute.xlu1 %235 }
 0x368   :  { %v241_v51 = vmul.f32 %v236_v49, %v218_v50 }
 0x36a   :  { %245 = vrot.lane.b32.xlu0 %v241_v51, %s617_s4 }
 0x3c2   :  { %v248_v52 = vpop.permute.xlu1 %247 }
 0x3c3   :  { %v252_v53 = vadd.f32 %v248_v52, %v702_v19 }
 0x3c5   :  { %589 = vtanh.f32 %v252_v53 }
 0x3ca   :  { %v268_v58 = vpop.permute.xlu1 %267 }
 0x3cb   :  { %v590_v54 = vpop.eup %589  ;;  %v273_v62 = vmul.f32 %v268_v58, %v218_v50 }
 0x3cc   :  { %261 = vrot.lane.b32.xlu0 %v590_v54, %s619_s10 }
 0x3dc   :  { %v246_v55 = vpop.permute.xlu0 %245 }
 0x3dd   :  { %v251_v56 = vadd.f32 %v246_v55, %v696_v16 }
 0x3df   :  { %591 = vtanh.f32 %v251_v56 }
 0x3e5   :  { %v592_v57 = vpop.eup %591 }
 0x3e6   :  { %259 = vrot.lane.b32.xlu2 %v592_v57, %s619_s10 }
 0x3ee   :  { %269 = vrot.lane.b32.xlu2 %v725_v13, %s618_s0 }
 0x43e   :  { %v262_v2 = vpop.permute.xlu0 %261 }
 0x43f   :  { %v266_v8 = vmul.f32 %v262_v2, %v256_v5 }
 0x440   :  { %v260_v60 = vpop.permute.xlu2 %259 }
 0x441   :  { %v265_v63 = vmul.f32 %v260_v60, %v255_v59 }
 0x443   :  { %v744_v0 = vadd.f32 %v273_v62, %v265_v63 }
 0x445   :  { %v279_v1 = vrot.slane %v744_v0, 7 }
 0x447   :  { %281 = vrot.lane.b32.xlu0 %v279_v1, %s619_s10 }
 0x448   :  { %v270_v7 = vpop.permute.xlu2 %269 }
 0x449   :  { %v274_v9 = vmul.f32 %v270_v7, %v233_v38 }
 0x44b   :  { %v748_v10 = vadd.f32 %v274_v9, %v266_v8 }
 0x44d   :  { %v280_v11 = vrot.slane %v748_v10, 7 }
 0x44f   :  { %283 = vrot.lane.b32.xlu1 %v280_v11, %s619_s10 }
 0x4b9   :  { %v282_v13 = vpop.permute.xlu0 %281 }
 0x4ba   :  { %v287_v14 = vmul.f32 %v282_v13, %v662_v3  ;;  %v530_v13 = vsel %vm529_vm12, %v715_v61, %v744_v0 }
 0x4bc   :  { %v291_v18 = vrot.slane %v287_v14, 2 }
 0x4c1   :  { %v284_v15 = vpop.permute.xlu1 %283 }
 0x4c2   :  { %v754_v17 = vmul.f32 %v284_v15, %v667_v4 }
 0x4c4   :  { %v292_v20 = vrot.slane %v754_v17, 1 }
 0x4c6   :  { %v293_v21 = vsel %vm42_vm0, %v292_v20, %v291_v18 }
 0x4c7   :  { %559 = vmatmul.msk.f32.vlgmr.msra.gmra.mxu2 %vm44_vm1, %v293_v21 }
 0x54a   :  { %v313_v22 = vpop.f32.mrf.mxu2 }
 0x54b   :  { %v314_v23 = vadd.f32 %v688_v12, %v313_v22 }
 0x54d   :  { %v317_v24 = vrot.slane %v314_v23, 6  ;;  %v318_v25 = vrot.slane %v314_v23, 7 }
 0x54f   :  { %363 = vrot.lane.b32.xlu0 %v318_v25, %s617_s4  ;;  %361 = vrot.lane.b32.xlu2 %v317_v24, %s617_s4  ;;  %v321_v26 = vadd.f32 %v317_v24, %v696_v16  ;;  %v322_v30 = vadd.f32 %v318_v25, %v702_v19  ;;  %v531_v24 = vsel %vm529_vm12, %v719_v6, %v748_v10 }
 0x551   :  { %v560_v27 = vmul.f32 -1.442695, %v321_v26  ;;  %v561_v32 = vmul.f32 -1.442695, %v322_v30 }
 0x553   :  { %593 = vpow2.f32 %v560_v27 }
 0x559   :  { %v594_v28 = vpop.eup %593 }
 0x55a   :  { %v329_v29 = vadd.f32 1.0, %v594_v28 }
 0x55c   :  { %595 = vrcp.f32 %v329_v29  ;;  %v342_v39 = vand.u32 2147483648, %v329_v29  ;;  %vm336_vm5 = vweird.f32 %v329_v29  ;;  %v340_v40 = vand.u32 2147483647, %v329_v29 }
 0x55d   :  { %597 = vpow2.f32 %v561_v32 }
 0x55e   :  { %v343_v42 = vor.u32 1.1754944e-38, %v342_v39  ;;  %vm341_vm7 = vcmp.eq.f32.partialorder %v340_v40, 8.507059e+37 }
 0x562   :  { %v596_v31 = vpop.eup %595 }
 0x563   :  { %v332_v33 = vmul.f32 %v596_v31, %v329_v29  ;;  %v598_v35 = vpop.eup %597  ;;  %vm337_vm4 = vweird.f32 %v596_v31 }
 0x564   :  { %v330_v37 = vadd.f32 1.0, %v598_v35  ;;  %vm338_vm6 = vmor %vm336_vm5, %vm337_vm4 }
 0x565   :  { %v333_v34 = vsub.f32 1.0, %v332_v33 }
 0x566   :  { %599 = vrcp.f32 %v330_v37  ;;  %v357_v51 = vand.u32 2147483648, %v330_v37  ;;  %vm351_vm9 = vweird.f32 %v330_v37  ;;  %v355_v52 = vand.u32 2147483647, %v330_v37 }
 0x567   :  { %v334_v36 = vmul.f32 %v596_v31, %v333_v34 }
 0x568   :  { %v358_v54 = vor.u32 1.1754944e-38, %v357_v51  ;;  %vm356_vm11 = vcmp.eq.f32.partialorder %v355_v52, 8.507059e+37 }
 0x569   :  { %v335_v38 = vadd.f32 %v596_v31, %v334_v36 }
 0x56b   :  { %v339_v41 = vsel %vm338_vm6, %v596_v31, %v335_v38  ;;  %vm535_vm6 = vcmask 1042432  }
 0x56c   :  { %v344_v44 = vsel %vm341_vm7, %v343_v42, %v339_v41  ;;  %v600_v46 = vpop.eup %599  ;;  %vm546_vm7 = vcmask 257024  }
 0x56d   :  { %v347_v47 = vmul.f32 %v600_v46, %v330_v37  ;;  %vm352_vm8 = vweird.f32 %v600_v46  ;;  %v381_v5 = vsub.f32 1.0, %v344_v44 }
 0x56e   :  { %vm353_vm10 = vmor %vm351_vm9, %vm352_vm8 }
 0x56f   :  { %v348_v48 = vsub.f32 1.0, %v347_v47 }
 0x571   :  { %v349_v49 = vmul.f32 %v600_v46, %v348_v48 }
 0x573   :  { %v350_v50 = vadd.f32 %v600_v46, %v349_v49 }
 0x575   :  { %v354_v53 = vsel %vm353_vm10, %v600_v46, %v350_v50 }
 0x576   :  { %v359_v56 = vsel %vm356_vm11, %v358_v54, %v354_v53 }
 0x577   :  { %v382_v20 = vsub.f32 1.0, %v359_v56 }
 0x5a9   :  { %v362_v43 = vpop.permute.xlu2 %361 }
 0x5aa   :  { %v367_v45 = vmul.f32 %v362_v43, %v344_v44 }
 0x5ac   :  { %371 = vrot.lane.b32.xlu1 %v367_v45, %s617_s4 }
 0x5c1   :  { %v364_v55 = vpop.permute.xlu0 %363 }
 0x5c2   :  { %v368_v57 = vmul.f32 %v364_v55, %v359_v56 }
 0x5c4   :  { %373 = vrot.lane.b32.xlu2 %v368_v57, %s617_s4 }
 0x5cc   :  { %393 = vrot.lane.b32.xlu2 %v287_v14, %s618_s0 }
 0x61e   :  { %v374_v58 = vpop.permute.xlu2 %373  ;;  %v372_v59 = vpop.permute.xlu1 %371 }
 0x61f   :  { %v378_v60 = vadd.f32 %v374_v58, %v702_v19  ;;  %v377_v62 = vadd.f32 %v372_v59, %v696_v16 }
 0x621   :  { %601 = vtanh.f32 %v378_v60 }
 0x622   :  { %603 = vtanh.f32 %v377_v62 }
 0x626   :  { %v394_v2 = vpop.permute.xlu2 %393 }
 0x627   :  { %v602_v63 = vpop.eup %601  ;;  %v399_v8 = vmul.f32 %v394_v2, %v344_v44 }
 0x628   :  { %v604_v1 = vpop.eup %603  ;;  %387 = vrot.lane.b32.xlu1 %v602_v63, %s619_s10 }
 0x629   :  { %385 = vrot.lane.b32.xlu0 %v604_v1, %s619_s10 }
 0x631   :  { %395 = vrot.lane.b32.xlu0 %v754_v17, %s618_s0 }
 0x69a   :  { %v388_v18 = vpop.permute.xlu1 %387 }
 0x69b   :  { %v386_v7 = vpop.permute.xlu0 %385  ;;  %v392_v17 = vmul.f32 %v388_v18, %v382_v20 }
 0x69c   :  { %v391_v9 = vmul.f32 %v386_v7, %v381_v5 }
 0x69e   :  { %v401_v11 = vadd.f32 %v399_v8, %v391_v9 }
 0x6a0   :  { %v405_v14 = vrot.slane %v401_v11, 7  ;;  %v775_v15 = vsel %vm532_vm13, %v530_v13, %v401_v11 }
 0x6a2   :  { %407 = vrot.lane.b32.xlu1 %v405_v14, %s619_s10 }
 0x6a3   :  { %v396_v21 = vpop.permute.xlu0 %395 }
 0x6a4   :  { %v400_v22 = vmul.f32 %v396_v21, %v359_v56 }
 0x6a6   :  { %v402_v23 = vadd.f32 %v400_v22, %v392_v17 }
 0x6a8   :  { %v406_v25 = vrot.slane %v402_v23, 7  ;;  %v780_v26 = vsel %vm532_vm13, %v531_v24, %v402_v23 }
 0x6aa   :  { %409 = vrot.lane.b32.xlu2 %v406_v25, %s619_s10 }
 0x704   :  { %v410_v61 = vpop.permute.xlu2 %409 }
 0x705   :  { %v784_v0 = vmul.f32 %v410_v61, %v667_v4 }
 0x707   :  { %v418_v29 = vrot.slane %v784_v0, 2 }
 0x714   :  { %v408_v27 = vpop.permute.xlu1 %407 }
 0x715   :  { %v413_v28 = vmul.f32 %v408_v27, %v662_v3 }
 0x717   :  { %v417_v30 = vrot.slane %v413_v28, 3 }
 0x719   :  { %v419_v31 = vsel %vm42_vm0, %v418_v29, %v417_v30 }
 0x71a   :  { %562 = vmatmul.msk.f32.vlgmr.msra.gmra.mxu3 %vm44_vm1, %v419_v31 }
 0x79d   :  { %v439_v6 = vpop.f32.mrf.mxu3 }
 0x79e   :  { %v440_v10 = vadd.f32 %v688_v12, %v439_v6 }
 0x7a0   :  { %v443_v32 = vrot.slane %v440_v10, 5  ;;  %v444_v33 = vrot.slane %v440_v10, 6 }
 0x7a2   :  { %489 = vrot.lane.b32.xlu1 %v444_v33, %s617_s4  ;;  %487 = vrot.lane.b32.xlu0 %v443_v32, %s617_s4  ;;  %v447_v4 = vadd.f32 %v443_v32, %v696_v16  ;;  %v448_v3 = vadd.f32 %v444_v33, %v702_v19 }
 0x7a4   :  { %v563_v34 = vmul.f32 -1.442695, %v447_v4  ;;  %v564_v35 = vmul.f32 -1.442695, %v448_v3 }
 0x7a6   :  { %605 = vpow2.f32 %v563_v34 }
 0x7a7   :  { %607 = vpow2.f32 %v564_v35 }
 0x7ac   :  { %v606_v36 = vpop.eup %605 }
 0x7ad   :  { %v608_v37 = vpop.eup %607  ;;  %v455_v38 = vadd.f32 1.0, %v606_v36 }
 0x7ae   :  { %v456_v39 = vadd.f32 1.0, %v608_v37 }
 0x7af   :  { %609 = vrcp.f32 %v455_v38  ;;  %vm462_vm14 = vweird.f32 %v455_v38  ;;  %v468_v50 = vand.u32 2147483648, %v455_v38  ;;  %v466_v52 = vand.u32 2147483647, %v455_v38 }
 0x7b0   :  { %611 = vrcp.f32 %v456_v39  ;;  %v483_v49 = vand.u32 2147483648, %v456_v39  ;;  %vm477_vm15 = vweird.f32 %v456_v39  ;;  %v481_v51 = vand.u32 2147483647, %v456_v39 }
 0x7b1   :  { %v469_v56 = vor.u32 1.1754944e-38, %v468_v50  ;;  %vm467_vm5 = vcmp.eq.f32.partialorder %v466_v52, 8.507059e+37 }
 0x7b2   :  { %v484_v55 = vor.u32 1.1754944e-38, %v483_v49  ;;  %vm482_vm4 = vcmp.eq.f32.partialorder %v481_v51, 8.507059e+37 }
 0x7b5   :  { %v610_v12 = vpop.eup %609 }
 0x7b6   :  { %v612_v40 = vpop.eup %611  ;;  %v458_v42 = vmul.f32 %v610_v12, %v455_v38  ;;  %vm463_vm0 = vweird.f32 %v610_v12 }
 0x7b7   :  { %v473_v41 = vmul.f32 %v612_v40, %v456_v39  ;;  %vm478_vm1 = vweird.f32 %v612_v40  ;;  %vm464_vm2 = vmor %vm462_vm14, %vm463_vm0 }
 0x7b8   :  { %v459_v44 = vsub.f32 1.0, %v458_v42  ;;  %vm479_vm3 = vmor %vm477_vm15, %vm478_vm1 }
 0x7b9   :  { %v474_v43 = vsub.f32 1.0, %v473_v41 }
 0x7ba   :  { %v460_v46 = vmul.f32 %v610_v12, %v459_v44 }
 0x7bb   :  { %v475_v45 = vmul.f32 %v612_v40, %v474_v43 }
 0x7bc   :  { %v461_v48 = vadd.f32 %v610_v12, %v460_v46 }
 0x7bd   :  { %v476_v47 = vadd.f32 %v612_v40, %v475_v45 }
 0x7be   :  { %v465_v54 = vsel %vm464_vm2, %v610_v12, %v461_v48 }
 0x7bf   :  { %v480_v53 = vsel %vm479_vm3, %v612_v40, %v476_v47  ;;  %v470_v60 = vsel %vm467_vm5, %v469_v56, %v465_v54 }
 0x7c0   :  { %v485_v58 = vsel %vm482_vm4, %v484_v55, %v480_v53  ;;  %v507_v13 = vsub.f32 1.0, %v470_v60 }
 0x7c1   :  { %v508_v22 = vsub.f32 1.0, %v485_v58 }
 0x814   :  { %v490_v57 = vpop.permute.xlu1 %489  ;;  %v488_v59 = vpop.permute.xlu0 %487 }
 0x815   :  { %v494_v62 = vmul.f32 %v490_v57, %v485_v58  ;;  %v493_v63 = vmul.f32 %v488_v59, %v470_v60 }
 0x817   :  { %499 = vrot.lane.b32.xlu0 %v494_v62, %s617_s4  ;;  %497 = vrot.lane.b32.xlu2 %v493_v63, %s617_s4 }
 0x81f   :  { %519 = vrot.lane.b32.xlu0 %v413_v28, %s618_s0 }
 0x871   :  { %v498_v1 = vpop.permute.xlu2 %497 }
 0x872   :  { %v503_v2 = vadd.f32 %v498_v1, %v696_v16 }
 0x874   :  { %613 = vtanh.f32 %v503_v2 }
 0x87a   :  { %v614_v5 = vpop.eup %613 }
 0x87b   :  { %511 = vrot.lane.b32.xlu1 %v614_v5, %s619_s10 }
 0x883   :  { %521 = vrot.lane.b32.xlu1 %v784_v0, %s618_s0 }
 0x889   :  { %v500_v7 = vpop.permute.xlu0 %499 }
 0x88a   :  { %v504_v8 = vadd.f32 %v500_v7, %v702_v19 }
 0x88c   :  { %615 = vtanh.f32 %v504_v8 }
 0x891   :  { %v520_v11 = vpop.permute.xlu0 %519 }
 0x892   :  { %v616_v9 = vpop.eup %615  ;;  %v525_v18 = vmul.f32 %v520_v11, %v470_v60 }
 0x893   :  { %513 = vrot.lane.b32.xlu2 %v616_v9, %s619_s10 }
 0x8ed   :  { %v512_v14 = vpop.permute.xlu1 %511  ;;  %v514_v17 = vpop.permute.xlu2 %513 }
 0x8ee   :  { %v517_v20 = vmul.f32 %v512_v14, %v507_v13  ;;  %v518_v24 = vmul.f32 %v514_v17, %v508_v22 }
 0x8f0   :  { %v527_v16 = vadd.f32 %v525_v18, %v517_v20 }
 0x8f2   :  { %v536_v21 = vsel %vm535_vm6, %v775_v15, %v527_v16 }
 0x8f3   :  { %540 = vrot.lane.b32.xlu2 %v536_v21, %s619_s10 }
 0x8f5   :  { %v522_v23 = vpop.permute.xlu1 %521 }
 0x8f6   :  { %v526_v19 = vmul.f32 %v522_v23, %v485_v58 }
 0x8f8   :  { %v528_v25 = vadd.f32 %v526_v19, %v518_v24 }
 0x8fa   :  { %v537_v61 = vsel %vm535_vm6, %v780_v26, %v528_v25 }
 0x8fb   :  { %542 = vrot.lane.b32.xlu0 %v537_v61, %s619_s10 }
 0x94d   :  { %v541_v0 = vpop.permute.xlu2 %540 }
 0x94e   :  { %547 = vst.msk [vmem:[%s819_s5] sm:$0xf] %vm546_vm7, %v541_v0 }
 0x96d   :  { %v543_v27 = vpop.permute.xlu0 %542 }
 0x96e   :  { %548 = vst.msk [vmem:[%s819_s5 + $0x4] sm:$0xf] %vm546_vm7, %v543_v27 }

// kernel: forward.14
= control target key start
LH: loop header
LB: loop body
LE: loop exit
PB: predicated region body
PF: predicated region fallthrough
CT: control target
= control target key end

     0   :  { %s555_s15 = smov 0   ;;  %s608_s0 = inlined_call_operand.vmem [shape: f32[2,8,32], index: 0, kind: input, shape index: {}]   ;;  %s609_s1 = inlined_call_operand.vmem [shape: f32[32,96], index: 1, kind: input, shape index: {}]   ;;  %s610_s2 = inlined_call_operand.vmem [shape: f32[1,96], index: 2, kind: input, shape index: {}]   ;;  %s611_s3 = inlined_call_operand.vmem [shape: f32[2,8,8], index: 3, kind: input, shape index: {}]   ;;  %s612_s4 = inlined_call_operand.vmem [shape: f32[2,8,32], index: 4, kind: output, shape index: {}]  }
   0x1 LB: > { %s476_s16 = sadd.s32 4294967295, %s522_s15   ;;  %p480_p0 = scmp.ge.s32.totalorder %s522_s15, 1  ;;  %s522_s15 = sphi %s555_s15, %s14_s15  }
   0x2   : > { %p170_p1 = scmp.lt.s32.totalorder %s522_s15, 3 }
   0x4   : > { %p171_p2 = pnand %p480_p0, %p170_p1 }
   0x5   : > { %p198_p3 = scmp.lt.s32.totalorder (!%p171_p2), %s476_s16, 1  ;;  %s524_s5 = smov (!%p171_p2), 112  }
   0x6   : > { %174 = sbr.rel (%p171_p2) target bundleno = 898 (0x382), region = 36  ;;  %s525_s6 = smov (!%p171_p2), 96  }
   0x7   : > { %s526_s7 = smov (!%p171_p2), 80   ;;  %s527_s11 = smov (!%p171_p2), 64  }
   0x8   : > { %s528_s12 = smov (!%p171_p2), 48   ;;  %s529_s13 = smov (!%p171_p2), 16  }
   0xb   : > { %v214_v0 = vld [vmem:[%s609_s1 + $0x18] sm:$0xff]  ;;  %v213_v1 = vld [vmem:[%s609_s1 + $0x10] sm:$0xff]  ;;  %v212_v2 = vld [vmem:[%s609_s1 + $0x8] sm:$0xff]  ;;  %s614_s16 = smov (!%p198_p3, %s476_s16), 1  ;;  %vm219_vm0 = vcmask 261120   ;;  %vm247_vm1 = vcmask 130048  }
   0xc   : > { %235 = vmatpush.msra.mxu0 %v214_v0  ;;  %v211_v3 = vld [vmem:[%s609_s1] sm:$0xff]  ;;  %s575_s25 = sshll.u32 %s614_s16, 3  ;;  %vm274_vm2 = vcmask 64512  }
   0xd   : > { %s201_s28 = scalar_lea.vmem %s608_s0, %s575_s25  ;;  %v507_v5 = vld [vmem:[%s610_s2] ss:$0 sm:$0xff]  ;;  %s205_s10 = scalar_lea.vmem %s611_s3, %s575_s25 }
   0xe   : > { %236 = vmatpush.msra.mxu0 %v213_v1  ;;  %v210_v4 = vld [vmem:[%s201_s28] sm:$0xff]  ;;  %s209_s17 = scalar_lea.vmem %s612_s4, %s575_s25 }
   0xf   : > { %v243_v11 = vld [vmem:[%s205_s10] sm:$0xff] }
  0x10   : > { %237 = vmatpush.msra.mxu0 %v212_v2 }
  0x12   : > { %238 = vmatpush.msra.mxu0 %v211_v3 }
  0x13   : > { %484 = vmatmul.msk.f32.vlgmr.msra.gmra.mxu0 %vm219_vm0, %v210_v4 }
  0x90   : > { %v240_v6 = vpop.f32.mrf.mxu0 }
  0x91   : > { %v241_v7 = vadd.f32 %v507_v5, %v240_v6 }
  0x93   : > { %325 = vrot.lane.b32.xlu1 %v241_v7, %s524_s5  ;;  %245 = vrot.lane.b32.xlu0 %v241_v7, %s525_s6 }
  0x9b   : > { %327 = vrot.lane.b32.xlu0 %v241_v7, %s526_s7 }
 0x105   : > { %v246_v8 = vpop.permute.xlu0 %245  ;;  %v326_v10 = vpop.permute.xlu1 %325 }
 0x106   : > { %485 = vmatpush.xpose.msk.msra.mxu1 %vm247_vm1, %v246_v8 }
 0x109   : > { %486 = vmatmul.msk.f32.vlgmr.msra.gmra.mxu1 %vm247_vm1, %v241_v7 }
 0x10d   : > { %v328_v9 = vpop.permute.xlu0 %327 }
 0x10e   : > { %488 = vmatpush.xpose.msk.msra.mxu3 %vm247_vm1, %v328_v9 }
 0x111   : > { %489 = vmatmul.msk.f32.vlgmr.msra.gmra.mxu3 %vm247_vm1, %v326_v10 }
 0x186   : > { %v269_v12 = vpop.f32.mrf.mxu1 }
 0x187   : > { %v272_v13 = vmul.f32 0.25, %v269_v12 }
 0x189   : > { %v273_v14 = vadd.f32 %v272_v13, %v243_v11 }
 0x18b   : > { %v275_v15 = vsel %vm274_vm2, %v273_v14, -inf }
 0x18c   : > { %276 = vmax.xlane.f32.xlu1 %v275_v15 }
 0x194   : > { %v350_v16 = vpop.f32.mrf.mxu3 }
 0x195   : > { %v353_v17 = vmul.f32 0.25, %v350_v16 }
 0x197   : > { %v354_v18 = vadd.f32 %v353_v17, %v243_v11 }
 0x199   : > { %v355_v19 = vsel %vm274_vm2, %v354_v18, -inf }
 0x19a   : > { %356 = vmax.xlane.f32.xlu2 %v355_v19 }
 0x1ff   : > { %v277_v20 = vpop.xlane.xlu1 %276 }
 0x200   : > { %v278_v21 = vsub.f32 %v273_v14, %v277_v20 }
 0x202   : > { %v279_v22 = vmul.f32 1.442695, %v278_v21 }
 0x204   : > { %508 = vpow2.f32 %v279_v22 }
 0x20a   : > { %v509_v23 = vpop.eup %508 }
 0x20b   : > { %v281_v24 = vsel %vm274_vm2, %v509_v23, 0.0 }
 0x20c   : > { %282 = vadd.xlane.f32.xlu2 %v281_v24 }
 0x20d   : > { %v357_v25 = vpop.xlane.xlu2 %356 }
 0x20e   : > { %v358_v26 = vsub.f32 %v354_v18, %v357_v25 }
 0x210   : > { %v359_v27 = vmul.f32 1.442695, %v358_v26 }
 0x212   : > { %510 = vpow2.f32 %v359_v27 }
 0x218   : > { %v511_v28 = vpop.eup %510 }
 0x219   : > { %v361_v29 = vsel %vm274_vm2, %v511_v28, 0.0 }
 0x21a   : > { %362 = vadd.xlane.f32.xlu0 %v361_v29 }
 0x224   : > { %299 = vrot.lane.b32.xlu2 %v241_v7, %s527_s11 }
 0x22c   : > { %379 = vrot.lane.b32.xlu2 %v241_v7, %s528_s12 }
 0x27f   : > { %v283_v30 = vpop.xlane.xlu2 %282 }
 0x280   : > { %512 = vrcp.f32 %v283_v30  ;;  %v295_v35 = vand.u32 2147483648, %v283_v30  ;;  %v293_v37 = vand.u32 2147483647, %v283_v30  ;;  %vm289_vm4 = vweird.f32 %v283_v30 }
 0x282   : > { %v296_v40 = vor.u32 1.1754944e-38, %v295_v35  ;;  %vm294_vm6 = vcmp.eq.f32.partialorder %v293_v37, 8.507059e+37 }
 0x286   : > { %v513_v31 = vpop.eup %512 }
 0x287   : > { %v285_v32 = vmul.f32 %v513_v31, %v283_v30  ;;  %v300_v33 = vpop.permute.xlu2 %299  ;;  %vm290_vm3 = vweird.f32 %v513_v31 }
 0x288   : > { %320 = vmatpush.msra.mxu2 %v300_v33  ;;  %vm291_vm5 = vmor %vm289_vm4, %vm290_vm3 }
 0x289   : > { %v286_v34 = vsub.f32 1.0, %v285_v32 }
 0x28b   : > { %v287_v36 = vmul.f32 %v513_v31, %v286_v34 }
 0x28d   : > { %v363_v38 = vpop.xlane.xlu0 %362  ;;  %v288_v39 = vadd.f32 %v513_v31, %v287_v36 }
 0x28e   : > { %514 = vrcp.f32 %v363_v38  ;;  %v375_v48 = vand.u32 2147483648, %v363_v38  ;;  %v373_v50 = vand.u32 2147483647, %v363_v38  ;;  %vm369_vm8 = vweird.f32 %v363_v38 }
 0x28f   : > { %v380_v41 = vpop.permute.xlu2 %379  ;;  %v292_v42 = vsel %vm291_vm5, %v513_v31, %v288_v39 }
 0x290   : > { %400 = vmatpush.msrb.mxu2 %v380_v41  ;;  %v297_v43 = vsel %vm294_vm6, %v296_v40, %v292_v42  ;;  %v376_v52 = vor.u32 1.1754944e-38, %v375_v48  ;;  %vm374_vm10 = vcmp.eq.f32.partialorder %v373_v50, 8.507059e+37 }
 0x291   : > { %v298_v44 = vmul.f32 %v509_v23, %v297_v43 }
 0x293   : > { %487 = vmatmul.msk.f32.vlgmr.msra.gmra.mxu2 %vm274_vm2, %v298_v44 }
 0x294   : > { %v515_v45 = vpop.eup %514 }
 0x295   : > { %v365_v46 = vmul.f32 %v515_v45, %v363_v38  ;;  %vm370_vm7 = vweird.f32 %v515_v45 }
 0x296   : > { %vm371_vm9 = vmor %vm369_vm8, %vm370_vm7 }
 0x297   : > { %v366_v47 = vsub.f32 1.0, %v365_v46 }
 0x299   : > { %v367_v49 = vmul.f32 %v515_v45, %v366_v47 }
 0x29b   : > { %v368_v51 = vadd.f32 %v515_v45, %v367_v49 }
 0x29d   : > { %v372_v53 = vsel %vm371_vm9, %v515_v45, %v368_v51 }
 0x29e   : > { %v377_v54 = vsel %vm374_vm10, %v376_v52, %v372_v53 }
 0x29f   : > { %v378_v55 = vmul.f32 %v511_v28, %v377_v54 }
 0x2a1   : > { %490 = vmatmul.msk.f32.vlgmr.msrb.gmra.mxu2 %vm274_vm2, %v378_v55 }
 0x316   : > { %v322_v56 = vpop.f32.mrf.mxu2 }
 0x324   : > { %v402_v57 = vpop.f32.mrf.mxu2 }
 0x325   : > { %406 = vrot.lane.b32.xlu2 %v402_v57, %s529_s13 }
 0x37f   : > { %v407_v58 = vpop.permute.xlu2 %406 }
 0x380   : > { %v409_v59 = vsel %vm247_vm1, %v322_v56, %v407_v58 }
 0x381   : > { %410 = vst.msk [vmem:[%s209_s17] sm:$0xff] %vm219_vm0, %v409_v59 }
 0x382 PF: > { %s14_s15 = sadd.s32 1, %s522_s15  }
 0x383   : > { %p11_p4 = scmp.ge.s32.totalorder %s14_s15, 4  }
 0x385   :  { %13 = sbr.rel (!%p11_p4) target bundleno = 1 (0x1), region = 69 }

// kernel: forward.15
= control target key start
LH: loop header
LB: loop body
LE: loop exit
PB: predicated region body
PF: predicated region fallthrough
CT: control target
= control target key end

     0   :  { %vm36_vm0 = vcmask 261120   ;;  %v172_v17 = vmov 32.0   ;;  %v173_v21 = vmov 0   ;;  %s267_s2 = inlined_call_operand.vmem [shape: f32[32,32], index: 2, kind: input, shape index: {}]   ;;  %s268_s3 = inlined_call_operand.vmem [shape: f32[1,32], index: 3, kind: input, shape index: {}]   ;;  %s269_s0 = inlined_call_operand.vmem [shape: f32[16,32], index: 0, kind: input, shape index: {}]   ;;  %s270_s1 = inlined_call_operand.vmem [shape: f32[16,32], index: 1, kind: input, shape index: {}]   ;;  %s271_s6 = inlined_call_operand.vmem [shape: f32[16,1], index: 6, kind: input, shape index: {}]   ;;  %s272_s4 = inlined_call_operand.vmem [shape: f32[1,32], index: 4, kind: input, shape index: {}]   ;;  %s273_s5 = inlined_call_operand.vmem [shape: f32[1,32], index: 5, kind: input, shape index: {}]   ;;  %s274_s7 = inlined_call_operand.vmem [shape: f32[16,32], index: 7, kind: output, shape index: {}]  }
   0x1   :  { %v31_v0 = vld [vmem:[%s267_s2 + $0x18] sm:$0xff]  ;;  %v30_v1 = vld [vmem:[%s267_s2 + $0x10] sm:$0xff]  ;;  %v29_v2 = vld [vmem:[%s267_s2 + $0x8] sm:$0xff]  ;;  %166 = vrcp.f32 %v172_v17  ;;  %161 = vset.pattern.permute.xlu2 %v173_v21  ;;  %162 = vset.pattern.permute.xlu0 %v173_v21 }
   0x2   :  { %55 = vmatpush.msra.mxu0 %v31_v0  ;;  %155 = vmatpush.msra.mxu1 %v31_v0  ;;  %v28_v3 = vld [vmem:[%s267_s2] sm:$0xff]  ;;  %v27_v5 = vld [vmem:[%s269_s0 + $0x8] sm:$0xff] }
   0x3   :  { %v26_v4 = vld [vmem:[%s269_s0] sm:$0xff]  ;;  %v67_v13 = vld [vmem:[%s270_s1 + $0x8] sm:$0xff] }
   0x4   :  { %56 = vmatpush.msra.mxu0 %v30_v1  ;;  %156 = vmatpush.msra.mxu1 %v30_v1  ;;  %v163_v6 = vld [vmem:[%s268_s3] ss:$0 sm:$0xff]  ;;  %v134_v24 = vld [vmem:[%s271_s6 + $0x8] sm:$0xff] }
   0x5   :  { %v66_v8 = vld [vmem:[%s270_s1] sm:$0xff] }
   0x6   :  { %57 = vmatpush.msra.mxu0 %v29_v2  ;;  %157 = vmatpush.msra.mxu1 %v29_v2  ;;  %v133_v20 = vld [vmem:[%s271_s6] sm:$0xff] }
   0x7   :  { %v167_v18 = vpop.eup %166  ;;  %137 = vperm.xlu2 %161, %v133_v20   ;;  %v164_v51 = vld [vmem:[%s272_s4] ss:$0 sm:$0xff] }
   0x8   :  { %58 = vmatpush.msra.mxu0 %v28_v3  ;;  %158 = vmatpush.msra.mxu1 %v28_v3  ;;  %v77_v19 = vmul.f32 32.0, %v167_v18  ;;  %vm81_vm1 = vweird.f32 %v167_v18  ;;  %v165_v55 = vld [vmem:[%s273_s5] ss:$0 sm:$0xff] }
   0x9   :  { %153 = vmatmul.msk.f32.vlgmr.msra.gmra.mxu0 %vm36_vm0, %v26_v4  ;;  %154 = vmatmul.msk.f32.vlgmr.msra.gmra.mxu1 %vm36_vm0, %v27_v5 }
   0xa   :  { %v78_v22 = vsub.f32 1.0, %v77_v19 }
   0xc   :  { %v79_v23 = vmul.f32 %v167_v18, %v78_v22 }
   0xe   :  { %v80_v25 = vadd.f32 %v167_v18, %v79_v23 }
   0xf   :  { %142 = vperm.xlu2 %161, %v134_v24  }
  0x10   :  { %v82_v26 = vsel %vm81_vm1, %v167_v18, %v80_v25 }
  0x61   :  { %v138_v59 = vpop.permute.xlu2 %137 }
  0x69   :  { %v143_v3 = vpop.permute.xlu2 %142 }
  0x86   :  { %v60_v7 = vpop.f32.mrf.mxu0  ;;  %v63_v9 = vpop.f32.mrf.mxu1 }
  0x87   :  { %v61_v10 = vadd.f32 %v163_v6, %v60_v7  ;;  %v64_v12 = vadd.f32 %v163_v6, %v63_v9 }
  0x89   :  { %v68_v11 = vadd.f32 %v66_v8, %v61_v10  ;;  %v69_v15 = vadd.f32 %v67_v13, %v64_v12 }
  0x8b   :  { %v70_v14 = vsel %vm36_vm0, %v68_v11, 0.0  ;;  %v73_v16 = vsel %vm36_vm0, %v69_v15, 0.0 }
  0x8c   :  { %71 = vadd.xlane.f32.xlu0 %v70_v14 }
  0x94   :  { %74 = vadd.xlane.f32.xlu0 %v73_v16 }
  0xff   :  { %v72_v27 = vpop.xlane.xlu0 %71 }
 0x100   :  { %v83_v28 = vmul.f32 %v82_v26, %v72_v27 }
 0x102   :  { %v85_v29 = vsub.f32 %v68_v11, %v83_v28 }
 0x104   :  { %v87_v30 = vmul.f32 %v85_v29, %v85_v29 }
 0x106   :  { %v89_v31 = vsel %vm36_vm0, %v87_v30, 0.0 }
 0x107   :  { %90 = vadd.xlane.f32.xlu1 %v89_v31  ;;  %v75_v32 = vpop.xlane.xlu0 %74 }
 0x108   :  { %v84_v33 = vmul.f32 %v82_v26, %v75_v32 }
 0x10a   :  { %v86_v34 = vsub.f32 %v69_v15, %v84_v33 }
 0x10c   :  { %v88_v35 = vmul.f32 %v86_v34, %v86_v34 }
 0x10e   :  { %v92_v36 = vsel %vm36_vm0, %v88_v35, 0.0 }
 0x10f   :  { %93 = vadd.xlane.f32.xlu1 %v92_v36 }
 0x17a   :  { %v91_v37 = vpop.xlane.xlu1 %90 }
 0x17b   :  { %v95_v38 = vmul.f32 %v91_v37, %v82_v26 }
 0x17d   :  { %v97_v39 = vadd.f32 1e-05, %v95_v38 }
 0x17f   :  { %168 = vrsqrt.f32 %v97_v39  ;;  %vm105_vm3 = vweird.f32 %v97_v39 }
 0x182   :  { %v94_v40 = vpop.xlane.xlu1 %93 }
 0x183   :  { %v96_v41 = vmul.f32 %v94_v40, %v82_v26 }
 0x185   :  { %v169_v42 = vpop.eup %168  ;;  %v98_v43 = vadd.f32 1e-05, %v96_v41 }
 0x186   :  { %v100_v44 = vmul.f32 %v169_v42, %v97_v39  ;;  %vm106_vm2 = vweird.f32 %v169_v42 }
 0x187   :  { %170 = vrsqrt.f32 %v98_v43  ;;  %vm107_vm4 = vmor %vm105_vm3, %vm106_vm2  ;;  %vm115_vm6 = vweird.f32 %v98_v43 }
 0x188   :  { %v101_v45 = vmul.f32 %v169_v42, %v100_v44 }
 0x18a   :  { %v102_v46 = vmul.f32 0.5, %v101_v45 }
 0x18c   :  { %v103_v47 = vsub.f32 1.5, %v102_v46 }
 0x18d   :  { %v171_v48 = vpop.eup %170 }
 0x18e   :  { %v104_v49 = vmul.f32 %v169_v42, %v103_v47  ;;  %v110_v50 = vmul.f32 %v171_v48, %v98_v43  ;;  %vm116_vm5 = vweird.f32 %v171_v48 }
 0x18f   :  { %vm117_vm7 = vmor %vm115_vm6, %vm116_vm5 }
 0x190   :  { %v111_v52 = vmul.f32 %v171_v48, %v110_v50  ;;  %v108_v53 = vsel %vm107_vm4, %v169_v42, %v104_v49 }
 0x191   :  { %v119_v54 = vmul.f32 %v108_v53, %v85_v29 }
 0x192   :  { %v112_v56 = vmul.f32 0.5, %v111_v52 }
 0x193   :  { %v125_v57 = vmul.f32 %v164_v51, %v119_v54 }
 0x194   :  { %v113_v58 = vsub.f32 1.5, %v112_v56 }
 0x195   :  { %v131_v60 = vadd.f32 %v165_v55, %v125_v57 }
 0x196   :  { %v114_v61 = vmul.f32 %v171_v48, %v113_v58 }
 0x197   :  { %v145_v62 = vmul.f32 %v138_v59, %v131_v60 }
 0x198   :  { %v118_v63 = vsel %vm117_vm7, %v171_v48, %v114_v61 }
 0x199   :  { %147 = vst.msk [vmem:[%s274_s7] sm:$0xff] %vm36_vm0, %v145_v62  ;;  %v120_v0 = vmul.f32 %v118_v63, %v86_v34 }
 0x19b   :  { %v126_v1 = vmul.f32 %v164_v51, %v120_v0 }
 0x19d   :  { %v132_v2 = vadd.f32 %v165_v55, %v126_v1 }
 0x19f   :  { %v146_v4 = vmul.f32 %v143_v3, %v132_v2 }
 0x1a1   :  { %148 = vst.msk [vmem:[%s274_s7 + $0x8] sm:$0xff] %vm36_vm0, %v146_v4 }

// kernel: forward.17
= control target key start
LH: loop header
LB: loop body
LE: loop exit
PB: predicated region body
PF: predicated region fallthrough
CT: control target
= control target key end

     0   :  { %vm32_vm0 = vcmask 261120   ;;  %vm83_vm1 = vcmask 254976   ;;  %v224_v21 = vmov 32.0   ;;  %s331_s1 = inlined_call_operand.vmem [shape: f32[32,32], index: 1, kind: input, shape index: {}]   ;;  %s332_s2 = inlined_call_operand.vmem [shape: f32[1,32], index: 2, kind: input, shape index: {}]   ;;  %s333_s0 = inlined_call_operand.vmem [shape: f32[26,32], index: 0, kind: input, shape index: {}]   ;;  %s334_s3 = inlined_call_operand.vmem [shape: f32[1,32], index: 3, kind: input, shape index: {}]   ;;  %s335_s4 = inlined_call_operand.vmem [shape: f32[1,32], index: 4, kind: input, shape index: {}]   ;;  %s336_s5 = inlined_call_operand.vmem [shape: f32[26,32], index: 5, kind: output, shape index: {}]  }
   0x1   :  { %v27_v0 = vld [vmem:[%s331_s1 + $0x18] sm:$0xff]  ;;  %v26_v1 = vld [vmem:[%s331_s1 + $0x10] sm:$0xff]  ;;  %v25_v2 = vld [vmem:[%s331_s1 + $0x8] sm:$0xff]  ;;  %214 = vrcp.f32 %v224_v21 }
   0x2   :  { %57 = vmatpush.msra.mxu0 %v27_v0  ;;  %199 = vmatpush.msra.mxu2 %v27_v0  ;;  %v24_v3 = vld [vmem:[%s331_s1] sm:$0xff]  ;;  %v22_v5 = vld [vmem:[%s333_s0 + $0x10] sm:$0xff]  ;;  %v21_v6 = vld [vmem:[%s333_s0 + $0x8] sm:$0xff] }
   0x3   :  { %198 = vmatpush.msra.mxu1 %v27_v0  ;;  %200 = vmatpush.msra.mxu3 %v27_v0  ;;  %v20_v4 = vld [vmem:[%s333_s0] sm:$0xff]  ;;  %v23_v7 = vld [vmem:[%s333_s0 + $0x18] sm:$0x3] }
   0x4   :  { %58 = vmatpush.msra.mxu0 %v26_v1  ;;  %202 = vmatpush.msra.mxu2 %v26_v1  ;;  %v211_v8 = vld [vmem:[%s332_s2] ss:$0 sm:$0xff] }
   0x5   :  { %201 = vmatpush.msra.mxu1 %v26_v1  ;;  %203 = vmatpush.msra.mxu3 %v26_v1 }
   0x6   :  { %59 = vmatpush.msra.mxu0 %v25_v2  ;;  %205 = vmatpush.msra.mxu2 %v25_v2 }
   0x7   :  { %204 = vmatpush.msra.mxu1 %v25_v2  ;;  %206 = vmatpush.msra.mxu3 %v25_v2  ;;  %v215_v22 = vpop.eup %214 }
   0x8   :  { %60 = vmatpush.msra.mxu0 %v24_v3  ;;  %208 = vmatpush.msra.mxu2 %v24_v3  ;;  %v88_v23 = vmul.f32 32.0, %v215_v22  ;;  %vm92_vm2 = vweird.f32 %v215_v22 }
   0x9   :  { %194 = vmatmul.msk.f32.vlgmr.msra.gmra.mxu0 %vm32_vm0, %v20_v4  ;;  %196 = vmatmul.msk.f32.vlgmr.msra.gmra.mxu2 %vm32_vm0, %v22_v5 }
   0xa   :  { %207 = vmatpush.msra.mxu1 %v24_v3  ;;  %209 = vmatpush.msra.mxu3 %v24_v3  ;;  %v89_v24 = vsub.f32 1.0, %v88_v23 }
   0xb   :  { %195 = vmatmul.msk.f32.vlgmr.msra.gmra.mxu1 %vm32_vm0, %v21_v6  ;;  %197 = vmatmul.msk.f32.vlgmr.msra.gmra.mxu3 %vm32_vm0, %v23_v7  ;;  %v212_v7 = vld [vmem:[%s334_s3] ss:$0 sm:$0xff] }
   0xc   :  { %v90_v25 = vmul.f32 %v215_v22, %v89_v24 }
   0xe   :  { %v91_v26 = vadd.f32 %v215_v22, %v90_v25 }
  0x10   :  { %v93_v27 = vsel %vm92_vm2, %v215_v22, %v91_v26 }
  0x86   :  { %v62_v9 = vpop.f32.mrf.mxu0 }
  0x87   :  { %v63_v10 = vadd.f32 %v211_v8, %v62_v9 }
  0x88   :  { %v65_v11 = vpop.f32.mrf.mxu1 }
  0x89   :  { %v74_v12 = vsel %vm32_vm0, %v63_v10, 0.0  ;;  %v66_v13 = vadd.f32 %v211_v8, %v65_v11  ;;  %v213_v11 = vld [vmem:[%s335_s4] ss:$0 sm:$0xff] }
  0x8a   :  { %75 = vadd.xlane.f32.xlu0 %v74_v12 }
  0x8b   :  { %v77_v18 = vsel %vm32_vm0, %v66_v13, 0.0 }
  0x8c   :  { %v68_v14 = vpop.f32.mrf.mxu2 }
  0x8d   :  { %v69_v15 = vadd.f32 %v211_v8, %v68_v14 }
  0x8e   :  { %v71_v16 = vpop.f32.mrf.mxu3 }
  0x8f   :  { %v80_v17 = vsel %vm32_vm0, %v69_v15, 0.0  ;;  %v72_v19 = vadd.f32 %v211_v8, %v71_v16 }
  0x90   :  { %81 = vadd.xlane.f32.xlu1 %v80_v17 }
  0x91   :  { %v84_v20 = vsel %vm83_vm1, %v72_v19, 0.0 }
  0x92   :  { %78 = vadd.xlane.f32.xlu0 %v77_v18 }
  0x98   :  { %85 = vadd.xlane.f32.xlu1 %v84_v20 }
  0xfd   :  { %v76_v28 = vpop.xlane.xlu0 %75 }
  0xfe   :  { %v94_v29 = vmul.f32 %v93_v27, %v76_v28 }
 0x100   :  { %v98_v30 = vsub.f32 %v63_v10, %v94_v29 }
 0x102   :  { %v102_v31 = vmul.f32 %v98_v30, %v98_v30 }
 0x103   :  { %v82_v32 = vpop.xlane.xlu1 %81 }
 0x104   :  { %v96_v33 = vmul.f32 %v93_v27, %v82_v32  ;;  %v106_v34 = vsel %vm32_vm0, %v102_v31, 0.0 }
 0x105   :  { %107 = vadd.xlane.f32.xlu2 %v106_v34  ;;  %v79_v35 = vpop.xlane.xlu0 %78 }
 0x106   :  { %v291_v36 = vsub.f32 %v69_v15, %v96_v33  ;;  %v95_v37 = vmul.f32 %v93_v27, %v79_v35 }
 0x108   :  { %v293_v38 = vsub.f32 %v66_v13, %v95_v37  ;;  %v104_v39 = vmul.f32 %v291_v36, %v291_v36 }
 0x10a   :  { %v112_v40 = vsel %vm32_vm0, %v104_v39, 0.0  ;;  %v103_v41 = vmul.f32 %v293_v38, %v293_v38 }
 0x10b   :  { %v86_v42 = vpop.xlane.xlu1 %85  ;;  %113 = vadd.xlane.f32.xlu0 %v112_v40 }
 0x10c   :  { %v97_v43 = vmul.f32 %v93_v27, %v86_v42  ;;  %v109_v44 = vsel %vm32_vm0, %v103_v41, 0.0 }
 0x10d   :  { %110 = vadd.xlane.f32.xlu2 %v109_v44 }
 0x10e   :  { %v301_v45 = vsub.f32 %v72_v19, %v97_v43 }
 0x110   :  { %v105_v46 = vmul.f32 %v301_v45, %v301_v45 }
 0x112   :  { %v115_v47 = vsel %vm83_vm1, %v105_v46, 0.0 }
 0x113   :  { %116 = vadd.xlane.f32.xlu1 %v115_v47 }
 0x178   :  { %v108_v48 = vpop.xlane.xlu2 %107 }
 0x179   :  { %v118_v49 = vmul.f32 %v108_v48, %v93_v27 }
 0x17b   :  { %v122_v50 = vadd.f32 1e-05, %v118_v49 }
 0x17d   :  { %216 = vrsqrt.f32 %v122_v50  ;;  %vm132_vm4 = vweird.f32 %v122_v50 }
 0x17e   :  { %v114_v51 = vpop.xlane.xlu0 %113 }
 0x17f   :  { %v120_v52 = vmul.f32 %v114_v51, %v93_v27 }
 0x180   :  { %v111_v53 = vpop.xlane.xlu2 %110 }
 0x181   :  { %v124_v54 = vadd.f32 1e-05, %v120_v52  ;;  %v119_v55 = vmul.f32 %v111_v53, %v93_v27 }
 0x183   :  { %v217_v56 = vpop.eup %216  ;;  %218 = vrsqrt.f32 %v124_v54  ;;  %v123_v57 = vadd.f32 1e-05, %v119_v55  ;;  %vm152_vm7 = vweird.f32 %v124_v54 }
 0x184   :  { %v127_v58 = vmul.f32 %v217_v56, %v122_v50  ;;  %vm133_vm3 = vweird.f32 %v217_v56 }
 0x185   :  { %220 = vrsqrt.f32 %v123_v57  ;;  %vm134_vm5 = vmor %vm132_vm4, %vm133_vm3  ;;  %vm142_vm10 = vweird.f32 %v123_v57 }
 0x186   :  { %v128_v59 = vmul.f32 %v217_v56, %v127_v58  ;;  %v117_v60 = vpop.xlane.xlu1 %116 }
 0x187   :  { %v121_v61 = vmul.f32 %v117_v60, %v93_v27 }
 0x188   :  { %v129_v62 = vmul.f32 0.5, %v128_v59 }
 0x189   :  { %v219_v63 = vpop.eup %218  ;;  %v125_v0 = vadd.f32 1e-05, %v121_v61 }
 0x18a   :  { %v130_v1 = vsub.f32 1.5, %v129_v62  ;;  %v147_v2 = vmul.f32 %v219_v63, %v124_v54  ;;  %vm153_vm6 = vweird.f32 %v219_v63 }
 0x18b   :  { %v221_v3 = vpop.eup %220  ;;  %222 = vrsqrt.f32 %v125_v0  ;;  %vm154_vm9 = vmor %vm152_vm7, %vm153_vm6  ;;  %vm162_vm13 = vweird.f32 %v125_v0 }
 0x18c   :  { %v131_v4 = vmul.f32 %v217_v56, %v130_v1  ;;  %v148_v5 = vmul.f32 %v219_v63, %v147_v2  ;;  %v137_v6 = vmul.f32 %v221_v3, %v123_v57  ;;  %vm143_vm8 = vweird.f32 %v221_v3 }
 0x18d   :  { %vm144_vm11 = vmor %vm142_vm10, %vm143_vm8 }
 0x18e   :  { %v135_v8 = vsel %vm134_vm5, %v217_v56, %v131_v4  ;;  %v149_v9 = vmul.f32 0.5, %v148_v5  ;;  %v138_v10 = vmul.f32 %v221_v3, %v137_v6 }
 0x18f   :  { %v166_v12 = vmul.f32 %v135_v8, %v98_v30 }
 0x190   :  { %v150_v13 = vsub.f32 1.5, %v149_v9  ;;  %v139_v14 = vmul.f32 0.5, %v138_v10 }
 0x191   :  { %v223_v15 = vpop.eup %222  ;;  %v174_v16 = vmul.f32 %v212_v7, %v166_v12 }
 0x192   :  { %v151_v17 = vmul.f32 %v219_v63, %v150_v13  ;;  %v140_v18 = vsub.f32 1.5, %v139_v14  ;;  %v157_v19 = vmul.f32 %v223_v15, %v125_v0  ;;  %vm163_vm12 = vweird.f32 %v223_v15 }
 0x193   :  { %v182_v20 = vadd.f32 %v213_v11, %v174_v16  ;;  %vm164_vm14 = vmor %vm162_vm13, %vm163_vm12 }
 0x194   :  { %v155_v21 = vsel %vm154_vm9, %v219_v63, %v151_v17  ;;  %v141_v22 = vmul.f32 %v221_v3, %v140_v18  ;;  %v158_v23 = vmul.f32 %v223_v15, %v157_v19 }
 0x195   :  { %186 = vst.msk [vmem:[%s336_s5] sm:$0xff] %vm32_vm0, %v182_v20  ;;  %v168_v24 = vmul.f32 %v155_v21, %v291_v36 }
 0x196   :  { %v145_v25 = vsel %vm144_vm11, %v221_v3, %v141_v22  ;;  %v159_v26 = vmul.f32 0.5, %v158_v23 }
 0x197   :  { %v176_v27 = vmul.f32 %v212_v7, %v168_v24  ;;  %v167_v28 = vmul.f32 %v145_v25, %v293_v38 }
 0x198   :  { %v160_v29 = vsub.f32 1.5, %v159_v26 }
 0x199   :  { %v184_v30 = vadd.f32 %v213_v11, %v176_v27  ;;  %v175_v31 = vmul.f32 %v212_v7, %v167_v28 }
 0x19a   :  { %v161_v32 = vmul.f32 %v223_v15, %v160_v29 }
 0x19b   :  { %188 = vst.msk [vmem:[%s336_s5 + $0x10] sm:$0xff] %vm32_vm0, %v184_v30  ;;  %v183_v33 = vadd.f32 %v213_v11, %v175_v31 }
 0x19c   :  { %v165_v34 = vsel %vm164_vm14, %v223_v15, %v161_v32 }
 0x19d   :  { %187 = vst.msk [vmem:[%s336_s5 + $0x8] sm:$0xff] %vm32_vm0, %v183_v33  ;;  %v169_v35 = vmul.f32 %v165_v34, %v301_v45 }
 0x19f   :  { %v177_v36 = vmul.f32 %v212_v7, %v169_v35 }
 0x1a1   :  { %v185_v37 = vadd.f32 %v213_v11, %v177_v36 }
 0x1a3   :  { %189 = vst.msk [vmem:[%s336_s5 + $0x18] sm:$0x3] %vm83_vm1, %v185_v37 }

// kernel: forward.16
= control target key start
LH: loop header
LB: loop body
LE: loop exit
PB: predicated region body
PF: predicated region fallthrough
CT: control target
= control target key end

     0   :  { %vm39_vm0 = vcmask 261120   ;;  %vm83_vm1 = vcmask 523264   ;;  %v228_v30 = vmov 32.0   ;;  %v229_v35 = vmov 0   ;;  %s349_s1 = inlined_call_operand.vmem [shape: f32[32,64], index: 1, kind: input, shape index: {}]   ;;  %s350_s3 = inlined_call_operand.vmem [shape: f32[64,32], index: 3, kind: input, shape index: {}]   ;;  %s351_s0 = inlined_call_operand.vmem [shape: f32[16,32], index: 0, kind: input, shape index: {}]   ;;  %s352_s2 = inlined_call_operand.vmem [shape: f32[1,64], index: 2, kind: input, shape index: {}]   ;;  %s353_s4 = inlined_call_operand.vmem [shape: f32[1,32], index: 4, kind: input, shape index: {}]   ;;  %s354_s7 = inlined_call_operand.vmem [shape: f32[16,1], index: 7, kind: input, shape index: {}]   ;;  %s355_s5 = inlined_call_operand.vmem [shape: f32[1,32], index: 5, kind: input, shape index: {}]   ;;  %s356_s6 = inlined_call_operand.vmem [shape: f32[1,32], index: 6, kind: input, shape index: {}]   ;;  %s357_s8 = inlined_call_operand.vmem [shape: f32[16,32], index: 8, kind: output, shape index: {}]  }
   0x1   :  { %v34_v0 = vld [vmem:[%s349_s1 + $0x18] sm:$0xff]  ;;  %v33_v1 = vld [vmem:[%s349_s1 + $0x10] sm:$0xff]  ;;  %v32_v2 = vld [vmem:[%s349_s1 + $0x8] sm:$0xff]  ;;  %222 = vrcp.f32 %v228_v30  ;;  %216 = vset.pattern.permute.xlu2 %v229_v35  ;;  %217 = vset.pattern.permute.xlu0 %v229_v35 }
   0x2   :  { %58 = vmatpush.msra.mxu0 %v34_v0  ;;  %202 = vmatpush.msra.mxu3 %v34_v0  ;;  %v78_v3 = vld [vmem:[%s350_s3 + $0x38] sm:$0xff]  ;;  %v77_v4 = vld [vmem:[%s350_s3 + $0x30] sm:$0xff]  ;;  %v31_v5 = vld [vmem:[%s349_s1] sm:$0xff] }
   0x3   :  { %98 = vmatpush.msra.mxu1 %v78_v3  ;;  %206 = vmatpush.msra.mxu2 %v78_v3  ;;  %v29_v6 = vld [vmem:[%s351_s0] sm:$0xff]  ;;  %v30_v7 = vld [vmem:[%s351_s0 + $0x8] sm:$0xff]  ;;  %v74_v10 = vld [vmem:[%s350_s3 + $0x18] sm:$0xff] }
   0x4   :  { %59 = vmatpush.msra.mxu0 %v33_v1  ;;  %203 = vmatpush.msra.mxu3 %v33_v1  ;;  %v76_v8 = vld [vmem:[%s350_s3 + $0x28] sm:$0xff]  ;;  %v75_v9 = vld [vmem:[%s350_s3 + $0x20] sm:$0xff]  ;;  %v73_v11 = vld [vmem:[%s350_s3 + $0x10] sm:$0xff] }
   0x5   :  { %99 = vmatpush.msra.mxu1 %v77_v4  ;;  %207 = vmatpush.msra.mxu2 %v77_v4  ;;  %v72_v12 = vld [vmem:[%s350_s3 + $0x8] sm:$0xff]  ;;  %v71_v13 = vld [vmem:[%s350_s3] sm:$0xff] }
   0x6   :  { %60 = vmatpush.msra.mxu0 %v32_v2  ;;  %204 = vmatpush.msra.mxu3 %v32_v2  ;;  %v218_v14 = vld [vmem:[%s352_s2] ss:$0 sm:$0xff]  ;;  %v179_v38 = vld [vmem:[%s354_s7 + $0x8] sm:$0xff] }
   0x7   :  { %100 = vmatpush.msra.mxu1 %v76_v8  ;;  %208 = vmatpush.msra.mxu2 %v76_v8  ;;  %v219_v21 = vld [vmem:[%s353_s4] ss:$0 sm:$0xff]  ;;  %v223_v31 = vpop.eup %222 }
   0x8   :  { %61 = vmatpush.msra.mxu0 %v31_v5  ;;  %205 = vmatpush.msra.mxu3 %v31_v5  ;;  %v122_v32 = vmul.f32 32.0, %v223_v31  ;;  %v178_v34 = vld [vmem:[%s354_s7] sm:$0xff]  ;;  %vm126_vm2 = vweird.f32 %v223_v31 }
   0x9   :  { %198 = vmatmul.msk.f32.vlgmr.msra.gmra.mxu0 %vm39_vm0, %v29_v6  ;;  %199 = vmatmul.msk.f32.vlgmr.msra.gmra.mxu3 %vm39_vm0, %v30_v7  ;;  %v220_v62 = vld [vmem:[%s355_s5] ss:$0 sm:$0xff] }
   0xa   :  { %101 = vmatpush.msra.mxu1 %v75_v9  ;;  %209 = vmatpush.msra.mxu2 %v75_v9  ;;  %v123_v33 = vsub.f32 1.0, %v122_v32  ;;  %v221_v2 = vld [vmem:[%s356_s6] ss:$0 sm:$0xff] }
   0xb   :  { %182 = vperm.xlu2 %216, %v178_v34  }
   0xc   :  { %102 = vmatpush.msra.mxu1 %v74_v10  ;;  %210 = vmatpush.msra.mxu2 %v74_v10  ;;  %v124_v36 = vmul.f32 %v223_v31, %v123_v33 }
   0xe   :  { %103 = vmatpush.msra.mxu1 %v73_v11  ;;  %211 = vmatpush.msra.mxu2 %v73_v11  ;;  %v125_v37 = vadd.f32 %v223_v31, %v124_v36 }
  0x10   :  { %104 = vmatpush.msra.mxu1 %v72_v12  ;;  %212 = vmatpush.msra.mxu2 %v72_v12  ;;  %v127_v39 = vsel %vm126_vm2, %v223_v31, %v125_v37 }
  0x12   :  { %105 = vmatpush.msra.mxu1 %v71_v13  ;;  %213 = vmatpush.msra.mxu2 %v71_v13 }
  0x13   :  { %187 = vperm.xlu2 %216, %v179_v38  }
  0x65   :  { %v183_v8 = vpop.permute.xlu2 %182 }
  0x86   :  { %v63_v15 = vpop.f32.mrf.mxu0 }
  0x87   :  { %v64_v16 = vadd.f32 %v218_v14, %v63_v15 }
  0x89   :  { %v69_v17 = vmax.f32 %v64_v16, 0.0  ;;  %v188_v16 = vpop.permute.xlu2 %187 }
  0x8b   :  { %200 = vmatmul.msk.f32.vlgmr.msra.gmra.mxu1 %vm83_vm1, %v69_v17 }
  0x8c   :  { %v66_v18 = vpop.f32.mrf.mxu3 }
  0x8d   :  { %v67_v19 = vadd.f32 %v218_v14, %v66_v18 }
  0x8f   :  { %v70_v20 = vmax.f32 %v67_v19, 0.0 }
  0x91   :  { %201 = vmatmul.msk.f32.vlgmr.msra.gmra.mxu2 %vm83_vm1, %v70_v20 }
 0x108   :  { %v107_v22 = vpop.f32.mrf.mxu1 }
 0x109   :  { %v108_v23 = vadd.f32 %v219_v21, %v107_v22 }
 0x10b   :  { %v113_v24 = vadd.f32 %v108_v23, %v29_v6 }
 0x10d   :  { %v115_v25 = vsel %vm39_vm0, %v113_v24, 0.0 }
 0x10e   :  { %116 = vadd.xlane.f32.xlu0 %v115_v25 }
 0x114   :  { %v110_v26 = vpop.f32.mrf.mxu2 }
 0x115   :  { %v111_v27 = vadd.f32 %v219_v21, %v110_v26 }
 0x117   :  { %v114_v28 = vadd.f32 %v111_v27, %v30_v7 }
 0x119   :  { %v118_v29 = vsel %vm39_vm0, %v114_v28, 0.0 }
 0x11a   :  { %119 = vadd.xlane.f32.xlu0 %v118_v29 }
 0x181   :  { %v117_v40 = vpop.xlane.xlu0 %116 }
 0x182   :  { %v128_v41 = vmul.f32 %v127_v39, %v117_v40 }
 0x184   :  { %v130_v42 = vsub.f32 %v113_v24, %v128_v41 }
 0x186   :  { %v132_v43 = vmul.f32 %v130_v42, %v130_v42 }
 0x188   :  { %v134_v44 = vsel %vm39_vm0, %v132_v43, 0.0 }
 0x189   :  { %135 = vadd.xlane.f32.xlu1 %v134_v44 }
 0x18d   :  { %v120_v45 = vpop.xlane.xlu0 %119 }
 0x18e   :  { %v129_v46 = vmul.f32 %v127_v39, %v120_v45 }
 0x190   :  { %v131_v47 = vsub.f32 %v114_v28, %v129_v46 }
 0x192   :  { %v133_v48 = vmul.f32 %v131_v47, %v131_v47 }
 0x194   :  { %v137_v49 = vsel %vm39_vm0, %v133_v48, 0.0 }
 0x195   :  { %138 = vadd.xlane.f32.xlu1 %v137_v49 }
 0x1fc   :  { %v136_v50 = vpop.xlane.xlu1 %135 }
 0x1fd   :  { %v140_v51 = vmul.f32 %v136_v50, %v127_v39 }
 0x1ff   :  { %v142_v52 = vadd.f32 1e-05, %v140_v51 }
 0x201   :  { %224 = vrsqrt.f32 %v142_v52  ;;  %vm150_vm4 = vweird.f32 %v142_v52 }
 0x207   :  { %v225_v53 = vpop.eup %224 }
 0x208   :  { %v145_v54 = vmul.f32 %v225_v53, %v142_v52  ;;  %v139_v55 = vpop.xlane.xlu1 %138  ;;  %vm151_vm3 = vweird.f32 %v225_v53 }
 0x209   :  { %v141_v56 = vmul.f32 %v139_v55, %v127_v39  ;;  %vm152_vm5 = vmor %vm150_vm4, %vm151_vm3 }
 0x20a   :  { %v146_v57 = vmul.f32 %v225_v53, %v145_v54 }
 0x20b   :  { %v143_v58 = vadd.f32 1e-05, %v141_v56 }
 0x20c   :  { %v147_v59 = vmul.f32 0.5, %v146_v57 }
 0x20d   :  { %226 = vrsqrt.f32 %v143_v58  ;;  %vm160_vm7 = vweird.f32 %v143_v58 }
 0x20e   :  { %v148_v60 = vsub.f32 1.5, %v147_v59 }
 0x210   :  { %v149_v61 = vmul.f32 %v225_v53, %v148_v60 }
 0x212   :  { %v153_v63 = vsel %vm152_vm5, %v225_v53, %v149_v61 }
 0x213   :  { %v227_v0 = vpop.eup %226  ;;  %v164_v1 = vmul.f32 %v153_v63, %v130_v42 }
 0x214   :  { %v155_v3 = vmul.f32 %v227_v0, %v143_v58  ;;  %vm161_vm6 = vweird.f32 %v227_v0 }
 0x215   :  { %v170_v4 = vmul.f32 %v220_v62, %v164_v1  ;;  %vm162_vm8 = vmor %vm160_vm7, %vm161_vm6 }
 0x216   :  { %v156_v5 = vmul.f32 %v227_v0, %v155_v3 }
 0x217   :  { %v176_v6 = vadd.f32 %v221_v2, %v170_v4 }
 0x218   :  { %v157_v7 = vmul.f32 0.5, %v156_v5 }
 0x219   :  { %v190_v9 = vmul.f32 %v183_v8, %v176_v6 }
 0x21a   :  { %v158_v10 = vsub.f32 1.5, %v157_v7 }
 0x21b   :  { %192 = vst.msk [vmem:[%s357_s8] sm:$0xff] %vm39_vm0, %v190_v9 }
 0x21c   :  { %v159_v11 = vmul.f32 %v227_v0, %v158_v10 }
 0x21e   :  { %v163_v12 = vsel %vm162_vm8, %v227_v0, %v159_v11 }
 0x21f   :  { %v165_v13 = vmul.f32 %v163_v12, %v131_v47 }
 0x221   :  { %v171_v14 = vmul.f32 %v220_v62, %v165_v13 }
 0x223   :  { %v177_v15 = vadd.f32 %v221_v2, %v171_v14 }
 0x225   :  { %v191_v17 = vmul.f32 %v188_v16, %v177_v15 }
 0x227   :  { %193 = vst.msk [vmem:[%s357_s8 + $0x8] sm:$0xff] %vm39_vm0, %v191_v17 }

// kernel: forward.19
= control target key start
LH: loop header
LB: loop body
LE: loop exit
PB: predicated region body
PF: predicated region fallthrough
CT: control target
= control target key end

     0   :  { %vm38_vm0 = vcmask 261120   ;;  %v270_v9 = vmov 0   ;;  %vm97_vm1 = vcmask 254976   ;;  %v271_v31 = vmov 32.0   ;;  %s417_s2 = inlined_call_operand.vmem [shape: f32[32,32], index: 2, kind: input, shape index: {}]   ;;  %s418_s3 = inlined_call_operand.vmem [shape: f32[1,32], index: 3, kind: input, shape index: {}]   ;;  %s419_s0 = inlined_call_operand.vmem [shape: f32[26,32], index: 0, kind: input, shape index: {}]   ;;  %s420_s6 = inlined_call_operand.vmem [shape: f32[26,1], index: 6, kind: input, shape index: {}]   ;;  %s421_s1 = inlined_call_operand.vmem [shape: f32[26,32], index: 1, kind: input, shape index: {}]   ;;  %s422_s4 = inlined_call_operand.vmem [shape: f32[1,32], index: 4, kind: input, shape index: {}]   ;;  %s423_s5 = inlined_call_operand.vmem [shape: f32[1,32], index: 5, kind: input, shape index: {}]   ;;  %s424_s7 = inlined_call_operand.vmem [shape: f32[26,32], index: 7, kind: output, shape index: {}]  }
   0x1   :  { %v33_v0 = vld [vmem:[%s417_s2 + $0x18] sm:$0xff]  ;;  %v32_v1 = vld [vmem:[%s417_s2 + $0x10] sm:$0xff]  ;;  %v31_v2 = vld [vmem:[%s417_s2 + $0x8] sm:$0xff]  ;;  %254 = vset.pattern.permute.xlu2 %v270_v9  ;;  %255 = vset.pattern.permute.xlu0 %v270_v9  ;;  %260 = vrcp.f32 %v271_v31 }
   0x2   :  { %63 = vmatpush.msra.mxu0 %v33_v0  ;;  %241 = vmatpush.msra.mxu2 %v33_v0  ;;  %v30_v3 = vld [vmem:[%s417_s2] sm:$0xff]  ;;  %v28_v5 = vld [vmem:[%s419_s0 + $0x10] sm:$0xff]  ;;  %v27_v6 = vld [vmem:[%s419_s0 + $0x8] sm:$0xff] }
   0x3   :  { %240 = vmatpush.msra.mxu1 %v33_v0  ;;  %242 = vmatpush.msra.mxu3 %v33_v0  ;;  %v26_v4 = vld [vmem:[%s419_s0] sm:$0xff]  ;;  %v29_v7 = vld [vmem:[%s419_s0 + $0x18] sm:$0x3]  ;;  %v81_v17 = vld [vmem:[%s421_s1 + $0x8] sm:$0xff] }
   0x4   :  { %64 = vmatpush.msra.mxu0 %v32_v1  ;;  %244 = vmatpush.msra.mxu2 %v32_v1  ;;  %v200_v8 = vld [vmem:[%s420_s6] sm:$0xff]  ;;  %v82_v20 = vld [vmem:[%s421_s1 + $0x10] sm:$0xff]  ;;  %v83_v26 = vld [vmem:[%s421_s1 + $0x18] sm:$0x3] }
   0x5   :  { %243 = vmatpush.msra.mxu1 %v32_v1  ;;  %245 = vmatpush.msra.mxu3 %v32_v1  ;;  %v257_v10 = vld [vmem:[%s418_s3] ss:$0 sm:$0xff]  ;;  %v201_v58 = vld [vmem:[%s420_s6 + $0x8] sm:$0xff]  ;;  %v203_v59 = vld [vmem:[%s420_s6 + $0x18] sm:$0x3] }
   0x6   :  { %65 = vmatpush.msra.mxu0 %v31_v2  ;;  %247 = vmatpush.msra.mxu2 %v31_v2  ;;  %v80_v12 = vld [vmem:[%s421_s1] sm:$0xff]  ;;  %v202_v60 = vld [vmem:[%s420_s6 + $0x10] sm:$0xff] }
   0x7   :  { %246 = vmatpush.msra.mxu1 %v31_v2  ;;  %248 = vmatpush.msra.mxu3 %v31_v2  ;;  %v261_v32 = vpop.eup %260 }
   0x8   :  { %66 = vmatpush.msra.mxu0 %v30_v3  ;;  %250 = vmatpush.msra.mxu2 %v30_v3  ;;  %v102_v33 = vmul.f32 32.0, %v261_v32  ;;  %vm106_vm2 = vweird.f32 %v261_v32 }
   0x9   :  { %236 = vmatmul.msk.f32.vlgmr.msra.gmra.mxu0 %vm38_vm0, %v26_v4  ;;  %238 = vmatmul.msk.f32.vlgmr.msra.gmra.mxu2 %vm38_vm0, %v28_v5 }
   0xa   :  { %249 = vmatpush.msra.mxu1 %v30_v3  ;;  %251 = vmatpush.msra.mxu3 %v30_v3  ;;  %v103_v34 = vsub.f32 1.0, %v102_v33 }
   0xb   :  { %237 = vmatmul.msk.f32.vlgmr.msra.gmra.mxu1 %vm38_vm0, %v27_v6  ;;  %239 = vmatmul.msk.f32.vlgmr.msra.gmra.mxu3 %vm38_vm0, %v29_v7 }
   0xc   :  { %206 = vperm.xlu2 %254, %v200_v8   ;;  %256 = vset.pattern.permute.xlu1 %v270_v9  ;;  %v104_v35 = vmul.f32 %v261_v32, %v103_v34 }
   0xe   :  { %v105_v36 = vadd.f32 %v261_v32, %v104_v35 }
  0x10   :  { %v107_v37 = vsel %vm106_vm2, %v261_v32, %v105_v36 }
  0x66   :  { %v207_v61 = vpop.permute.xlu2 %206 }
  0x86   :  { %v68_v11 = vpop.f32.mrf.mxu0 }
  0x87   :  { %v69_v13 = vadd.f32 %v257_v10, %v68_v11 }
  0x88   :  { %v71_v14 = vpop.f32.mrf.mxu1 }
  0x89   :  { %v84_v15 = vadd.f32 %v80_v12, %v69_v13  ;;  %v72_v16 = vadd.f32 %v257_v10, %v71_v14 }
  0x8b   :  { %v88_v18 = vsel %vm38_vm0, %v84_v15, 0.0  ;;  %v85_v22 = vadd.f32 %v81_v17, %v72_v16 }
  0x8c   :  { %v74_v19 = vpop.f32.mrf.mxu2  ;;  %89 = vadd.xlane.f32.xlu0 %v88_v18 }
  0x8d   :  { %v75_v21 = vadd.f32 %v257_v10, %v74_v19  ;;  %v91_v28 = vsel %vm38_vm0, %v85_v22, 0.0 }
  0x8e   :  { %v77_v23 = vpop.f32.mrf.mxu3 }
  0x8f   :  { %v86_v24 = vadd.f32 %v82_v20, %v75_v21  ;;  %v78_v25 = vadd.f32 %v257_v10, %v77_v23  ;;  %v258_v21 = vld [vmem:[%s422_s4] ss:$0 sm:$0xff] }
  0x91   :  { %v94_v27 = vsel %vm38_vm0, %v86_v24, 0.0  ;;  %v87_v29 = vadd.f32 %v83_v26, %v78_v25  ;;  %v259_v26 = vld [vmem:[%s423_s5] ss:$0 sm:$0xff] }
  0x92   :  { %95 = vadd.xlane.f32.xlu1 %v94_v27 }
  0x93   :  { %v98_v30 = vsel %vm97_vm1, %v87_v29, 0.0 }
  0x94   :  { %92 = vadd.xlane.f32.xlu0 %v91_v28 }
  0x9a   :  { %99 = vadd.xlane.f32.xlu1 %v98_v30 }
  0xff   :  { %v90_v38 = vpop.xlane.xlu0 %89 }
 0x100   :  { %v108_v39 = vmul.f32 %v107_v37, %v90_v38 }
 0x102   :  { %v362_v40 = vsub.f32 %v84_v15, %v108_v39 }
 0x104   :  { %v116_v41 = vmul.f32 %v362_v40, %v362_v40 }
 0x105   :  { %v96_v42 = vpop.xlane.xlu1 %95 }
 0x106   :  { %v110_v43 = vmul.f32 %v107_v37, %v96_v42  ;;  %v120_v44 = vsel %vm38_vm0, %v116_v41, 0.0 }
 0x107   :  { %121 = vadd.xlane.f32.xlu2 %v120_v44  ;;  %v93_v45 = vpop.xlane.xlu0 %92 }
 0x108   :  { %v367_v46 = vsub.f32 %v86_v24, %v110_v43  ;;  %v109_v47 = vmul.f32 %v107_v37, %v93_v45 }
 0x10a   :  { %v369_v48 = vsub.f32 %v85_v22, %v109_v47  ;;  %v118_v49 = vmul.f32 %v367_v46, %v367_v46 }
 0x10c   :  { %v126_v50 = vsel %vm38_vm0, %v118_v49, 0.0  ;;  %v117_v51 = vmul.f32 %v369_v48, %v369_v48 }
 0x10d   :  { %v100_v52 = vpop.xlane.xlu1 %99  ;;  %127 = vadd.xlane.f32.xlu0 %v126_v50 }
 0x10e   :  { %v111_v53 = vmul.f32 %v107_v37, %v100_v52  ;;  %v123_v54 = vsel %vm38_vm0, %v117_v51, 0.0 }
 0x10f   :  { %124 = vadd.xlane.f32.xlu2 %v123_v54 }
 0x110   :  { %v377_v55 = vsub.f32 %v87_v29, %v111_v53 }
 0x112   :  { %v119_v56 = vmul.f32 %v377_v55, %v377_v55 }
 0x114   :  { %v129_v57 = vsel %vm97_vm1, %v119_v56, 0.0 }
 0x115   :  { %130 = vadd.xlane.f32.xlu1 %v129_v57 }
 0x121   :  { %211 = vperm.xlu0 %255, %v201_v58  }
 0x127   :  { %221 = vperm.xlu2 %254, %v203_v59  }
 0x12e   :  { %216 = vperm.xlu1 %256, %v202_v60  }
 0x17a   :  { %v122_v62 = vpop.xlane.xlu2 %121 }
 0x17b   :  { %v132_v63 = vmul.f32 %v122_v62, %v107_v37 }
 0x17d   :  { %v136_v0 = vadd.f32 1e-05, %v132_v63 }
 0x17f   :  { %262 = vrsqrt.f32 %v136_v0  ;;  %vm146_vm4 = vweird.f32 %v136_v0 }
 0x180   :  { %v128_v1 = vpop.xlane.xlu0 %127 }
 0x181   :  { %v134_v2 = vmul.f32 %v128_v1, %v107_v37 }
 0x182   :  { %v125_v3 = vpop.xlane.xlu2 %124 }
 0x183   :  { %v138_v4 = vadd.f32 1e-05, %v134_v2  ;;  %v133_v5 = vmul.f32 %v125_v3, %v107_v37 }
 0x185   :  { %v263_v6 = vpop.eup %262  ;;  %264 = vrsqrt.f32 %v138_v4  ;;  %v137_v7 = vadd.f32 1e-05, %v133_v5  ;;  %vm166_vm7 = vweird.f32 %v138_v4 }
 0x186   :  { %v141_v8 = vmul.f32 %v263_v6, %v136_v0  ;;  %vm147_vm3 = vweird.f32 %v263_v6 }
 0x187   :  { %266 = vrsqrt.f32 %v137_v7  ;;  %vm148_vm5 = vmor %vm146_vm4, %vm147_vm3  ;;  %vm156_vm10 = vweird.f32 %v137_v7 }
 0x188   :  { %v142_v9 = vmul.f32 %v263_v6, %v141_v8  ;;  %v131_v10 = vpop.xlane.xlu1 %130 }
 0x189   :  { %v135_v11 = vmul.f32 %v131_v10, %v107_v37 }
 0x18a   :  { %v143_v12 = vmul.f32 0.5, %v142_v9  ;;  %v222_v58 = vpop.permute.xlu2 %221 }
 0x18b   :  { %v265_v13 = vpop.eup %264  ;;  %v139_v14 = vadd.f32 1e-05, %v135_v11 }
 0x18c   :  { %v144_v15 = vsub.f32 1.5, %v143_v12  ;;  %v161_v16 = vmul.f32 %v265_v13, %v138_v4  ;;  %vm167_vm6 = vweird.f32 %v265_v13 }
 0x18d   :  { %v267_v17 = vpop.eup %266  ;;  %268 = vrsqrt.f32 %v139_v14  ;;  %vm168_vm9 = vmor %vm166_vm7, %vm167_vm6  ;;  %vm176_vm13 = vweird.f32 %v139_v14 }
 0x18e   :  { %v145_v18 = vmul.f32 %v263_v6, %v144_v15  ;;  %v162_v19 = vmul.f32 %v265_v13, %v161_v16  ;;  %v151_v20 = vmul.f32 %v267_v17, %v137_v7  ;;  %vm157_vm8 = vweird.f32 %v267_v17 }
 0x18f   :  { %vm158_vm11 = vmor %vm156_vm10, %vm157_vm8 }
 0x190   :  { %v149_v22 = vsel %vm148_vm5, %v263_v6, %v145_v18  ;;  %v163_v23 = vmul.f32 0.5, %v162_v19  ;;  %v152_v24 = vmul.f32 %v267_v17, %v151_v20 }
 0x191   :  { %v180_v25 = vmul.f32 %v149_v22, %v362_v40 }
 0x192   :  { %v164_v27 = vsub.f32 1.5, %v163_v23  ;;  %v153_v28 = vmul.f32 0.5, %v152_v24 }
 0x193   :  { %v269_v29 = vpop.eup %268  ;;  %v188_v30 = vmul.f32 %v258_v21, %v180_v25  ;;  %v212_v49 = vpop.permute.xlu0 %211 }
 0x194   :  { %v165_v31 = vmul.f32 %v265_v13, %v164_v27  ;;  %v154_v32 = vsub.f32 1.5, %v153_v28  ;;  %v171_v33 = vmul.f32 %v269_v29, %v139_v14  ;;  %vm177_vm12 = vweird.f32 %v269_v29 }
 0x195   :  { %v196_v34 = vadd.f32 %v259_v26, %v188_v30  ;;  %vm178_vm14 = vmor %vm176_vm13, %vm177_vm12 }
 0x196   :  { %v155_v35 = vmul.f32 %v267_v17, %v154_v32  ;;  %v172_v36 = vmul.f32 %v269_v29, %v171_v33  ;;  %v169_v37 = vsel %vm168_vm9, %v265_v13, %v165_v31 }
 0x197   :  { %v224_v38 = vmul.f32 %v207_v61, %v196_v34  ;;  %v182_v39 = vmul.f32 %v169_v37, %v367_v46 }
 0x198   :  { %v173_v40 = vmul.f32 0.5, %v172_v36  ;;  %v159_v41 = vsel %vm158_vm11, %v267_v17, %v155_v35 }
 0x199   :  { %228 = vst.msk [vmem:[%s424_s7] sm:$0xff] %vm38_vm0, %v224_v38  ;;  %v181_v42 = vmul.f32 %v159_v41, %v369_v48  ;;  %v190_v45 = vmul.f32 %v258_v21, %v182_v39 }
 0x19a   :  { %v174_v43 = vsub.f32 1.5, %v173_v40 }
 0x19b   :  { %v189_v44 = vmul.f32 %v258_v21, %v181_v42  ;;  %v198_v53 = vadd.f32 %v259_v26, %v190_v45 }
 0x19c   :  { %v175_v47 = vmul.f32 %v269_v29, %v174_v43 }
 0x19d   :  { %v197_v50 = vadd.f32 %v259_v26, %v189_v44 }
 0x19e   :  { %v179_v51 = vsel %vm178_vm14, %v269_v29, %v175_v47 }
 0x19f   :  { %v183_v46 = vmul.f32 %v179_v51, %v377_v55  ;;  %v225_v52 = vmul.f32 %v212_v49, %v197_v50 }
 0x1a0   :  { %v217_v54 = vpop.permute.xlu1 %216 }
 0x1a1   :  { %v191_v56 = vmul.f32 %v258_v21, %v183_v46  ;;  %229 = vst.msk [vmem:[%s424_s7 + $0x8] sm:$0xff] %vm38_vm0, %v225_v52  ;;  %v226_v48 = vmul.f32 %v217_v54, %v198_v53 }
 0x1a3   :  { %v199_v57 = vadd.f32 %v259_v26, %v191_v56  ;;  %230 = vst.msk [vmem:[%s424_s7 + $0x10] sm:$0xff] %vm38_vm0, %v226_v48 }
 0x1a5   :  { %v227_v59 = vmul.f32 %v222_v58, %v199_v57 }
 0x1a7   :  { %231 = vst.msk [vmem:[%s424_s7 + $0x18] sm:$0x3] %vm97_vm1, %v227_v59 }

// kernel: forward.18
= control target key start
LH: loop header
LB: loop body
LE: loop exit
PB: predicated region body
PF: predicated region fallthrough
CT: control target
= control target key end

     0   :  { %s700_s15 = smov 0   ;;  %s806_s0 = inlined_call_operand.vmem [shape: f32[2,13,32], index: 0, kind: input, shape index: {}]   ;;  %s807_s1 = inlined_call_operand.vmem [shape: f32[32,96], index: 1, kind: input, shape index: {}]   ;;  %s808_s2 = inlined_call_operand.vmem [shape: f32[1,96], index: 2, kind: input, shape index: {}]   ;;  %s809_s3 = inlined_call_operand.vmem [shape: f32[2,13,13], index: 3, kind: input, shape index: {}]   ;;  %s810_s4 = inlined_call_operand.vmem [shape: f32[2,13,32], index: 4, kind: output, shape index: {}]  }
   0x1 LB: > { %s596_s16 = sadd.s32 4294967295, %s667_s15   ;;  %p600_p0 = scmp.ge.s32.totalorder %s667_s15, 1  ;;  %s667_s15 = sphi %s700_s15, %s14_s15  }
   0x2   : > { %p172_p1 = scmp.lt.s32.totalorder %s667_s15, 3 }
   0x4   : > { %p173_p2 = pnand %p600_p0, %p172_p1 }
   0x5   : > { %p203_p3 = scmp.lt.s32.totalorder (!%p173_p2), %s596_s16, 1  ;;  %s669_s5 = smov (!%p173_p2), 112  }
   0x6   : > { %176 = sbr.rel (%p173_p2) target bundleno = 940 (0x3ac), region = 36  ;;  %s670_s6 = smov (!%p173_p2), 80  }
   0x7   : > { %s671_s7 = smov (!%p173_p2), 96   ;;  %s672_s11 = smov (!%p173_p2), 64  }
   0x8   : > { %s673_s12 = smov (!%p173_p2), 48   ;;  %s674_s13 = smov (!%p173_p2), 16  }
   0xb   : > { %v223_v0 = vld [vmem:[%s807_s1 + $0x18] sm:$0xff]  ;;  %v222_v1 = vld [vmem:[%s807_s1 + $0x10] sm:$0xff]  ;;  %v221_v2 = vld [vmem:[%s807_s1 + $0x8] sm:$0xff]  ;;  %s814_s16 = smov (!%p203_p3, %s596_s16), 1  ;;  %vm228_vm0 = vcmask 261120   ;;  %vm266_vm1 = vcmask 130048  }
   0xc   : > { %247 = vmatpush.msra.mxu0 %v223_v0  ;;  %v220_v3 = vld [vmem:[%s807_s1] sm:$0xff]  ;;  %s720_s25 = sshll.u32 %s814_s16, 4  ;;  %vm302_vm2 = vcmask 105472   ;;  %vm306_vm3 = vcmask 102400   ;;  %vm363_vm4 = vcmask 1044480  }
   0xd   : > { %s207_s28 = scalar_lea.vmem %s806_s0, %s720_s25  ;;  %v644_v6 = vld [vmem:[%s808_s2] ss:$0 sm:$0xff]  ;;  %s212_s10 = scalar_lea.vmem %s809_s3, %s720_s25 }
   0xe   : > { %248 = vmatpush.msra.mxu0 %v222_v1  ;;  %v218_v4 = vld [vmem:[%s207_s28] sm:$0xff]  ;;  %v219_v5 = vld [vmem:[%s207_s28 + $0x8] sm:$0x1f]  ;;  %s217_s17 = scalar_lea.vmem %s810_s4, %s720_s25 }
   0xf   : > { %v259_v20 = vld [vmem:[%s212_s10 + $0x8] sm:$0x1f]  ;;  %v258_v22 = vld [vmem:[%s212_s10] sm:$0xff] }
  0x10   : > { %249 = vmatpush.msra.mxu0 %v221_v2 }
  0x12   : > { %250 = vmatpush.msra.mxu0 %v220_v3 }
  0x13   : > { %607 = vmatmul.msk.f32.vlgmr.msra.gmra.mxu0 %vm228_vm0, %v218_v4 }
  0x1b   : > { %608 = vmatmul.msk.f32.gmra.mxu0 %vm228_vm0, %v219_v5 }
  0x90   : > { %v252_v7 = vpop.f32.mrf.mxu0 }
  0x91   : > { %v731_v8 = vadd.f32 %v644_v6, %v252_v7 }
  0x93   : > { %389 = vrot.lane.b32.xlu2 %v731_v8, %s669_s5 }
  0x98   : > { %v255_v9 = vpop.f32.mrf.mxu0 }
  0x99   : > { %v734_v10 = vadd.f32 %v644_v6, %v255_v9 }
  0x9b   : > { %395 = vrot.lane.b32.xlu1 %v734_v10, %s670_s6  ;;  %264 = vrot.lane.b32.xlu0 %v734_v10, %s671_s7 }
  0x9c   : > { %391 = vrot.lane.b32.xlu2 %v734_v10, %s669_s5 }
  0xa3   : > { %393 = vrot.lane.b32.xlu1 %v731_v8, %s670_s6  ;;  %262 = vrot.lane.b32.xlu0 %v731_v8, %s671_s7 }
  0xed   : > { %v390_v15 = vpop.permute.xlu2 %389 }
  0xf6   : > { %v392_v16 = vpop.permute.xlu2 %391 }
 0x10d   : > { %v396_v11 = vpop.permute.xlu1 %395  ;;  %v265_v12 = vpop.permute.xlu0 %264 }
 0x10e   : > { %609 = vmatpush.xpose.msk.msra.mxu1 %vm266_vm1, %v265_v12  ;;  %616 = vmatpush.xpose.msk.msra.mxu3 %vm266_vm1, %v396_v11 }
 0x115   : > { %v394_v13 = vpop.permute.xlu1 %393  ;;  %v263_v14 = vpop.permute.xlu0 %262 }
 0x116   : > { %610 = vmatpush.xpose.msk.msra.mxu1 %vm266_vm1, %v263_v14  ;;  %617 = vmatpush.xpose.msk.msra.mxu3 %vm266_vm1, %v394_v13 }
 0x119   : > { %611 = vmatmul.msk.f32.vlgmr.msra.gmra.mxu1 %vm266_vm1, %v731_v8  ;;  %618 = vmatmul.msk.f32.vlgmr.msra.gmra.mxu3 %vm266_vm1, %v390_v15 }
 0x121   : > { %612 = vmatmul.msk.f32.gmra.mxu1 %vm266_vm1, %v734_v10  ;;  %619 = vmatmul.msk.f32.gmra.mxu3 %vm266_vm1, %v392_v16 }
 0x196   : > { %v292_v17 = vpop.f32.mrf.mxu1 }
 0x197   : > { %v298_v25 = vmul.f32 0.25, %v292_v17 }
 0x199   : > { %v300_v31 = vadd.f32 %v298_v25, %v258_v22 }
 0x19b   : > { %v303_v34 = vsel %vm302_vm2, %v300_v31, -inf }
 0x19c   : > { %v422_v18 = vpop.f32.mrf.mxu3 }
 0x19d   : > { %v428_v19 = vmul.f32 0.25, %v422_v18 }
 0x19e   : > { %v295_v21 = vpop.f32.mrf.mxu1 }
 0x19f   : > { %v299_v23 = vmul.f32 0.25, %v295_v21  ;;  %v430_v24 = vadd.f32 %v428_v19, %v258_v22 }
 0x1a1   : > { %v301_v26 = vadd.f32 %v299_v23, %v259_v20  ;;  %v432_v27 = vsel %vm302_vm2, %v430_v24, -inf }
 0x1a2   : > { %433 = vmax.xlane.f32.xlu1 %v432_v27 }
 0x1a3   : > { %v307_v28 = vsel %vm306_vm3, %v301_v26, -inf }
 0x1a4   : > { %v425_v29 = vpop.f32.mrf.mxu3  ;;  %308 = vmax.xlane.f32.xlu0 %v307_v28 }
 0x1a5   : > { %v429_v30 = vmul.f32 0.25, %v425_v29 }
 0x1a7   : > { %v431_v32 = vadd.f32 %v429_v30, %v259_v20 }
 0x1a9   : > { %v435_v33 = vsel %vm306_vm3, %v431_v32, -inf }
 0x1aa   : > { %436 = vmax.xlane.f32.xlu2 %v435_v33  ;;  %304 = vmax.xlane.f32.xlu1 %v303_v34 }
 0x1b8   : > { %354 = vrot.lane.b32.xlu0 %v734_v10, %s672_s11 }
 0x1c3   : > { %352 = vrot.lane.b32.xlu1 %v731_v8, %s672_s11 }
 0x215   : > { %v434_v35 = vpop.xlane.xlu1 %433 }
 0x216   : > { %v438_v36 = vsub.f32 %v430_v24, %v434_v35 }
 0x217   : > { %v309_v37 = vpop.xlane.xlu0 %308 }
 0x218   : > { %v440_v38 = vmul.f32 1.442695, %v438_v36  ;;  %v311_v39 = vsub.f32 %v301_v26, %v309_v37 }
 0x21a   : > { %645 = vpow2.f32 %v440_v38  ;;  %v314_v40 = vmul.f32 1.442695, %v311_v39 }
 0x21c   : > { %647 = vpow2.f32 %v314_v40 }
 0x21d   : > { %v437_v41 = vpop.xlane.xlu2 %436  ;;  %v305_v42 = vpop.xlane.xlu1 %304 }
 0x21e   : > { %v439_v43 = vsub.f32 %v431_v32, %v437_v41  ;;  %v310_v44 = vsub.f32 %v300_v31, %v305_v42 }
 0x220   : > { %v761_v45 = vpop.eup %645  ;;  %v442_v46 = vmul.f32 1.442695, %v439_v43  ;;  %v312_v47 = vmul.f32 1.442695, %v310_v44 }
 0x221   : > { %v444_v48 = vsel %vm302_vm2, %v761_v45, 0.0 }
 0x222   : > { %v765_v49 = vpop.eup %647  ;;  %649 = vpow2.f32 %v442_v46  ;;  %445 = vadd.xlane.f32.xlu0 %v444_v48 }
 0x223   : > { %651 = vpow2.f32 %v312_v47  ;;  %v319_v50 = vsel %vm306_vm3, %v765_v49, 0.0 }
 0x224   : > { %320 = vadd.xlane.f32.xlu2 %v319_v50 }
 0x228   : > { %v769_v51 = vpop.eup %649 }
 0x229   : > { %v771_v52 = vpop.eup %651  ;;  %v447_v55 = vsel %vm306_vm3, %v769_v51, 0.0 }
 0x22a   : > { %v316_v53 = vsel %vm302_vm2, %v771_v52, 0.0  ;;  %v355_v54 = vpop.permute.xlu0 %354 }
 0x22b   : > { %317 = vadd.xlane.f32.xlu1 %v316_v53  ;;  %613 = vmatpush.msk.msrb.mxu0 %vm363_vm4, %v355_v54 }
 0x22c   : > { %628 = vmatpush.msk.msra.mxu2 %vm363_vm4, %v355_v54  ;;  %448 = vadd.xlane.f32.xlu2 %v447_v55 }
 0x235   : > { %v353_v56 = vpop.permute.xlu1 %352 }
 0x236   : > { %480 = vrot.lane.b32.xlu0 %v731_v8, %s673_s12  ;;  %381 = vmatpush.msrb.mxu0 %v353_v56 }
 0x237   : > { %629 = vmatpush.msra.mxu2 %v353_v56 }
 0x244   : > { %482 = vrot.lane.b32.xlu2 %v734_v10, %s673_s12 }
 0x295   : > { %v446_v57 = vpop.xlane.xlu0 %445 }
 0x296   : > { %653 = vrcp.f32 %v446_v57  ;;  %vm455_vm10 = vweird.f32 %v446_v57  ;;  %v461_v16 = vand.u32 2147483648, %v446_v57  ;;  %v459_v20 = vand.u32 2147483647, %v446_v57 }
 0x297   : > { %v321_v58 = vpop.xlane.xlu2 %320 }
 0x298   : > { %655 = vrcp.f32 %v321_v58  ;;  %v348_v3 = vand.u32 2147483648, %v321_v58  ;;  %v346_v4 = vand.u32 2147483647, %v321_v58  ;;  %vm342_vm6 = vweird.f32 %v321_v58 }
 0x299   : > { %v462_v29 = vor.u32 1.1754944e-38, %v461_v16  ;;  %vm460_vm14 = vcmp.eq.f32.partialorder %v459_v20, 8.507059e+37 }
 0x29a   : > { %v349_v10 = vor.u32 1.1754944e-38, %v348_v3  ;;  %vm347_vm8 = vcmp.eq.f32.partialorder %v346_v4, 8.507059e+37 }
 0x29c   : > { %v654_v59 = vpop.eup %653 }
 0x29d   : > { %v451_v60 = vmul.f32 %v654_v59, %v446_v57  ;;  %vm456_vm9 = vweird.f32 %v654_v59 }
 0x29e   : > { %v656_v61 = vpop.eup %655  ;;  %v318_v62 = vpop.xlane.xlu1 %317  ;;  %vm783_vm11 = vmor %vm455_vm10, %vm456_vm9 }
 0x29f   : > { %v452_v63 = vsub.f32 1.0, %v451_v60  ;;  %v338_v0 = vmul.f32 %v656_v61, %v321_v58  ;;  %657 = vrcp.f32 %v318_v62  ;;  %v449_v1 = vpop.xlane.xlu2 %448  ;;  %vm343_vm5 = vweird.f32 %v656_v61 }
 0x2a0   : > { %659 = vrcp.f32 %v449_v1  ;;  %vm344_vm7 = vmor %vm342_vm6, %vm343_vm5  ;;  %v333_v21 = vand.u32 2147483648, %v318_v62  ;;  %v331_v26 = vand.u32 2147483647, %v318_v62  ;;  %vm327_vm13 = vweird.f32 %v318_v62 }
 0x2a1   : > { %v339_v2 = vsub.f32 1.0, %v338_v0  ;;  %v453_v5 = vmul.f32 %v654_v59, %v452_v63  ;;  %v476_v36 = vand.u32 2147483648, %v449_v1  ;;  %vm470_vm5 = vweird.f32 %v449_v1 }
 0x2a2   : > { %v334_v31 = vor.u32 1.1754944e-38, %v333_v21  ;;  %vm332_vm3 = vcmp.eq.f32.partialorder %v331_v26, 8.507059e+37  ;;  %v474_v39 = vand.u32 2147483647, %v449_v1 }
 0x2a3   : > { %v340_v6 = vmul.f32 %v656_v61, %v339_v2  ;;  %v454_v12 = vadd.f32 %v654_v59, %v453_v5  ;;  %v477_v41 = vor.u32 1.1754944e-38, %v476_v36 }
 0x2a5   : > { %v658_v7 = vpop.eup %657  ;;  %v341_v8 = vadd.f32 %v656_v61, %v340_v6  ;;  %v458_v28 = vsel %vm783_vm11, %v654_v59, %v454_v12 }
 0x2a6   : > { %v660_v9 = vpop.eup %659  ;;  %v323_v11 = vmul.f32 %v658_v7, %v318_v62  ;;  %vm328_vm12 = vweird.f32 %v658_v7  ;;  %v463_v33 = vsel %vm460_vm14, %v462_v29, %v458_v28 }
 0x2a7   : > { %v466_v13 = vmul.f32 %v660_v9, %v449_v1  ;;  %v483_v14 = vpop.permute.xlu2 %482  ;;  %v345_v15 = vsel %vm344_vm7, %v656_v61, %v341_v8  ;;  %vm329_vm15 = vmor %vm327_vm13, %vm328_vm12  ;;  %v464_v38 = vmul.f32 %v761_v45, %v463_v33  ;;  %vm475_vm7 = vcmp.eq.f32.partialorder %v474_v39, 8.507059e+37 }
 0x2a8   : > { %v324_v17 = vsub.f32 1.0, %v323_v11  ;;  %620 = vmatpush.msk.msrb.mxu2 %vm363_vm4, %v483_v14  ;;  %v481_v18 = vpop.permute.xlu0 %480  ;;  %v350_v19 = vsel %vm347_vm8, %v349_v10, %v345_v15  ;;  %vm471_vm4 = vweird.f32 %v660_v9  ;;  %vm527_vm8 = vcmask 258048  }
 0x2a9   : > { %v467_v22 = vsub.f32 1.0, %v466_v13  ;;  %v351_v23 = vmul.f32 %v765_v49, %v350_v19  ;;  %vm472_vm6 = vmor %vm470_vm5, %vm471_vm4 }
 0x2aa   : > { %v325_v25 = vmul.f32 %v658_v7, %v324_v17  ;;  %508 = vmatpush.msrb.mxu2 %v481_v18 }
 0x2ab   : > { %v468_v27 = vmul.f32 %v660_v9, %v467_v22  ;;  %615 = vmatmul.msk.f32.vlgmr.msra.gmra.mxu2 %vm302_vm2, %v351_v23 }
 0x2ac   : > { %v326_v30 = vadd.f32 %v658_v7, %v325_v25 }
 0x2ad   : > { %v469_v35 = vadd.f32 %v660_v9, %v468_v27 }
 0x2ae   : > { %v330_v32 = vsel %vm329_vm15, %v658_v7, %v326_v30 }
 0x2af   : > { %v335_v34 = vsel %vm332_vm3, %v334_v31, %v330_v32  ;;  %v473_v40 = vsel %vm472_vm6, %v660_v9, %v469_v35 }
 0x2b0   : > { %v336_v37 = vmul.f32 %v771_v52, %v335_v34  ;;  %v478_v42 = vsel %vm475_vm7, %v477_v41, %v473_v40 }
 0x2b1   : > { %v479_v43 = vmul.f32 %v769_v51, %v478_v42 }
 0x2b2   : > { %614 = vmatmul.msk.f32.vlgmr.msrb.gmra.mxu0 %vm302_vm2, %v336_v37 }
 0x2b3   : > { %621 = vmatmul.msk.f32.vlgmr.msrb.gmra.mxu2 %vm302_vm2, %v464_v38 }
 0x2bb   : > { %622 = vmatmul.msk.f32.gmra.mxu2 %vm302_vm2, %v479_v43 }
 0x32e   : > { %v386_v44 = vpop.f32.mrf.mxu2 }
 0x32f   : > { %v383_v49 = vpop.f32.mrf.mxu0 }
 0x336   : > { %v510_v46 = vpop.f32.mrf.mxu2 }
 0x337   : > { %518 = vrot.lane.b32.xlu0 %v510_v46, %s674_s13 }
 0x33e   : > { %v513_v45 = vpop.f32.mrf.mxu2 }
 0x33f   : > { %520 = vrot.lane.b32.xlu2 %v513_v45, %s674_s13 }
 0x399   : > { %v521_v47 = vpop.permute.xlu2 %520 }
 0x39a   : > { %v525_v48 = vsel %vm266_vm1, %v386_v44, %v521_v47 }
 0x39b   : > { %528 = vst.msk [vmem:[%s217_s17 + $0x8] sm:$0x1f] %vm527_vm8, %v525_v48 }
 0x3a9   : > { %v519_v50 = vpop.permute.xlu0 %518 }
 0x3aa   : > { %v524_v51 = vsel %vm266_vm1, %v383_v49, %v519_v50 }
 0x3ab   : > { %526 = vst.msk [vmem:[%s217_s17] sm:$0xff] %vm228_vm0, %v524_v51 }
 0x3ac PF: > { %s14_s15 = sadd.s32 1, %s667_s15  }
 0x3ad   : > { %p11_p4 = scmp.ge.s32.totalorder %s14_s15, 4  }
 0x3af   :  { %13 = sbr.rel (!%p11_p4) target bundleno = 1 (0x1), region = 69 }

// kernel: forward.20
= control target key start
LH: loop header
LB: loop body
LE: loop exit
PB: predicated region body
PF: predicated region fallthrough
CT: control target
= control target key end

     0   :  { %vm41_vm0 = vcmask 261120   ;;  %vm99_vm1 = vcmask 523264   ;;  %v332_v34 = vmov 0   ;;  %vm154_vm2 = vcmask 254976   ;;  %s508_s1 = inlined_call_operand.vmem [shape: f32[32,64], index: 1, kind: input, shape index: {}]   ;;  %s509_s3 = inlined_call_operand.vmem [shape: f32[64,32], index: 3, kind: input, shape index: {}]   ;;  %s510_s0 = inlined_call_operand.vmem [shape: f32[26,32], index: 0, kind: input, shape index: {}]   ;;  %s511_s2 = inlined_call_operand.vmem [shape: f32[1,64], index: 2, kind: input, shape index: {}]   ;;  %s512_s4 = inlined_call_operand.vmem [shape: f32[1,32], index: 4, kind: input, shape index: {}]   ;;  %s513_s7 = inlined_call_operand.vmem [shape: f32[26,1], index: 7, kind: input, shape index: {}]   ;;  %s514_s5 = inlined_call_operand.vmem [shape: f32[1,32], index: 5, kind: input, shape index: {}]   ;;  %s515_s6 = inlined_call_operand.vmem [shape: f32[1,32], index: 6, kind: input, shape index: {}]   ;;  %s516_s8 = inlined_call_operand.vmem [shape: f32[26,32], index: 8, kind: output, shape index: {}]  }
   0x1   :  { %v36_v0 = vld [vmem:[%s508_s1 + $0x18] sm:$0xff]  ;;  %v35_v1 = vld [vmem:[%s508_s1 + $0x10] sm:$0xff]  ;;  %v34_v2 = vld [vmem:[%s508_s1 + $0x8] sm:$0xff]  ;;  %315 = vset.pattern.permute.xlu2 %v332_v34  ;;  %316 = vset.pattern.permute.xlu0 %v332_v34  ;;  %v333_v48 = vmov 32.0  }
   0x2   :  { %66 = vmatpush.msra.mxu0 %v36_v0  ;;  %301 = vmatpush.msra.mxu3 %v36_v0  ;;  %v94_v3 = vld [vmem:[%s509_s3 + $0x38] sm:$0xff]  ;;  %v93_v4 = vld [vmem:[%s509_s3 + $0x30] sm:$0xff]  ;;  %v33_v5 = vld [vmem:[%s508_s1] sm:$0xff]  ;;  %322 = vrcp.f32 %v333_v48 }
   0x3   :  { %120 = vmatpush.msra.mxu1 %v94_v3  ;;  %305 = vmatpush.msra.mxu2 %v94_v3  ;;  %v29_v6 = vld [vmem:[%s510_s0] sm:$0xff]  ;;  %v403_v7 = vld [vmem:[%s510_s0 + $0x8] sm:$0xff]  ;;  %v90_v10 = vld [vmem:[%s509_s3 + $0x18] sm:$0xff] }
   0x4   :  { %67 = vmatpush.msra.mxu0 %v35_v1  ;;  %302 = vmatpush.msra.mxu3 %v35_v1  ;;  %v92_v8 = vld [vmem:[%s509_s3 + $0x28] sm:$0xff]  ;;  %v91_v9 = vld [vmem:[%s509_s3 + $0x20] sm:$0xff]  ;;  %v31_v11 = vld [vmem:[%s510_s0 + $0x10] sm:$0xff] }
   0x5   :  { %121 = vmatpush.msra.mxu1 %v93_v4  ;;  %306 = vmatpush.msra.mxu2 %v93_v4  ;;  %v32_v12 = vld [vmem:[%s510_s0 + $0x18] sm:$0x3]  ;;  %v89_v13 = vld [vmem:[%s509_s3 + $0x10] sm:$0xff]  ;;  %v88_v14 = vld [vmem:[%s509_s3 + $0x8] sm:$0xff] }
   0x6   :  { %68 = vmatpush.msra.mxu0 %v34_v2  ;;  %303 = vmatpush.msra.mxu3 %v34_v2  ;;  %v87_v15 = vld [vmem:[%s509_s3] sm:$0xff] }
   0x7   :  { %122 = vmatpush.msra.mxu1 %v92_v8  ;;  %307 = vmatpush.msra.mxu2 %v92_v8  ;;  %v318_v16 = vld [vmem:[%s511_s2] ss:$0 sm:$0xff] }
   0x8   :  { %69 = vmatpush.msra.mxu0 %v33_v5  ;;  %304 = vmatpush.msra.mxu3 %v33_v5  ;;  %v319_v29 = vld [vmem:[%s512_s4] ss:$0 sm:$0xff]  ;;  %v323_v49 = vpop.eup %322 }
   0x9   :  { %293 = vmatmul.msk.f32.vlgmr.msra.gmra.mxu0 %vm41_vm0, %v29_v6  ;;  %294 = vmatmul.msk.f32.vlgmr.msra.gmra.mxu3 %vm41_vm0, %v403_v7  ;;  %v257_v32 = vld [vmem:[%s513_s7] sm:$0xff]  ;;  %v159_v50 = vmul.f32 32.0, %v323_v49  ;;  %vm163_vm3 = vweird.f32 %v323_v49 }
   0xa   :  { %123 = vmatpush.msra.mxu1 %v91_v9  ;;  %308 = vmatpush.msra.mxu2 %v91_v9 }
   0xb   :  { %263 = vperm.xlu2 %315, %v257_v32   ;;  %317 = vset.pattern.permute.xlu1 %v332_v34  ;;  %v160_v51 = vsub.f32 1.0, %v159_v50 }
   0xc   :  { %124 = vmatpush.msra.mxu1 %v90_v10  ;;  %309 = vmatpush.msra.mxu2 %v90_v10 }
   0xd   :  { %v161_v52 = vmul.f32 %v323_v49, %v160_v51 }
   0xe   :  { %125 = vmatpush.msra.mxu1 %v89_v13  ;;  %310 = vmatpush.msra.mxu2 %v89_v13  ;;  %v259_v13 = vld [vmem:[%s513_s7 + $0x10] sm:$0xff] }
   0xf   :  { %v162_v53 = vadd.f32 %v323_v49, %v161_v52 }
  0x10   :  { %126 = vmatpush.msra.mxu1 %v88_v14  ;;  %311 = vmatpush.msra.mxu2 %v88_v14 }
  0x11   :  { %295 = vmatmul.msk.f32.gmra.mxu3 %vm41_vm0, %v31_v11  ;;  %v448_v54 = vsel %vm163_vm3, %v323_v49, %v162_v53 }
  0x12   :  { %127 = vmatpush.msra.mxu1 %v87_v15  ;;  %312 = vmatpush.msra.mxu2 %v87_v15 }
  0x19   :  { %296 = vmatmul.msk.f32.gmra.mxu3 %vm41_vm0, %v32_v12 }
  0x65   :  { %v264_v14 = vpop.permute.xlu2 %263 }
  0x86   :  { %v71_v17 = vpop.f32.mrf.mxu0 }
  0x87   :  { %v72_v18 = vadd.f32 %v318_v16, %v71_v17 }
  0x89   :  { %v83_v19 = vmax.f32 %v72_v18, 0.0 }
  0x8b   :  { %297 = vmatmul.msk.f32.vlgmr.msra.gmra.mxu1 %vm99_vm1, %v83_v19 }
  0x8c   :  { %v74_v20 = vpop.f32.mrf.mxu3 }
  0x8d   :  { %v75_v21 = vadd.f32 %v318_v16, %v74_v20 }
  0x8f   :  { %v84_v22 = vmax.f32 %v75_v21, 0.0 }
  0x93   :  { %298 = vmatmul.msk.f32.gmra.mxu1 %vm99_vm1, %v84_v22 }
  0x94   :  { %v77_v23 = vpop.f32.mrf.mxu3 }
  0x95   :  { %v78_v24 = vadd.f32 %v318_v16, %v77_v23 }
  0x97   :  { %v85_v25 = vmax.f32 %v78_v24, 0.0 }
  0x99   :  { %299 = vmatmul.msk.f32.vlgmr.msra.gmra.mxu2 %vm99_vm1, %v85_v25 }
  0x9c   :  { %v80_v26 = vpop.f32.mrf.mxu3 }
  0x9d   :  { %v81_v27 = vadd.f32 %v318_v16, %v80_v26 }
  0x9f   :  { %v86_v28 = vmax.f32 %v81_v27, 0.0 }
  0xa1   :  { %300 = vmatmul.msk.f32.gmra.mxu2 %vm99_vm1, %v86_v28 }
 0x108   :  { %v129_v30 = vpop.f32.mrf.mxu1 }
 0x109   :  { %v130_v31 = vadd.f32 %v319_v29, %v129_v30  ;;  %v320_v30 = vld [vmem:[%s514_s5] ss:$0 sm:$0xff] }
 0x10b   :  { %v141_v33 = vadd.f32 %v130_v31, %v29_v6 }
 0x10d   :  { %v145_v35 = vsel %vm41_vm0, %v141_v33, 0.0 }
 0x10e   :  { %146 = vadd.xlane.f32.xlu0 %v145_v35 }
 0x110   :  { %v132_v36 = vpop.f32.mrf.mxu1 }
 0x111   :  { %v133_v37 = vadd.f32 %v319_v29, %v132_v36  ;;  %v321_v36 = vld [vmem:[%s515_s6] ss:$0 sm:$0xff] }
 0x113   :  { %v142_v38 = vadd.f32 %v133_v37, %v403_v7 }
 0x115   :  { %v148_v39 = vsel %vm41_vm0, %v142_v38, 0.0 }
 0x116   :  { %149 = vadd.xlane.f32.xlu0 %v148_v39 }
 0x11c   :  { %v135_v40 = vpop.f32.mrf.mxu2 }
 0x11d   :  { %v136_v41 = vadd.f32 %v319_v29, %v135_v40 }
 0x11f   :  { %v143_v42 = vadd.f32 %v136_v41, %v31_v11  ;;  %v260_v11 = vld [vmem:[%s513_s7 + $0x18] sm:$0x3] }
 0x121   :  { %v151_v43 = vsel %vm41_vm0, %v143_v42, 0.0 }
 0x122   :  { %152 = vadd.xlane.f32.xlu1 %v151_v43 }
 0x124   :  { %v138_v44 = vpop.f32.mrf.mxu2 }
 0x125   :  { %v139_v45 = vadd.f32 %v319_v29, %v138_v44 }
 0x127   :  { %v144_v46 = vadd.f32 %v139_v45, %v32_v12  ;;  %v258_v12 = vld [vmem:[%s513_s7 + $0x8] sm:$0xff] }
 0x129   :  { %v155_v47 = vsel %vm154_vm2, %v144_v46, 0.0 }
 0x12a   :  { %156 = vadd.xlane.f32.xlu1 %v155_v47 }
 0x181   :  { %v147_v55 = vpop.xlane.xlu0 %146 }
 0x182   :  { %v165_v56 = vmul.f32 %v448_v54, %v147_v55 }
 0x184   :  { %v169_v57 = vsub.f32 %v141_v33, %v165_v56 }
 0x186   :  { %v173_v58 = vmul.f32 %v169_v57, %v169_v57 }
 0x188   :  { %v177_v59 = vsel %vm41_vm0, %v173_v58, 0.0 }
 0x189   :  { %178 = vadd.xlane.f32.xlu2 %v177_v59  ;;  %v150_v60 = vpop.xlane.xlu0 %149 }
 0x18a   :  { %v166_v61 = vmul.f32 %v448_v54, %v150_v60 }
 0x18c   :  { %v453_v62 = vsub.f32 %v142_v38, %v166_v61 }
 0x18e   :  { %v174_v63 = vmul.f32 %v453_v62, %v453_v62 }
 0x190   :  { %v180_v0 = vsel %vm41_vm0, %v174_v63, 0.0 }
 0x191   :  { %181 = vadd.xlane.f32.xlu2 %v180_v0 }
 0x195   :  { %v153_v1 = vpop.xlane.xlu1 %152 }
 0x196   :  { %v167_v2 = vmul.f32 %v448_v54, %v153_v1 }
 0x198   :  { %v459_v3 = vsub.f32 %v143_v42, %v167_v2 }
 0x19a   :  { %v175_v4 = vmul.f32 %v459_v3, %v459_v3 }
 0x19c   :  { %v183_v5 = vsel %vm41_vm0, %v175_v4, 0.0 }
 0x19d   :  { %v157_v6 = vpop.xlane.xlu1 %156  ;;  %184 = vadd.xlane.f32.xlu0 %v183_v5 }
 0x19e   :  { %v168_v7 = vmul.f32 %v448_v54, %v157_v6 }
 0x1a0   :  { %v465_v8 = vsub.f32 %v144_v46, %v168_v7 }
 0x1a2   :  { %v176_v9 = vmul.f32 %v465_v8, %v465_v8 }
 0x1a4   :  { %v186_v10 = vsel %vm154_vm2, %v176_v9, 0.0 }
 0x1a5   :  { %187 = vadd.xlane.f32.xlu1 %v186_v10 }
 0x1a9   :  { %278 = vperm.xlu2 %315, %v260_v11  }
 0x1b1   :  { %268 = vperm.xlu0 %316, %v258_v12  }
 0x1be   :  { %273 = vperm.xlu1 %317, %v259_v13  }
 0x1fc   :  { %v179_v15 = vpop.xlane.xlu2 %178 }
 0x1fd   :  { %v189_v16 = vmul.f32 %v179_v15, %v448_v54 }
 0x1ff   :  { %v193_v17 = vadd.f32 1e-05, %v189_v16 }
 0x201   :  { %324 = vrsqrt.f32 %v193_v17  ;;  %vm203_vm5 = vweird.f32 %v193_v17 }
 0x204   :  { %v182_v18 = vpop.xlane.xlu2 %181 }
 0x205   :  { %v190_v19 = vmul.f32 %v182_v18, %v448_v54 }
 0x207   :  { %v325_v20 = vpop.eup %324  ;;  %v194_v21 = vadd.f32 1e-05, %v190_v19 }
 0x208   :  { %v198_v22 = vmul.f32 %v325_v20, %v193_v17  ;;  %vm204_vm4 = vweird.f32 %v325_v20 }
 0x209   :  { %326 = vrsqrt.f32 %v194_v21  ;;  %vm205_vm6 = vmor %vm203_vm5, %vm204_vm4  ;;  %vm213_vm8 = vweird.f32 %v194_v21 }
 0x20a   :  { %v199_v23 = vmul.f32 %v325_v20, %v198_v22 }
 0x20c   :  { %v200_v24 = vmul.f32 0.5, %v199_v23 }
 0x20e   :  { %v201_v25 = vsub.f32 1.5, %v200_v24 }
 0x20f   :  { %v327_v26 = vpop.eup %326 }
 0x210   :  { %v202_v27 = vmul.f32 %v325_v20, %v201_v25  ;;  %v208_v28 = vmul.f32 %v327_v26, %v194_v21  ;;  %v185_v29 = vpop.xlane.xlu0 %184  ;;  %vm214_vm7 = vweird.f32 %v327_v26 }
 0x211   :  { %v191_v31 = vmul.f32 %v185_v29, %v448_v54  ;;  %vm215_vm9 = vmor %vm213_vm8, %vm214_vm7 }
 0x212   :  { %v206_v32 = vsel %vm205_vm6, %v325_v20, %v202_v27  ;;  %v209_v33 = vmul.f32 %v327_v26, %v208_v28 }
 0x213   :  { %v237_v34 = vmul.f32 %v206_v32, %v169_v57  ;;  %v195_v35 = vadd.f32 1e-05, %v191_v31 }
 0x214   :  { %v210_v37 = vmul.f32 0.5, %v209_v33 }
 0x215   :  { %v245_v38 = vmul.f32 %v320_v30, %v237_v34  ;;  %328 = vrsqrt.f32 %v195_v35  ;;  %vm223_vm11 = vweird.f32 %v195_v35 }
 0x216   :  { %v211_v39 = vsub.f32 1.5, %v210_v37 }
 0x217   :  { %v253_v40 = vadd.f32 %v321_v36, %v245_v38 }
 0x218   :  { %v212_v41 = vmul.f32 %v327_v26, %v211_v39  ;;  %v188_v42 = vpop.xlane.xlu1 %187 }
 0x219   :  { %v192_v43 = vmul.f32 %v188_v42, %v448_v54  ;;  %v281_v44 = vmul.f32 %v264_v14, %v253_v40 }
 0x21a   :  { %v216_v45 = vsel %vm215_vm9, %v327_v26, %v212_v41 }
 0x21b   :  { %v329_v46 = vpop.eup %328  ;;  %v196_v47 = vadd.f32 1e-05, %v192_v43  ;;  %v238_v48 = vmul.f32 %v216_v45, %v453_v62  ;;  %285 = vst.msk [vmem:[%s516_s8] sm:$0xff] %vm41_vm0, %v281_v44 }
 0x21c   :  { %v218_v49 = vmul.f32 %v329_v46, %v195_v35  ;;  %vm224_vm10 = vweird.f32 %v329_v46 }
 0x21d   :  { %330 = vrsqrt.f32 %v196_v47  ;;  %v246_v51 = vmul.f32 %v320_v30, %v238_v48  ;;  %vm225_vm12 = vmor %vm223_vm11, %vm224_vm10  ;;  %vm233_vm14 = vweird.f32 %v196_v47 }
 0x21e   :  { %v219_v50 = vmul.f32 %v329_v46, %v218_v49 }
 0x21f   :  { %v254_v55 = vadd.f32 %v321_v36, %v246_v51 }
 0x220   :  { %v220_v52 = vmul.f32 0.5, %v219_v50 }
 0x222   :  { %v221_v53 = vsub.f32 1.5, %v220_v52 }
 0x223   :  { %v331_v54 = vpop.eup %330  ;;  %v269_v56 = vpop.permute.xlu0 %268 }
 0x224   :  { %v222_v57 = vmul.f32 %v329_v46, %v221_v53  ;;  %v228_v58 = vmul.f32 %v331_v54, %v196_v47  ;;  %v282_v59 = vmul.f32 %v269_v56, %v254_v55  ;;  %vm234_vm13 = vweird.f32 %v331_v54 }
 0x225   :  { %vm235_vm15 = vmor %vm233_vm14, %vm234_vm13 }
 0x226   :  { %v229_v60 = vmul.f32 %v331_v54, %v228_v58  ;;  %286 = vst.msk [vmem:[%s516_s8 + $0x8] sm:$0xff] %vm41_vm0, %v282_v59  ;;  %v226_v61 = vsel %vm225_vm12, %v329_v46, %v222_v57 }
 0x227   :  { %v239_v62 = vmul.f32 %v226_v61, %v459_v3  ;;  %v279_v3 = vpop.permute.xlu2 %278 }
 0x228   :  { %v230_v63 = vmul.f32 0.5, %v229_v60 }
 0x229   :  { %v247_v1 = vmul.f32 %v320_v30, %v239_v62 }
 0x22a   :  { %v231_v0 = vsub.f32 1.5, %v230_v63 }
 0x22b   :  { %v255_v6 = vadd.f32 %v321_v36, %v247_v1 }
 0x22c   :  { %v232_v2 = vmul.f32 %v331_v54, %v231_v0 }
 0x22e   :  { %v236_v4 = vsel %vm235_vm15, %v331_v54, %v232_v2 }
 0x22f   :  { %v240_v5 = vmul.f32 %v236_v4, %v465_v8 }
 0x230   :  { %v274_v7 = vpop.permute.xlu1 %273 }
 0x231   :  { %v248_v9 = vmul.f32 %v320_v30, %v240_v5  ;;  %v283_v10 = vmul.f32 %v274_v7, %v255_v6 }
 0x233   :  { %v256_v11 = vadd.f32 %v321_v36, %v248_v9  ;;  %287 = vst.msk [vmem:[%s516_s8 + $0x10] sm:$0xff] %vm41_vm0, %v283_v10 }
 0x235   :  { %v284_v12 = vmul.f32 %v279_v3, %v256_v11 }
 0x237   :  { %288 = vst.msk [vmem:[%s516_s8 + $0x18] sm:$0x3] %vm154_vm2, %v284_v12 }

// kernel: forward.21
= control target key start
LH: loop header
LB: loop body
LE: loop exit
PB: predicated region body
PF: predicated region fallthrough
CT: control target
= control target key end

     0   :  { %vm76_vm0 = vcmask 1041408   ;;  %vm72_vm1 = vcmask 277504   ;;  %s1020_s0 = inlined_call_operand.vmem [shape: f32[2,34], index: 0, kind: input, shape index: {}]   ;;  %s1021_s1 = inlined_call_operand.vmem [shape: f32[34,768], index: 1, kind: input, shape index: {}]   ;;  %s1022_s2 = inlined_call_operand.vmem [shape: f32[1,768], index: 2, kind: input, shape index: {}]   ;;  %s1023_s3 = inlined_call_operand.vmem [shape: f32[1,768], index: 3, kind: input, shape index: {}]   ;;  %s1024_s4 = inlined_call_operand.vmem [shape: f32[1,768], index: 4, kind: input, shape index: {}]   ;;  %s1025_s5 = inlined_call_operand.vmem [shape: f32[768,12], index: 5, kind: input, shape index: {}]   ;;  %s1026_s6 = inlined_call_operand.vmem [shape: f32[1,12], index: 6, kind: input, shape index: {}]   ;;  %s1027_s7 = inlined_call_operand.hbm [shape: f32[2,12], index: 7, kind: output, shape index: {}]  }
   0x1   :  { %v52_v0 = vld [vmem:[%s1021_s1 + $0xc0] sm:$0x3]  ;;  %v46_v1 = vld [vmem:[%s1021_s1 + $0x90] sm:$0xff]  ;;  %v53_v2 = vld [vmem:[%s1021_s1 + $0xc8] sm:$0x3] }
   0x2   :  { %518 = vmatpush.msk.msra.mxu0 %vm76_vm0, %v52_v0  ;;  %520 = vmatpush.msk.msra.mxu1 %vm76_vm0, %v53_v2  ;;  %v47_v3 = vld [vmem:[%s1021_s1 + $0x98] sm:$0xff]  ;;  %v40_v4 = vld [vmem:[%s1021_s1 + $0x60] sm:$0xff]  ;;  %v41_v5 = vld [vmem:[%s1021_s1 + $0x68] sm:$0xff] }
   0x3   :  { %v34_v6 = vld [vmem:[%s1021_s1 + $0x30] sm:$0xff]  ;;  %v35_v7 = vld [vmem:[%s1021_s1 + $0x38] sm:$0xff]  ;;  %v28_v8 = vld [vmem:[%s1021_s1] sm:$0xff] }
   0x4   :  { %107 = vmatpush.msra.mxu0 %v46_v1  ;;  %127 = vmatpush.msra.mxu1 %v47_v3  ;;  %v29_v9 = vld [vmem:[%s1021_s1 + $0x8] sm:$0xff]  ;;  %v639_v10 = vld [vmem:[%s1020_s0] sm:$0x3]  ;;  %v54_v11 = vld [vmem:[%s1021_s1 + $0xd0] sm:$0x3] }
   0x5   :  { %v55_v12 = vld [vmem:[%s1021_s1 + $0xd8] sm:$0x3]  ;;  %v48_v13 = vld [vmem:[%s1021_s1 + $0xa0] sm:$0xff]  ;;  %v49_v14 = vld [vmem:[%s1021_s1 + $0xa8] sm:$0xff] }
   0x6   :  { %108 = vmatpush.msra.mxu0 %v40_v4  ;;  %128 = vmatpush.msra.mxu1 %v41_v5  ;;  %v276_v15 = vld [vmem:[%s1025_s5 + $0x78] sm:$0xff]  ;;  %v275_v16 = vld [vmem:[%s1025_s5 + $0x70] sm:$0xff]  ;;  %v274_v21 = vld [vmem:[%s1025_s5 + $0x68] sm:$0xff] }
   0x7   :  { %v292_v17 = vld [vmem:[%s1025_s5 + $0xf8] sm:$0xff]  ;;  %v291_v18 = vld [vmem:[%s1025_s5 + $0xf0] sm:$0xff]  ;;  %361 = vmatpush.msra.mxu2 %v276_v15  ;;  %v290_v22 = vld [vmem:[%s1025_s5 + $0xe8] sm:$0xff] }
   0x8   :  { %109 = vmatpush.msra.mxu0 %v34_v6  ;;  %129 = vmatpush.msra.mxu1 %v35_v7  ;;  %v42_v19 = vld [vmem:[%s1021_s1 + $0x70] sm:$0xff]  ;;  %v43_v20 = vld [vmem:[%s1021_s1 + $0x78] sm:$0xff]  ;;  %v36_v23 = vld [vmem:[%s1021_s1 + $0x40] sm:$0xff] }
   0x9   :  { %381 = vmatpush.msra.mxu3 %v292_v17  ;;  %v37_v24 = vld [vmem:[%s1021_s1 + $0x48] sm:$0xff]  ;;  %362 = vmatpush.msra.mxu2 %v275_v16  ;;  %v273_v25 = vld [vmem:[%s1025_s5 + $0x60] sm:$0xff]  ;;  %v30_v27 = vld [vmem:[%s1021_s1 + $0x10] sm:$0xff] }
   0xa   :  { %110 = vmatpush.msra.mxu0 %v28_v8  ;;  %130 = vmatpush.msra.mxu1 %v29_v9  ;;  %v289_v26 = vld [vmem:[%s1025_s5 + $0xe0] sm:$0xff]  ;;  %v31_v28 = vld [vmem:[%s1021_s1 + $0x18] sm:$0xff]  ;;  %v57_v30 = vld [vmem:[%s1021_s1 + $0xe8] sm:$0x3] }
   0xb   :  { %519 = vmatmul.msk.f32.vlgmr.msra.gmra.mxu0 %vm72_vm1, %v639_v10  ;;  %521 = vmatmul.msk.f32.vlgmr.msra.gmra.mxu1 %vm72_vm1, %v639_v10  ;;  %v56_v29 = vld [vmem:[%s1021_s1 + $0xe0] sm:$0x3]  ;;  %v50_v31 = vld [vmem:[%s1021_s1 + $0xb0] sm:$0xff]  ;;  %v51_v32 = vld [vmem:[%s1021_s1 + $0xb8] sm:$0xff] }
   0xc   :  { %522 = vmatpush.msk.msrb.mxu0 %vm76_vm0, %v54_v11  ;;  %524 = vmatpush.msk.msrb.mxu1 %vm76_vm0, %v55_v12  ;;  %v272_v33 = vld [vmem:[%s1025_s5 + $0x58] sm:$0xff]  ;;  %v44_v35 = vld [vmem:[%s1021_s1 + $0x80] sm:$0xff]  ;;  %v45_v36 = vld [vmem:[%s1021_s1 + $0x88] sm:$0xff] }
   0xd   :  { %382 = vmatpush.msra.mxu3 %v291_v18  ;;  %363 = vmatpush.msra.mxu2 %v274_v21  ;;  %v288_v34 = vld [vmem:[%s1025_s5 + $0xd8] sm:$0xff]  ;;  %v271_v37 = vld [vmem:[%s1025_s5 + $0x50] sm:$0xff]  ;;  %v270_v41 = vld [vmem:[%s1025_s5 + $0x48] sm:$0xff] }
   0xe   :  { %147 = vmatpush.msrb.mxu0 %v48_v13  ;;  %167 = vmatpush.msrb.mxu1 %v49_v14  ;;  %v287_v38 = vld [vmem:[%s1025_s5 + $0xd0] sm:$0xff]  ;;  %v39_v40 = vld [vmem:[%s1021_s1 + $0x58] sm:$0xff]  ;;  %v286_v42 = vld [vmem:[%s1025_s5 + $0xc8] sm:$0xff] }
   0xf   :  { %383 = vmatpush.msra.mxu3 %v290_v22  ;;  %364 = vmatpush.msra.mxu2 %v273_v25  ;;  %v38_v39 = vld [vmem:[%s1021_s1 + $0x50] sm:$0xff]  ;;  %v32_v43 = vld [vmem:[%s1021_s1 + $0x20] sm:$0xff]  ;;  %v33_v44 = vld [vmem:[%s1021_s1 + $0x28] sm:$0xff] }
  0x10   :  { %148 = vmatpush.msrb.mxu0 %v42_v19  ;;  %168 = vmatpush.msrb.mxu1 %v43_v20 }
  0x11   :  { %384 = vmatpush.msra.mxu3 %v289_v26  ;;  %365 = vmatpush.msra.mxu2 %v272_v33 }
  0x12   :  { %149 = vmatpush.msrb.mxu0 %v36_v23  ;;  %169 = vmatpush.msrb.mxu1 %v37_v24 }
  0x13   :  { %385 = vmatpush.msra.mxu3 %v288_v34  ;;  %366 = vmatpush.msra.mxu2 %v271_v37 }
  0x14   :  { %150 = vmatpush.msrb.mxu0 %v30_v27  ;;  %170 = vmatpush.msrb.mxu1 %v31_v28 }
  0x15   :  { %523 = vmatmul.msk.f32.vlgmr.msrb.gmra.mxu0 %vm72_vm1, %v639_v10  ;;  %525 = vmatmul.msk.f32.vlgmr.msrb.gmra.mxu1 %vm72_vm1, %v639_v10 }
  0x16   :  { %526 = vmatpush.msk.msra.mxu0 %vm76_vm0, %v56_v29  ;;  %528 = vmatpush.msk.msra.mxu1 %vm76_vm0, %v57_v30 }
  0x17   :  { %386 = vmatpush.msra.mxu3 %v287_v38 }
  0x18   :  { %187 = vmatpush.msra.mxu0 %v50_v31  ;;  %207 = vmatpush.msra.mxu1 %v51_v32 }
  0x1a   :  { %188 = vmatpush.msra.mxu0 %v44_v35  ;;  %208 = vmatpush.msra.mxu1 %v45_v36 }
  0x1c   :  { %189 = vmatpush.msra.mxu0 %v38_v39  ;;  %209 = vmatpush.msra.mxu1 %v39_v40 }
  0x1d   :  { %12 = vsyncpa [#allocation3], 0  ;;  %367 = vmatpush.msra.mxu2 %v270_v41  ;;  %v269_v45 = vld [vmem:[%s1025_s5 + $0x40] sm:$0xff]  ;;  %387 = vmatpush.msra.mxu3 %v286_v42  ;;  %v308_v47 = vld [vmem:[%s1025_s5 + $0x178] sm:$0xff]  ;;  %s509_s15 = sshll.u32 %s1027_s7, 4  ;;  %vm500_vm5 = vcmask 91136   ;;  %s510_s15 = int_to_ptr.hbm [resolvable:$true] %s509_s15 }
  0x1e   :  { %v285_v46 = vld [vmem:[%s1025_s5 + $0xc0] sm:$0xff]  ;;  %190 = vmatpush.msra.mxu0 %v32_v43  ;;  %210 = vmatpush.msra.mxu1 %v33_v44  ;;  %v324_v48 = vld [vmem:[%s1025_s5 + $0x1f8] sm:$0xff]  ;;  %v307_v51 = vld [vmem:[%s1025_s5 + $0x170] sm:$0xff] }
  0x1f   :  { %527 = vmatmul.msk.f32.vlgmr.msra.gmra.mxu0 %vm72_vm1, %v639_v10  ;;  %529 = vmatmul.msk.f32.vlgmr.msra.gmra.mxu1 %vm72_vm1, %v639_v10  ;;  %v268_v49 = vld [vmem:[%s1025_s5 + $0x38] sm:$0xff]  ;;  %v323_v52 = vld [vmem:[%s1025_s5 + $0x1f0] sm:$0xff]  ;;  %v306_v55 = vld [vmem:[%s1025_s5 + $0x168] sm:$0xff] }
  0x20   :  { %v284_v50 = vld [vmem:[%s1025_s5 + $0xb8] sm:$0xff]  ;;  %368 = vmatpush.msra.mxu2 %v269_v45  ;;  %388 = vmatpush.msra.mxu3 %v285_v46  ;;  %v267_v53 = vld [vmem:[%s1025_s5 + $0x30] sm:$0xff]  ;;  %v322_v56 = vld [vmem:[%s1025_s5 + $0x1e8] sm:$0xff] }
  0x21   :  { %v283_v54 = vld [vmem:[%s1025_s5 + $0xb0] sm:$0xff]  ;;  %401 = vmatpush.msrb.mxu0 %v308_v47  ;;  %421 = vmatpush.msrb.mxu1 %v324_v48  ;;  %v266_v57 = vld [vmem:[%s1025_s5 + $0x28] sm:$0xff]  ;;  %v305_v59 = vld [vmem:[%s1025_s5 + $0x160] sm:$0xff] }
  0x22   :  { %369 = vmatpush.msra.mxu2 %v268_v49  ;;  %389 = vmatpush.msra.mxu3 %v284_v50  ;;  %v282_v58 = vld [vmem:[%s1025_s5 + $0xa8] sm:$0xff]  ;;  %v321_v60 = vld [vmem:[%s1025_s5 + $0x1e0] sm:$0xff]  ;;  %v304_v63 = vld [vmem:[%s1025_s5 + $0x158] sm:$0xff] }
  0x23   :  { %402 = vmatpush.msrb.mxu0 %v307_v51  ;;  %422 = vmatpush.msrb.mxu1 %v323_v52  ;;  %v265_v61 = vld [vmem:[%s1025_s5 + $0x20] sm:$0xff]  ;;  %v320_v0 = vld [vmem:[%s1025_s5 + $0x1d8] sm:$0xff]  ;;  %v303_v3 = vld [vmem:[%s1025_s5 + $0x150] sm:$0xff] }
  0x24   :  { %370 = vmatpush.msra.mxu2 %v267_v53  ;;  %390 = vmatpush.msra.mxu3 %v283_v54  ;;  %v281_v62 = vld [vmem:[%s1025_s5 + $0xa0] sm:$0xff]  ;;  %v264_v1 = vld [vmem:[%s1025_s5 + $0x18] sm:$0xff]  ;;  %v263_v4 = vld [vmem:[%s1025_s5 + $0x10] sm:$0xff] }
  0x25   :  { %403 = vmatpush.msrb.mxu0 %v306_v55  ;;  %423 = vmatpush.msrb.mxu1 %v322_v56  ;;  %v280_v2 = vld [vmem:[%s1025_s5 + $0x98] sm:$0xff]  ;;  %v279_v5 = vld [vmem:[%s1025_s5 + $0x90] sm:$0xff]  ;;  %v262_v6 = vld [vmem:[%s1025_s5 + $0x8] sm:$0xff] }
  0x26   :  { %371 = vmatpush.msra.mxu2 %v266_v57  ;;  %391 = vmatpush.msra.mxu3 %v282_v58  ;;  %v278_v7 = vld [vmem:[%s1025_s5 + $0x88] sm:$0xff]  ;;  %v261_v8 = vld [vmem:[%s1025_s5] sm:$0xff]  ;;  %v340_v10 = vld [vmem:[%s1025_s5 + $0x278] sm:$0xff] }
  0x27   :  { %404 = vmatpush.msrb.mxu0 %v305_v59  ;;  %424 = vmatpush.msrb.mxu1 %v321_v60  ;;  %v277_v9 = vld [vmem:[%s1025_s5 + $0x80] sm:$0xff]  ;;  %v356_v11 = vld [vmem:[%s1025_s5 + $0x2f8] sm:$0xff]  ;;  %v339_v12 = vld [vmem:[%s1025_s5 + $0x270] sm:$0xff] }
  0x28   :  { %372 = vmatpush.msra.mxu2 %v265_v61  ;;  %392 = vmatpush.msra.mxu3 %v281_v62  ;;  %v302_v13 = vld [vmem:[%s1025_s5 + $0x148] sm:$0xff]  ;;  %v319_v14 = vld [vmem:[%s1025_s5 + $0x1d0] sm:$0xff]  ;;  %v301_v17 = vld [vmem:[%s1025_s5 + $0x140] sm:$0xff] }
  0x29   :  { %405 = vmatpush.msrb.mxu0 %v304_v63  ;;  %425 = vmatpush.msrb.mxu1 %v320_v0  ;;  %v338_v15 = vld [vmem:[%s1025_s5 + $0x268] sm:$0xff]  ;;  %v355_v16 = vld [vmem:[%s1025_s5 + $0x2f0] sm:$0xff]  ;;  %v337_v19 = vld [vmem:[%s1025_s5 + $0x260] sm:$0xff] }
  0x2a   :  { %373 = vmatpush.msra.mxu2 %v264_v1  ;;  %393 = vmatpush.msra.mxu3 %v280_v2  ;;  %v318_v18 = vld [vmem:[%s1025_s5 + $0x1c8] sm:$0xff]  ;;  %v300_v21 = vld [vmem:[%s1025_s5 + $0x138] sm:$0xff]  ;;  %v317_v22 = vld [vmem:[%s1025_s5 + $0x1c0] sm:$0xff] }
  0x2b   :  { %406 = vmatpush.msrb.mxu0 %v303_v3  ;;  %426 = vmatpush.msrb.mxu1 %v319_v14  ;;  %v354_v20 = vld [vmem:[%s1025_s5 + $0x2e8] sm:$0xff]  ;;  %v336_v23 = vld [vmem:[%s1025_s5 + $0x258] sm:$0xff]  ;;  %v353_v24 = vld [vmem:[%s1025_s5 + $0x2e0] sm:$0xff] }
  0x2c   :  { %374 = vmatpush.msra.mxu2 %v263_v4  ;;  %394 = vmatpush.msra.mxu3 %v279_v5  ;;  %v299_v25 = vld [vmem:[%s1025_s5 + $0x130] sm:$0xff]  ;;  %v316_v26 = vld [vmem:[%s1025_s5 + $0x1b8] sm:$0xff]  ;;  %v298_v29 = vld [vmem:[%s1025_s5 + $0x128] sm:$0xff] }
  0x2d   :  { %407 = vmatpush.msrb.mxu0 %v302_v13  ;;  %427 = vmatpush.msrb.mxu1 %v318_v18  ;;  %v335_v27 = vld [vmem:[%s1025_s5 + $0x250] sm:$0xff]  ;;  %v352_v28 = vld [vmem:[%s1025_s5 + $0x2d8] sm:$0xff]  ;;  %v334_v31 = vld [vmem:[%s1025_s5 + $0x248] sm:$0xff] }
  0x2e   :  { %375 = vmatpush.msra.mxu2 %v262_v6  ;;  %395 = vmatpush.msra.mxu3 %v278_v7  ;;  %v315_v30 = vld [vmem:[%s1025_s5 + $0x1b0] sm:$0xff]  ;;  %v297_v33 = vld [vmem:[%s1025_s5 + $0x120] sm:$0xff]  ;;  %v314_v34 = vld [vmem:[%s1025_s5 + $0x1a8] sm:$0xff] }
  0x2f   :  { %408 = vmatpush.msrb.mxu0 %v301_v17  ;;  %428 = vmatpush.msrb.mxu1 %v317_v22  ;;  %v351_v32 = vld [vmem:[%s1025_s5 + $0x2d0] sm:$0xff]  ;;  %v333_v35 = vld [vmem:[%s1025_s5 + $0x240] sm:$0xff]  ;;  %v350_v36 = vld [vmem:[%s1025_s5 + $0x2c8] sm:$0xff] }
  0x30   :  { %376 = vmatpush.msra.mxu2 %v261_v8  ;;  %396 = vmatpush.msra.mxu3 %v277_v9  ;;  %v296_v37 = vld [vmem:[%s1025_s5 + $0x118] sm:$0xff]  ;;  %v313_v38 = vld [vmem:[%s1025_s5 + $0x1a0] sm:$0xff]  ;;  %v295_v41 = vld [vmem:[%s1025_s5 + $0x110] sm:$0xff] }
  0x31   :  { %409 = vmatpush.msrb.mxu0 %v300_v21  ;;  %429 = vmatpush.msrb.mxu1 %v316_v26  ;;  %v332_v39 = vld [vmem:[%s1025_s5 + $0x238] sm:$0xff]  ;;  %v349_v40 = vld [vmem:[%s1025_s5 + $0x2c0] sm:$0xff]  ;;  %v331_v43 = vld [vmem:[%s1025_s5 + $0x230] sm:$0xff] }
  0x32   :  { %441 = vmatpush.msrb.mxu2 %v340_v10  ;;  %461 = vmatpush.msrb.mxu3 %v356_v11  ;;  %v312_v42 = vld [vmem:[%s1025_s5 + $0x198] sm:$0xff]  ;;  %v294_v45 = vld [vmem:[%s1025_s5 + $0x108] sm:$0xff]  ;;  %v311_v46 = vld [vmem:[%s1025_s5 + $0x190] sm:$0xff] }
  0x33   :  { %410 = vmatpush.msrb.mxu0 %v299_v25  ;;  %430 = vmatpush.msrb.mxu1 %v315_v30  ;;  %v348_v44 = vld [vmem:[%s1025_s5 + $0x2b8] sm:$0xff]  ;;  %v330_v47 = vld [vmem:[%s1025_s5 + $0x228] sm:$0xff]  ;;  %v347_v48 = vld [vmem:[%s1025_s5 + $0x2b0] sm:$0xff] }
  0x34   :  { %442 = vmatpush.msrb.mxu2 %v339_v12  ;;  %462 = vmatpush.msrb.mxu3 %v355_v16  ;;  %v293_v49 = vld [vmem:[%s1025_s5 + $0x100] sm:$0xff]  ;;  %v310_v50 = vld [vmem:[%s1025_s5 + $0x188] sm:$0xff]  ;;  %v328_v54 = vld [vmem:[%s1025_s5 + $0x218] sm:$0xff] }
  0x35   :  { %411 = vmatpush.msrb.mxu0 %v298_v29  ;;  %431 = vmatpush.msrb.mxu1 %v314_v34  ;;  %v329_v51 = vld [vmem:[%s1025_s5 + $0x220] sm:$0xff]  ;;  %v346_v52 = vld [vmem:[%s1025_s5 + $0x2a8] sm:$0xff]  ;;  %v327_v56 = vld [vmem:[%s1025_s5 + $0x210] sm:$0xff] }
  0x36   :  { %443 = vmatpush.msrb.mxu2 %v338_v15  ;;  %463 = vmatpush.msrb.mxu3 %v354_v20  ;;  %v309_v53 = vld [vmem:[%s1025_s5 + $0x180] sm:$0xff]  ;;  %v344_v57 = vld [vmem:[%s1025_s5 + $0x298] sm:$0xff]  ;;  %v326_v58 = vld [vmem:[%s1025_s5 + $0x208] sm:$0xff] }
  0x37   :  { %412 = vmatpush.msrb.mxu0 %v297_v33  ;;  %432 = vmatpush.msrb.mxu1 %v313_v38  ;;  %v345_v55 = vld [vmem:[%s1025_s5 + $0x2a0] sm:$0xff]  ;;  %v343_v59 = vld [vmem:[%s1025_s5 + $0x290] sm:$0xff]  ;;  %v342_v61 = vld [vmem:[%s1025_s5 + $0x288] sm:$0xff] }
  0x38   :  { %444 = vmatpush.msrb.mxu2 %v337_v19  ;;  %464 = vmatpush.msrb.mxu3 %v353_v24  ;;  %v325_v60 = vld [vmem:[%s1025_s5 + $0x200] sm:$0xff] }
  0x39   :  { %413 = vmatpush.msrb.mxu0 %v296_v37  ;;  %433 = vmatpush.msrb.mxu1 %v312_v42  ;;  %v58_v62 = vld [vmem:[%s1022_s2] sm:$0x3f] }
  0x3a   :  { %445 = vmatpush.msrb.mxu2 %v336_v23  ;;  %465 = vmatpush.msrb.mxu3 %v352_v28  ;;  %v215_v63 = vld [vmem:[%s1023_s3] sm:$0x3f]  ;;  %v60_v1 = vperm.slane %v58_v62, 0  ;;  %v61_v2 = vperm.slane %v58_v62, 1  ;;  %v62_v18 = vperm.slane %v58_v62, 2  ;;  %v63_v19 = vperm.slane %v58_v62, 3 }
  0x3b   :  { %414 = vmatpush.msrb.mxu0 %v295_v41  ;;  %434 = vmatpush.msrb.mxu1 %v311_v46  ;;  %v341_v0 = vld [vmem:[%s1025_s5 + $0x280] sm:$0xff]  ;;  %v217_v4 = vperm.slane %v215_v63, 0  ;;  %v218_v5 = vperm.slane %v215_v63, 1  ;;  %v219_v20 = vperm.slane %v215_v63, 2  ;;  %v220_v21 = vperm.slane %v215_v63, 3 }
  0x3c   :  { %446 = vmatpush.msrb.mxu2 %v335_v27  ;;  %466 = vmatpush.msrb.mxu3 %v351_v32  ;;  %v235_v3 = vld [vmem:[%s1024_s4] sm:$0x3f]  ;;  %v64_v32 = vperm.slane %v58_v62, 4  ;;  %v65_v33 = vperm.slane %v58_v62, 5  ;;  %v222_v37 = vperm.slane %v215_v63, 5  ;;  %s563_s4 = smov [#allocation2]  }
  0x3d   :  { %415 = vmatpush.msrb.mxu0 %v294_v45  ;;  %435 = vmatpush.msrb.mxu1 %v310_v50  ;;  %v237_v10 = vperm.slane %v235_v3, 0  ;;  %v238_v11 = vperm.slane %v235_v3, 1  ;;  %v239_v25 = vperm.slane %v235_v3, 2  ;;  %v240_v27 = vperm.slane %v235_v3, 3  ;;  %v532_v50 = vld [vmem:[%s1026_s6] ss:$0 sm:$0xff] }
  0x3e   :  { %447 = vmatpush.msrb.mxu2 %v334_v31  ;;  %467 = vmatpush.msrb.mxu3 %v350_v36  ;;  %v221_v36 = vperm.slane %v215_v63, 4  ;;  %v241_v42 = vperm.slane %v235_v3, 4  ;;  %s507_s5 = sshll.u32 %s563_s4, 4  ;;  %s508_s5 = int_to_ptr.vmem [resolvable:$true] %s507_s5 }
  0x3f   :  { %416 = vmatpush.msrb.mxu0 %v293_v49  ;;  %436 = vmatpush.msrb.mxu1 %v309_v53 }
  0x40   :  { %448 = vmatpush.msrb.mxu2 %v333_v35  ;;  %468 = vmatpush.msrb.mxu3 %v349_v40 }
  0x42   :  { %449 = vmatpush.msrb.mxu2 %v332_v39  ;;  %469 = vmatpush.msrb.mxu3 %v348_v44 }
  0x44   :  { %450 = vmatpush.msrb.mxu2 %v331_v43  ;;  %470 = vmatpush.msrb.mxu3 %v347_v48  ;;  %v242_v43 = vperm.slane %v235_v3, 5 }
  0x46   :  { %451 = vmatpush.msrb.mxu2 %v330_v47  ;;  %471 = vmatpush.msrb.mxu3 %v346_v52 }
  0x48   :  { %452 = vmatpush.msrb.mxu2 %v329_v51  ;;  %472 = vmatpush.msrb.mxu3 %v345_v55 }
  0x4a   :  { %453 = vmatpush.msrb.mxu2 %v328_v54  ;;  %473 = vmatpush.msrb.mxu3 %v344_v57 }
  0x4c   :  { %454 = vmatpush.msrb.mxu2 %v327_v56  ;;  %474 = vmatpush.msrb.mxu3 %v343_v59 }
  0x4e   :  { %455 = vmatpush.msrb.mxu2 %v326_v58  ;;  %475 = vmatpush.msrb.mxu3 %v342_v61 }
  0x50   :  { %456 = vmatpush.msrb.mxu2 %v325_v60  ;;  %476 = vmatpush.msrb.mxu3 %v341_v0 }
  0x88   :  { %v112_v6 = vpop.f32.mrf.mxu0  ;;  %v132_v7 = vpop.f32.mrf.mxu1 }
  0x89   :  { %v113_v8 = vadd.f32 %v112_v6, %v60_v1  ;;  %v133_v9 = vadd.f32 %v132_v7, %v61_v2 }
  0x8b   :  { %v229_v12 = vmul.f32 %v217_v4, %v113_v8  ;;  %v230_v13 = vmul.f32 %v218_v5, %v133_v9 }
  0x8d   :  { %v249_v14 = vadd.f32 %v237_v10, %v229_v12  ;;  %v250_v15 = vadd.f32 %v238_v11, %v230_v13 }
  0x8f   :  { %v255_v16 = vmax.f32 %v249_v14, 0.0  ;;  %v256_v17 = vmax.f32 %v250_v15, 0.0 }
  0x91   :  { %377 = vmatmul.f32.vlgmr.msra.gmra.mxu2 %v255_v16  ;;  %397 = vmatmul.f32.vlgmr.msra.gmra.mxu3 %v256_v17 }
  0x92   :  { %v152_v22 = vpop.f32.mrf.mxu0  ;;  %v172_v23 = vpop.f32.mrf.mxu1 }
  0x93   :  { %v153_v24 = vadd.f32 %v152_v22, %v62_v18  ;;  %v173_v26 = vadd.f32 %v172_v23, %v63_v19 }
  0x95   :  { %v231_v28 = vmul.f32 %v219_v20, %v153_v24  ;;  %v232_v29 = vmul.f32 %v220_v21, %v173_v26 }
  0x97   :  { %v251_v30 = vadd.f32 %v239_v25, %v231_v28  ;;  %v252_v31 = vadd.f32 %v240_v27, %v232_v29 }
  0x99   :  { %v257_v34 = vmax.f32 %v251_v30, 0.0  ;;  %v258_v35 = vmax.f32 %v252_v31, 0.0 }
  0x9b   :  { %417 = vmatmul.f32.vlgmr.msrb.gmra.mxu0 %v257_v34  ;;  %437 = vmatmul.f32.vlgmr.msrb.gmra.mxu1 %v258_v35 }
  0x9c   :  { %v192_v38 = vpop.f32.mrf.mxu0  ;;  %v212_v39 = vpop.f32.mrf.mxu1 }
  0x9d   :  { %v193_v40 = vadd.f32 %v192_v38, %v64_v32  ;;  %v213_v41 = vadd.f32 %v212_v39, %v65_v33 }
  0x9f   :  { %v233_v44 = vmul.f32 %v221_v36, %v193_v40  ;;  %v234_v45 = vmul.f32 %v222_v37, %v213_v41 }
  0xa1   :  { %v253_v46 = vadd.f32 %v241_v42, %v233_v44  ;;  %v254_v47 = vadd.f32 %v242_v43, %v234_v45 }
  0xa3   :  { %v259_v48 = vmax.f32 %v253_v46, 0.0  ;;  %v260_v49 = vmax.f32 %v254_v47, 0.0 }
  0xa5   :  { %457 = vmatmul.f32.vlgmr.msrb.gmra.mxu2 %v259_v48  ;;  %477 = vmatmul.f32.vlgmr.msrb.gmra.mxu3 %v260_v49 }
 0x114   :  { %v378_v51 = vpop.f32.mrf.mxu2  ;;  %v398_v53 = vpop.f32.mrf.mxu3 }
 0x115   :  { %v379_v52 = vadd.f32 %v532_v50, %v378_v51 }
 0x117   :  { %v399_v54 = vadd.f32 %v398_v53, %v379_v52 }
 0x118   :  { %v418_v55 = vpop.f32.mrf.mxu0  ;;  %v438_v57 = vpop.f32.mrf.mxu1 }
 0x119   :  { %v419_v56 = vadd.f32 %v418_v55, %v399_v54 }
 0x11b   :  { %v439_v58 = vadd.f32 %v438_v57, %v419_v56 }
 0x128   :  { %v458_v59 = vpop.f32.mrf.mxu2  ;;  %v478_v60 = vpop.f32.mrf.mxu3 }
 0x129   :  { %v459_v61 = vadd.f32 %v458_v59, %v439_v58 }
 0x12b   :  { %v479_v62 = vadd.f32 %v478_v60, %v459_v61 }
 0x12d   :  { %v530_v63 = vmul.f32 -1.442695, %v479_v62 }
 0x12f   :  { %533 = vpow2.f32 %v530_v63 }
 0x135   :  { %v534_v0 = vpop.eup %533 }
 0x136   :  { %v484_v1 = vadd.f32 1.0, %v534_v0 }
 0x138   :  { %535 = vrcp.f32 %v484_v1  ;;  %v496_v5 = vand.u32 2147483648, %v484_v1  ;;  %v494_v7 = vand.u32 2147483647, %v484_v1  ;;  %vm490_vm3 = vweird.f32 %v484_v1 }
 0x13a   :  { %v497_v9 = vor.u32 1.1754944e-38, %v496_v5  ;;  %vm495_vm6 = vcmp.eq.f32.partialorder %v494_v7, 8.507059e+37 }
 0x13e   :  { %v536_v2 = vpop.eup %535 }
 0x13f   :  { %v486_v3 = vmul.f32 %v536_v2, %v484_v1  ;;  %vm491_vm2 = vweird.f32 %v536_v2 }
 0x140   :  { %vm492_vm4 = vmor %vm490_vm3, %vm491_vm2 }
 0x141   :  { %v487_v4 = vsub.f32 1.0, %v486_v3 }
 0x143   :  { %v488_v6 = vmul.f32 %v536_v2, %v487_v4 }
 0x145   :  { %v489_v8 = vadd.f32 %v536_v2, %v488_v6 }
 0x147   :  { %v493_v10 = vsel %vm492_vm4, %v536_v2, %v489_v8 }
 0x148   :  { %v498_v11 = vsel %vm495_vm6, %v497_v9, %v493_v10 }
 0x149   :  { %501 = vst.msk [vmem:[#allocation2] sm:$0x3] %vm500_vm5, %v498_v11 }
 0x14a   :  { %512 = dma.vmem_to_hbm [thread:$0]  %s508_s5, 32, %s510_s15, [#allocation3]  }
 0x14b   :  { %561 = dma.done.wait [#allocation3], 32  }
 0x14c   :  { %562 = vsyncadd [#allocation3], 4294967264 }
 0x14d   :  { %517 = vsyncpa [#allocation3], 1 }

</bundles_post_ra>
